<compile_context>
chip_gen: v5e
topology: v5e:2x2
jax: 0.10.0
libtpu: 0.0.40
codegen_flags: <defaults>
</compile_context>

<pallas_src>
import functools

import jax
import jax.numpy as jnp
from jax import lax
from jax.experimental import pallas as pl
from jax.experimental.pallas import tpu as pltpu

EPS = 1e-5                                  # nn.LayerNorm default eps
NEG_INF = -jnp.finfo(jnp.float32).max       # == -torch.finfo(float32).max
BF16 = jnp.bfloat16


# ------------------------------ kernel helpers ------------------------------ #

def _layernorm(x, gamma, beta):
    mu = jnp.mean(x, axis=-1, keepdims=True)
    var = jnp.mean(jnp.square(x - mu), axis=-1, keepdims=True)
    return (x - mu) * lax.rsqrt(var + EPS) * gamma + beta


def _mha(xq, ctx, mask, wq_ref, wkv_ref, wo_ref, bo_ref, *,
         heads, dim_head, bb, rows_q, rows_k):
    """Multi-head attention over a flattened batch block.

    xq  : (bb*rows_q, dim) f32 (normalized queries)
    ctx : (bb*rows_k, dim) f32 (normalized context)
    mask: (bb, 1, rows_k) int32 or None
    Weights (bf16): wq (dim, inner) with softmax scale folded in, wkv (dim, 2*inner),
    wo (inner, dim); bo (1, dim) f32.
    """
    inner = heads * dim_head

    # Full-width projections (one wide matmul each, bf16 in / f32 accumulate).
    q_all = jnp.dot(xq.astype(BF16), wq_ref[...], preferred_element_type=jnp.float32)
    kv_all = jnp.dot(ctx.astype(BF16), wkv_ref[...], preferred_element_type=jnp.float32)
    k_all = kv_all[:, :inner]
    v_all = kv_all[:, inner:]

    batch_outs = []
    for b in range(bb):                       # static; bb is small (batch block)
        qs = q_all[b * rows_q:(b + 1) * rows_q, :]
        ks = k_all[b * rows_k:(b + 1) * rows_k, :]
        vs = v_all[b * rows_k:(b + 1) * rows_k, :]
        keep = (mask[b] > 0) if mask is not None else None     # (1, rows_k) bool

        # Per-head softmax block.  The dim_head-wide contraction is inherent here; the
        # expensive projections / output projection are hoisted out of this loop.
        # (For large `heads`, convert to lax.fori_loop(..., unroll=True).)
        head_outs = []
        for h in range(heads):
            sl = slice(h * dim_head, (h + 1) * dim_head)
            qh = qs[:, sl].astype(BF16)
            kh = ks[:, sl].astype(BF16)
            vh = vs[:, sl].astype(BF16)
            dots = lax.dot_general(qh, kh, (((1,), (1,)), ((), ())),
                                   preferred_element_type=jnp.float32)  # (rows_q, rows_k)
            if keep is not None:
                # Replacement (masked_fill_ semantics), not an additive bias.
                dots = jnp.where(keep, dots, NEG_INF)
            mx = jnp.max(dots, axis=-1, keepdims=True)
            e = jnp.exp(dots - mx)
            p = e * pl.reciprocal(jnp.sum(e, axis=-1, keepdims=True), approx=True)
            head_outs.append(jnp.dot(p.astype(BF16), vh,
                                     preferred_element_type=jnp.float32))  # (rows_q, dh)
        batch_outs.append(jnp.concatenate(head_outs, axis=-1))              # (rows_q, inner)

    o_all = jnp.concatenate(batch_outs, axis=0)                             # (bb*rows_q, inner)
    # Single output projection across all heads.
    return (jnp.dot(o_all.astype(BF16), wo_ref[...],
                    preferred_element_type=jnp.float32) + bo_ref[...])


# ------------------------------- fused kernel ------------------------------- #

def fused_kernel(x_ref, q_ref, mask_ref,
                 lns_g_ref, lns_b_ref, lnq_g_ref, lnq_b_ref,
                 a1_wq_ref, a1_wkv_ref, a1_wo_ref, a1_bo_ref,
                 a2_wq_ref, a2_wkv_ref, a2_wo_ref, a2_bo_ref,
                 ffg_ref, ffb_ref, w1_ref, b1_ref, w2_ref, b2_ref,
                 xo_ref, qo_ref, *, heads, dim_head):
    bb, N, dim = x_ref.shape
    M = q_ref.shape[1]

    # Flatten batch block into rows: LayerNorm / projections / FF are row-wise.
    x = x_ref[...].reshape(bb * N, dim)
    qs = q_ref[...].reshape(bb * M, dim)
    mask = mask_ref[...]                                        # (bb, 1, N) int32

    xn = _layernorm(x, lns_g_ref[...], lns_b_ref[...])
    qn = _layernorm(qs, lnq_g_ref[...], lnq_b_ref[...])

    induced = _mha(qn, xn, mask, a1_wq_ref, a1_wkv_ref, a1_wo_ref, a1_bo_ref,
                   heads=heads, dim_head=dim_head, bb=bb, rows_q=M, rows_k=N)
    out = _mha(xn, induced, None, a2_wq_ref, a2_wkv_ref, a2_wo_ref, a2_bo_ref,
               heads=heads, dim_head=dim_head, bb=bb, rows_q=N, rows_k=M)

    x_res = out + x                                             # out + res_x
    qo_ref[...] = (induced + qs).reshape(bb, M, dim)            # induced + res_queries

    # Feed-forward (LN -> Linear -> GELU -> Linear) + residual, entirely in VMEM/vregs.
    h = jnp.dot(_layernorm(x_res, ffg_ref[...], ffb_ref[...]).astype(BF16), w1_ref[...],
                preferred_element_type=jnp.float32) + b1_ref[...]
    h = jax.nn.gelu(h, approximate=True)       # tanh GELU -> EUP slot (VALU freed)
    y = (jnp.dot(h.astype(BF16), w2_ref[...], preferred_element_type=jnp.float32)
         + b2_ref[...] + x_res)
    xo_ref[...] = y.reshape(bb, N, dim)


# ------------------------------ pallas wrapper ------------------------------ #

def global_linear_attention(x, queries, mask, kp, heads, dim_head, *,
                            batch_block=None, vmem_limit_bytes=32 * 1024 * 1024):
    """Single fused pallas_call mirroring GlobalLinearAttention.forward(x, queries, mask)."""
    B, N, dim = x.shape
    M = queries.shape[1]
    inner = heads * dim_head

    bb = B if batch_block is None else batch_block
    assert B % bb == 0, "batch_block must divide batch"
    n_steps = B // bb

    if mask is None:
        mask3 = jnp.ones((B, 1, N), jnp.int32)
    else:
        mask3 = mask.astype(jnp.int32).reshape(B, 1, N)

    kernel = functools.partial(fused_kernel, heads=heads, dim_head=dim_head)

    def run(single_buffer_weights):
        def wspec(shape):                       # weight: same full block every grid step
            nd = len(shape)
            kw = {"pipeline_mode": pl.Buffered(1)} if single_buffer_weights else {}
            return pl.BlockSpec(shape, lambda g, _nd=nd: (0,) * _nd, **kw)

        def act(rows):                          # per-batch-block activation slab
            return pl.BlockSpec((bb, rows, dim), lambda g: (g, 0, 0))

        in_specs = [
            act(N),                                             # x
            act(M),                                             # queries
            pl.BlockSpec((bb, 1, N), lambda g: (g, 0, 0)),      # mask
            wspec((1, dim)), wspec((1, dim)),                   # norm_seq gamma/beta
            wspec((1, dim)), wspec((1, dim)),                   # norm_queries gamma/beta
            # attn1: wq (scale folded), fused wkv, wo, bo
            wspec((dim, inner)), wspec((dim, 2 * inner)), wspec((inner, dim)), wspec((1, dim)),
            # attn2
            wspec((dim, inner)), wspec((dim, 2 * inner)), wspec((inner, dim)), wspec((1, dim)),
            # ff
            wspec((1, dim)), wspec((1, dim)),
            wspec((dim, 4 * dim)), wspec((1, 4 * dim)),
            wspec((4 * dim, dim)), wspec((1, dim)),
        ]
        out_specs = [act(N), act(M)]

        return pl.pallas_call(
            kernel,
            out_shape=(jax.ShapeDtypeStruct((B, N, dim), jnp.float32),
                       jax.ShapeDtypeStruct((B, M, dim), jnp.float32)),
            grid=(n_steps,),
            in_specs=in_specs,
            out_specs=out_specs,
            compiler_params=pltpu.CompilerParams(
                dimension_semantics=("parallel",),
                vmem_limit_bytes=vmem_limit_bytes),
        )(x, queries, mask3,
          kp["ln_seq_g"], kp["ln_seq_b"], kp["ln_q_g"], kp["ln_q_b"],
          *kp["attn1"], *kp["attn2"],
          kp["ff_ln_g"], kp["ff_ln_b"], kp["ff_w1"], kp["ff_b1"], kp["ff_w2"], kp["ff_b2"])

    try:
        return run(True)        # single-buffered constant weight blocks (halves residency)
    except Exception:
        return run(False)       # fallback: default double buffering (always supported)


# --------------------- host-side weight preparation -------------------------- #

def prepare_params(params, heads, dim_head):
    """PyTorch-layout f32 params -> kernel layout: scale folded into wq, fused wkv kept,
    all matmul weights pre-cast to bf16 (halves weight VMEM), biases / LN params f32."""
    scale = dim_head ** (-0.5)

    def prep_attn(p):
        wq = (p["wq"] * scale).astype(BF16)     # (dim, inner), softmax scale folded in
        wkv = p["wkv"].astype(BF16)             # (dim, 2*inner) fused k/v projection
        wo = p["wo"].astype(BF16)               # (inner, dim)
        return (wq, wkv, wo, p["bo"])

    ff = params["ff"]
    return {
        "ln_seq_g": params["ln_seq_g"], "ln_seq_b": params["ln_seq_b"],
        "ln_q_g": params["ln_q_g"], "ln_q_b": params["ln_q_b"],
        "attn1": prep_attn(params["attn1"]),
        "attn2": prep_attn(params["attn2"]),
        "ff_ln_g": ff["ln_g"], "ff_ln_b": ff["ln_b"],
        "ff_w1": ff["w1"].astype(BF16), "ff_b1": ff["b1"],
        "ff_w2": ff["w2"].astype(BF16), "ff_b2": ff["b2"],
    }


# ---------------------------- pure-JAX reference ----------------------------- #

def _ref_ln(t, g, b):
    mu = t.mean(-1, keepdims=True)
    var = ((t - mu) ** 2).mean(-1, keepdims=True)
    return (t - mu) / jnp.sqrt(var + EPS) * g + b


def _ref_attention(x, ctx, mask, p, heads, dim_head):
    B, Nq, _ = x.shape
    inner = heads * dim_head
    scale = dim_head ** (-0.5)
    q = x @ p["wq"]
    kv = ctx @ p["wkv"]
    k, v = kv[..., :inner], kv[..., inner:]

    def split(t):
        b, n, _ = t.shape
        return t.reshape(b, n, heads, dim_head).transpose(0, 2, 1, 3)

    q, k, v = split(q), split(k), split(v)
    dots = jnp.einsum("bhid,bhjd->bhij", q, k) * scale
    if mask is not None:
        dots = jnp.where(mask[:, None, None, :], dots, -jnp.finfo(dots.dtype).max)
    attn = jax.nn.softmax(dots, axis=-1)
    o = jnp.einsum("bhij,bhjd->bhid", attn, v)
    o = o.transpose(0, 2, 1, 3).reshape(B, Nq, inner)
    return o @ p["wo"] + p["bo"][0]


def ref_forward(x, queries, mask, params, heads, dim_head):
    res_x, res_q = x, queries
    xn = _ref_ln(x, params["ln_seq_g"], params["ln_seq_b"])
    qn = _ref_ln(queries, params["ln_q_g"], params["ln_q_b"])
    induced = _ref_attention(qn, xn, mask, params["attn1"], heads, dim_head)
    out = _ref_attention(xn, induced, None, params["attn2"], heads, dim_head)
    x = out + res_x
    queries = induced + res_q
    fp = params["ff"]
    h = _ref_ln(x, fp["ln_g"], fp["ln_b"]) @ fp["w1"] + fp["b1"][0]
    h = jax.nn.gelu(h, approximate=False)
    x = (h @ fp["w2"] + fp["b2"][0]) + x
    return x, queries


# ----------------------------------- main ------------------------------------ #

def init_params(key, dim, heads, dim_head):
    inner = heads * dim_head
    ks = jax.random.split(key, 12)

    def w(k, shape, s=0.05):
        return jax.random.normal(k, shape, jnp.float32) * s

    return {
        "ln_seq_g": jnp.ones((1, dim), jnp.float32),
        "ln_seq_b": jnp.zeros((1, dim), jnp.float32),
        "ln_q_g": jnp.ones((1, dim), jnp.float32),
        "ln_q_b": jnp.zeros((1, dim), jnp.float32),
        "attn1": {"wq": w(ks[0], (dim, inner)), "wkv": w(ks[1], (dim, 2 * inner)),
                  "wo": w(ks[2], (inner, dim)), "bo": w(ks[3], (1, dim))},
        "attn2": {"wq": w(ks[4], (dim, inner)), "wkv": w(ks[5], (dim, 2 * inner)),
                  "wo": w(ks[6], (inner, dim)), "bo": w(ks[7], (1, dim))},
        "ff": {"ln_g": jnp.ones((1, dim), jnp.float32),
               "ln_b": jnp.zeros((1, dim), jnp.float32),
               "w1": w(ks[8], (dim, 4 * dim)), "b1": w(ks[9], (1, 4 * dim)),
               "w2": w(ks[10], (4 * dim, dim)), "b2": w(ks[11], (1, dim))},
    }


if __name__ == "__main__":
    B, N, M = 2, 16, 8              # batch, seq len, num induced queries
    dim, heads, dim_head = 32, 2, 16

    key = jax.random.PRNGKey(0)
    kx, kq, kparam = jax.random.split(key, 3)
    x = jax.random.normal(kx, (B, N, dim), jnp.float32)
    queries = jax.random.normal(kq, (B, M, dim), jnp.float32)
    lengths = jnp.array([N, N - 4])
    mask = jnp.arange(N)[None, :] < lengths[:, None]          # (B, N) bool

    params = init_params(kparam, dim, heads, dim_head)
    kernel_params = prepare_params(params, heads, dim_head)   # host-side layout + bf16 cast

    x_out, q_out = global_linear_attention(x, queries, mask, kernel_params,
                                           heads, dim_head)
    jax.block_until_ready((x_out, q_out))

    x_ref, q_ref = ref_forward(x, queries, mask, params, heads, dim_head)
    assert x_out.shape == (B, N, dim) and q_out.shape == (B, M, dim)
    # Tolerance covers bf16 MXU operands (f32 accumulation), tanh GELU, and the EUP
    # approximate reciprocal in the softmax denominator; f32 reference stays exact.
    assert jnp.allclose(x_out, x_ref, rtol=2e-2, atol=2e-2)
    assert jnp.allclose(q_out, q_ref, rtol=2e-2, atol=2e-2)

    print("KERNEL_OK")
</pallas_src>

<mosaic_0001>
module attributes {stable_mosaic.version = 11 : i64} {
  func.func @fused_kernel(%arg0: i32, %arg1: memref<2x16x32xf32, #tpu.memory_space<vmem>>, %arg2: memref<2x8x32xf32, #tpu.memory_space<vmem>>, %arg3: memref<2x1x16xi32, #tpu.memory_space<vmem>>, %arg4: memref<1x32xf32, #tpu.memory_space<vmem>>, %arg5: memref<1x32xf32, #tpu.memory_space<vmem>>, %arg6: memref<1x32xf32, #tpu.memory_space<vmem>>, %arg7: memref<1x32xf32, #tpu.memory_space<vmem>>, %arg8: memref<32x32xbf16, #tpu.memory_space<vmem>>, %arg9: memref<32x64xbf16, #tpu.memory_space<vmem>>, %arg10: memref<32x32xbf16, #tpu.memory_space<vmem>>, %arg11: memref<1x32xf32, #tpu.memory_space<vmem>>, %arg12: memref<32x32xbf16, #tpu.memory_space<vmem>>, %arg13: memref<32x64xbf16, #tpu.memory_space<vmem>>, %arg14: memref<32x32xbf16, #tpu.memory_space<vmem>>, %arg15: memref<1x32xf32, #tpu.memory_space<vmem>>, %arg16: memref<1x32xf32, #tpu.memory_space<vmem>>, %arg17: memref<1x32xf32, #tpu.memory_space<vmem>>, %arg18: memref<32x128xbf16, #tpu.memory_space<vmem>>, %arg19: memref<1x128xf32, #tpu.memory_space<vmem>>, %arg20: memref<128x32xbf16, #tpu.memory_space<vmem>>, %arg21: memref<1x32xf32, #tpu.memory_space<vmem>>, %arg22: memref<2x16x32xf32, #tpu.memory_space<vmem>>, %arg23: memref<2x8x32xf32, #tpu.memory_space<vmem>>) attributes {dimension_semantics = [#tpu.dimension_semantics<parallel>], iteration_bounds = array<i64: 1>, scalar_prefetch = 0 : i64, scratch_operands = 0 : i64, tpu.core_type = #tpu.core_type<tc>, window_params = [{transform_indices = @transform_0, window_bounds = array<i64: 2, 16, 32>}, {transform_indices = @transform_1, window_bounds = array<i64: 2, 8, 32>}, {transform_indices = @transform_2, window_bounds = array<i64: 2, 1, 16>}, {pipeline_mode = #tpu.pipeline_mode<synchronous>, transform_indices = @transform_3, window_bounds = array<i64: 1, 32>}, {pipeline_mode = #tpu.pipeline_mode<synchronous>, transform_indices = @transform_4, window_bounds = array<i64: 1, 32>}, {pipeline_mode = #tpu.pipeline_mode<synchronous>, transform_indices = @transform_5, window_bounds = array<i64: 1, 32>}, {pipeline_mode = #tpu.pipeline_mode<synchronous>, transform_indices = @transform_6, window_bounds = array<i64: 1, 32>}, {pipeline_mode = #tpu.pipeline_mode<synchronous>, transform_indices = @transform_7, window_bounds = array<i64: 32, 32>}, {pipeline_mode = #tpu.pipeline_mode<synchronous>, transform_indices = @transform_8, window_bounds = array<i64: 32, 64>}, {pipeline_mode = #tpu.pipeline_mode<synchronous>, transform_indices = @transform_9, window_bounds = array<i64: 32, 32>}, {pipeline_mode = #tpu.pipeline_mode<synchronous>, transform_indices = @transform_10, window_bounds = array<i64: 1, 32>}, {pipeline_mode = #tpu.pipeline_mode<synchronous>, transform_indices = @transform_11, window_bounds = array<i64: 32, 32>}, {pipeline_mode = #tpu.pipeline_mode<synchronous>, transform_indices = @transform_12, window_bounds = array<i64: 32, 64>}, {pipeline_mode = #tpu.pipeline_mode<synchronous>, transform_indices = @transform_13, window_bounds = array<i64: 32, 32>}, {pipeline_mode = #tpu.pipeline_mode<synchronous>, transform_indices = @transform_14, window_bounds = array<i64: 1, 32>}, {pipeline_mode = #tpu.pipeline_mode<synchronous>, transform_indices = @transform_15, window_bounds = array<i64: 1, 32>}, {pipeline_mode = #tpu.pipeline_mode<synchronous>, transform_indices = @transform_16, window_bounds = array<i64: 1, 32>}, {pipeline_mode = #tpu.pipeline_mode<synchronous>, transform_indices = @transform_17, window_bounds = array<i64: 32, 128>}, {pipeline_mode = #tpu.pipeline_mode<synchronous>, transform_indices = @transform_18, window_bounds = array<i64: 1, 128>}, {pipeline_mode = #tpu.pipeline_mode<synchronous>, transform_indices = @transform_19, window_bounds = array<i64: 128, 32>}, {pipeline_mode = #tpu.pipeline_mode<synchronous>, transform_indices = @transform_20, window_bounds = array<i64: 1, 32>}, {transform_indices = @transform_21, window_bounds = array<i64: 2, 16, 32>}, {transform_indices = @transform_22, window_bounds = array<i64: 2, 8, 32>}]} {
    %c0 = arith.constant 0 : index
    %c0_0 = arith.constant 0 : index
    %c0_1 = arith.constant 0 : index
    %0 = vector.load %arg1[%c0, %c0_0, %c0_1] : memref<2x16x32xf32, #tpu.memory_space<vmem>>, vector<2x16x32xf32>
    %1 = vector.shape_cast %0 : vector<2x16x32xf32> to vector<32x32xf32>
    %c0_2 = arith.constant 0 : index
    %c0_3 = arith.constant 0 : index
    %c0_4 = arith.constant 0 : index
    %2 = vector.load %arg2[%c0_2, %c0_3, %c0_4] : memref<2x8x32xf32, #tpu.memory_space<vmem>>, vector<2x8x32xf32>
    %3 = vector.shape_cast %2 : vector<2x8x32xf32> to vector<16x32xf32>
    %c0_5 = arith.constant 0 : index
    %c0_6 = arith.constant 0 : index
    %c0_7 = arith.constant 0 : index
    %4 = vector.load %arg3[%c0_5, %c0_6, %c0_7] : memref<2x1x16xi32, #tpu.memory_space<vmem>>, vector<2x1x16xi32>
    %c0_8 = arith.constant 0 : index
    %c0_9 = arith.constant 0 : index
    %5 = vector.load %arg4[%c0_8, %c0_9] : memref<1x32xf32, #tpu.memory_space<vmem>>, vector<1x32xf32>
    %c0_10 = arith.constant 0 : index
    %c0_11 = arith.constant 0 : index
    %6 = vector.load %arg5[%c0_10, %c0_11] : memref<1x32xf32, #tpu.memory_space<vmem>>, vector<1x32xf32>
    %cst = arith.constant dense<0.000000e+00> : vector<32xf32>
    %7 = vector.multi_reduction <add>, %1, %cst [1] : vector<32x32xf32> to vector<32xf32>
    %8 = vector.shape_cast %7 : vector<32xf32> to vector<32x1xf32>
    %cst_12 = arith.constant 3.200000e+01 : f32
    %9 = vector.broadcast %cst_12 : f32 to vector<32x1xf32>
    %10 = arith.divf %8, %9 : vector<32x1xf32>
    %11 = vector.broadcast %10 : vector<32x1xf32> to vector<32x32xf32>
    %12 = arith.subf %1, %11 : vector<32x32xf32>
    %13 = arith.mulf %12, %12 : vector<32x32xf32>
    %cst_13 = arith.constant dense<0.000000e+00> : vector<32xf32>
    %14 = vector.multi_reduction <add>, %13, %cst_13 [1] : vector<32x32xf32> to vector<32xf32>
    %15 = vector.shape_cast %14 : vector<32xf32> to vector<32x1xf32>
    %cst_14 = arith.constant 3.200000e+01 : f32
    %16 = vector.broadcast %cst_14 : f32 to vector<32x1xf32>
    %17 = arith.divf %15, %16 : vector<32x1xf32>
    %18 = vector.broadcast %10 : vector<32x1xf32> to vector<32x32xf32>
    %19 = arith.subf %1, %18 : vector<32x32xf32>
    %cst_15 = arith.constant 9.99999974E-6 : f32
    %20 = vector.broadcast %cst_15 : f32 to vector<32x1xf32>
    %21 = arith.addf %17, %20 : vector<32x1xf32>
    %22 = math.rsqrt %21 : vector<32x1xf32>
    %23 = vector.broadcast %22 : vector<32x1xf32> to vector<32x32xf32>
    %24 = arith.mulf %19, %23 : vector<32x32xf32>
    %25 = vector.broadcast %5 : vector<1x32xf32> to vector<32x32xf32>
    %26 = arith.mulf %24, %25 : vector<32x32xf32>
    %27 = vector.broadcast %6 : vector<1x32xf32> to vector<32x32xf32>
    %28 = arith.addf %26, %27 : vector<32x32xf32>
    %c0_16 = arith.constant 0 : index
    %c0_17 = arith.constant 0 : index
    %29 = vector.load %arg6[%c0_16, %c0_17] : memref<1x32xf32, #tpu.memory_space<vmem>>, vector<1x32xf32>
    %c0_18 = arith.constant 0 : index
    %c0_19 = arith.constant 0 : index
    %30 = vector.load %arg7[%c0_18, %c0_19] : memref<1x32xf32, #tpu.memory_space<vmem>>, vector<1x32xf32>
    %cst_20 = arith.constant dense<0.000000e+00> : vector<16xf32>
    %31 = vector.multi_reduction <add>, %3, %cst_20 [1] : vector<16x32xf32> to vector<16xf32>
    %32 = vector.shape_cast %31 : vector<16xf32> to vector<16x1xf32>
    %cst_21 = arith.constant 3.200000e+01 : f32
    %33 = vector.broadcast %cst_21 : f32 to vector<16x1xf32>
    %34 = arith.divf %32, %33 : vector<16x1xf32>
    %35 = vector.broadcast %34 : vector<16x1xf32> to vector<16x32xf32>
    %36 = arith.subf %3, %35 : vector<16x32xf32>
    %37 = arith.mulf %36, %36 : vector<16x32xf32>
    %cst_22 = arith.constant dense<0.000000e+00> : vector<16xf32>
    %38 = vector.multi_reduction <add>, %37, %cst_22 [1] : vector<16x32xf32> to vector<16xf32>
    %39 = vector.shape_cast %38 : vector<16xf32> to vector<16x1xf32>
    %cst_23 = arith.constant 3.200000e+01 : f32
    %40 = vector.broadcast %cst_23 : f32 to vector<16x1xf32>
    %41 = arith.divf %39, %40 : vector<16x1xf32>
    %42 = vector.broadcast %34 : vector<16x1xf32> to vector<16x32xf32>
    %43 = arith.subf %3, %42 : vector<16x32xf32>
    %cst_24 = arith.constant 9.99999974E-6 : f32
    %44 = vector.broadcast %cst_24 : f32 to vector<16x1xf32>
    %45 = arith.addf %41, %44 : vector<16x1xf32>
    %46 = math.rsqrt %45 : vector<16x1xf32>
    %47 = vector.broadcast %46 : vector<16x1xf32> to vector<16x32xf32>
    %48 = arith.mulf %43, %47 : vector<16x32xf32>
    %49 = vector.broadcast %29 : vector<1x32xf32> to vector<16x32xf32>
    %50 = arith.mulf %48, %49 : vector<16x32xf32>
    %51 = vector.broadcast %30 : vector<1x32xf32> to vector<16x32xf32>
    %52 = arith.addf %50, %51 : vector<16x32xf32>
    %53 = arith.truncf %52 : vector<16x32xf32> to vector<16x32xbf16>
    %c0_25 = arith.constant 0 : index
    %c0_26 = arith.constant 0 : index
    %54 = vector.load %arg8[%c0_25, %c0_26] : memref<32x32xbf16, #tpu.memory_space<vmem>>, vector<32x32xbf16>
    %cst_27 = arith.constant dense<0.000000e+00> : vector<16x32xf32>
    %55 = tpu.matmul %53, %54, %cst_27 {dimension_numbers = #tpu.dot_dimension_numbers<[1], [0], [0], [1], [0, 0, 1, 1], [], []>} : vector<16x32xbf16>, vector<32x32xbf16>, vector<16x32xf32> -> vector<16x32xf32>
    %56 = arith.truncf %28 : vector<32x32xf32> to vector<32x32xbf16>
    %c0_28 = arith.constant 0 : index
    %c0_29 = arith.constant 0 : index
    %57 = vector.load %arg9[%c0_28, %c0_29] : memref<32x64xbf16, #tpu.memory_space<vmem>>, vector<32x64xbf16>
    %cst_30 = arith.constant dense<0.000000e+00> : vector<32x64xf32>
    %58 = tpu.matmul %56, %57, %cst_30 {dimension_numbers = #tpu.dot_dimension_numbers<[1], [0], [0], [1], [0, 0, 1, 1], [], []>} : vector<32x32xbf16>, vector<32x64xbf16>, vector<32x64xf32> -> vector<32x64xf32>
    %59 = vector.extract_strided_slice %58 {offsets = [0, 0], sizes = [32, 32], strides = [1, 1]} : vector<32x64xf32> to vector<32x32xf32>
    %60 = vector.extract_strided_slice %58 {offsets = [0, 32], sizes = [32, 32], strides = [1, 1]} : vector<32x64xf32> to vector<32x32xf32>
    %61 = vector.extract_strided_slice %55 {offsets = [0, 0], sizes = [8, 32], strides = [1, 1]} : vector<16x32xf32> to vector<8x32xf32>
    %62 = vector.extract_strided_slice %59 {offsets = [0, 0], sizes = [16, 32], strides = [1, 1]} : vector<32x32xf32> to vector<16x32xf32>
    %63 = vector.extract_strided_slice %60 {offsets = [0, 0], sizes = [16, 32], strides = [1, 1]} : vector<32x32xf32> to vector<16x32xf32>
    %64 = vector.extract_strided_slice %4 {offsets = [0, 0, 0], sizes = [1, 1, 16], strides = [1, 1, 1]} : vector<2x1x16xi32> to vector<1x1x16xi32>
    %65 = vector.shape_cast %64 : vector<1x1x16xi32> to vector<1x16xi32>
    %c0_i32 = arith.constant 0 : i32
    %66 = vector.broadcast %c0_i32 : i32 to vector<1x16xi32>
    %67 = arith.cmpi sgt, %65, %66 : vector<1x16xi32>
    %68 = vector.extract_strided_slice %61 {offsets = [0, 0], sizes = [8, 16], strides = [1, 1]} : vector<8x32xf32> to vector<8x16xf32>
    %69 = arith.truncf %68 : vector<8x16xf32> to vector<8x16xbf16>
    %70 = vector.extract_strided_slice %62 {offsets = [0, 0], sizes = [16, 16], strides = [1, 1]} : vector<16x32xf32> to vector<16x16xf32>
    %71 = arith.truncf %70 : vector<16x16xf32> to vector<16x16xbf16>
    %72 = vector.extract_strided_slice %63 {offsets = [0, 0], sizes = [16, 16], strides = [1, 1]} : vector<16x32xf32> to vector<16x16xf32>
    %73 = arith.truncf %72 : vector<16x16xf32> to vector<16x16xbf16>
    %cst_31 = arith.constant dense<0.000000e+00> : vector<8x16xf32>
    %74 = tpu.matmul %69, %71, %cst_31 {dimension_numbers = #tpu.dot_dimension_numbers<[1], [1], [0], [0], [0, 0, 1, 0], [], []>} : vector<8x16xbf16>, vector<16x16xbf16>, vector<8x16xf32> -> vector<8x16xf32>
    %cst_32 = arith.constant -3.40282347E+38 : f32
    %75 = vector.shape_cast %67 : vector<1x16xi1> to vector<1x16xi1>
    %76 = vector.broadcast %75 : vector<1x16xi1> to vector<8x16xi1>
    %77 = vector.broadcast %cst_32 : f32 to vector<8x16xf32>
    %78 = arith.select %76, %74, %77 : vector<8x16xi1>, vector<8x16xf32>
    %cst_33 = arith.constant dense<0xFF800000> : vector<8xf32>
    %79 = vector.multi_reduction <maximumf>, %78, %cst_33 [1] : vector<8x16xf32> to vector<8xf32>
    %80 = vector.shape_cast %79 : vector<8xf32> to vector<8x1xf32>
    %81 = vector.broadcast %80 : vector<8x1xf32> to vector<8x16xf32>
    %82 = arith.subf %78, %81 : vector<8x16xf32>
    %83 = math.exp %82 : vector<8x16xf32>
    %cst_34 = arith.constant dense<0.000000e+00> : vector<8xf32>
    %84 = vector.multi_reduction <add>, %83, %cst_34 [1] : vector<8x16xf32> to vector<8xf32>
    %85 = vector.shape_cast %84 : vector<8xf32> to vector<8x1xf32>
    %86 = tpu.reciprocal %85 {approx = true} : vector<8x1xf32> -> vector<8x1xf32>
    %87 = vector.broadcast %86 : vector<8x1xf32> to vector<8x16xf32>
    %88 = arith.mulf %83, %87 : vector<8x16xf32>
    %89 = arith.truncf %88 : vector<8x16xf32> to vector<8x16xbf16>
    %cst_35 = arith.constant dense<0.000000e+00> : vector<8x16xf32>
    %90 = tpu.matmul %89, %73, %cst_35 {dimension_numbers = #tpu.dot_dimension_numbers<[1], [0], [0], [1], [0, 0, 1, 1], [], []>} : vector<8x16xbf16>, vector<16x16xbf16>, vector<8x16xf32> -> vector<8x16xf32>
    %91 = vector.extract_strided_slice %61 {offsets = [0, 16], sizes = [8, 16], strides = [1, 1]} : vector<8x32xf32> to vector<8x16xf32>
    %92 = arith.truncf %91 : vector<8x16xf32> to vector<8x16xbf16>
    %93 = vector.extract_strided_slice %62 {offsets = [0, 16], sizes = [16, 16], strides = [1, 1]} : vector<16x32xf32> to vector<16x16xf32>
    %94 = arith.truncf %93 : vector<16x16xf32> to vector<16x16xbf16>
    %95 = vector.extract_strided_slice %63 {offsets = [0, 16], sizes = [16, 16], strides = [1, 1]} : vector<16x32xf32> to vector<16x16xf32>
    %96 = arith.truncf %95 : vector<16x16xf32> to vector<16x16xbf16>
    %cst_36 = arith.constant dense<0.000000e+00> : vector<8x16xf32>
    %97 = tpu.matmul %92, %94, %cst_36 {dimension_numbers = #tpu.dot_dimension_numbers<[1], [1], [0], [0], [0, 0, 1, 0], [], []>} : vector<8x16xbf16>, vector<16x16xbf16>, vector<8x16xf32> -> vector<8x16xf32>
    %cst_37 = arith.constant -3.40282347E+38 : f32
    %98 = vector.shape_cast %67 : vector<1x16xi1> to vector<1x16xi1>
    %99 = vector.broadcast %98 : vector<1x16xi1> to vector<8x16xi1>
    %100 = vector.broadcast %cst_37 : f32 to vector<8x16xf32>
    %101 = arith.select %99, %97, %100 : vector<8x16xi1>, vector<8x16xf32>
    %cst_38 = arith.constant dense<0xFF800000> : vector<8xf32>
    %102 = vector.multi_reduction <maximumf>, %101, %cst_38 [1] : vector<8x16xf32> to vector<8xf32>
    %103 = vector.shape_cast %102 : vector<8xf32> to vector<8x1xf32>
    %104 = vector.broadcast %103 : vector<8x1xf32> to vector<8x16xf32>
    %105 = arith.subf %101, %104 : vector<8x16xf32>
    %106 = math.exp %105 : vector<8x16xf32>
    %cst_39 = arith.constant dense<0.000000e+00> : vector<8xf32>
    %107 = vector.multi_reduction <add>, %106, %cst_39 [1] : vector<8x16xf32> to vector<8xf32>
    %108 = vector.shape_cast %107 : vector<8xf32> to vector<8x1xf32>
    %109 = tpu.reciprocal %108 {approx = true} : vector<8x1xf32> -> vector<8x1xf32>
    %110 = vector.broadcast %109 : vector<8x1xf32> to vector<8x16xf32>
    %111 = arith.mulf %106, %110 : vector<8x16xf32>
    %112 = arith.truncf %111 : vector<8x16xf32> to vector<8x16xbf16>
    %cst_40 = arith.constant dense<0.000000e+00> : vector<8x16xf32>
    %113 = tpu.matmul %112, %96, %cst_40 {dimension_numbers = #tpu.dot_dimension_numbers<[1], [0], [0], [1], [0, 0, 1, 1], [], []>} : vector<8x16xbf16>, vector<16x16xbf16>, vector<8x16xf32> -> vector<8x16xf32>
    %114 = tpu.concatenate %90, %113 in 1 : vector<8x16xf32>, vector<8x16xf32> -> vector<8x32xf32>
    %115 = vector.extract_strided_slice %55 {offsets = [8, 0], sizes = [8, 32], strides = [1, 1]} : vector<16x32xf32> to vector<8x32xf32>
    %116 = vector.extract_strided_slice %59 {offsets = [16, 0], sizes = [16, 32], strides = [1, 1]} : vector<32x32xf32> to vector<16x32xf32>
    %117 = vector.extract_strided_slice %60 {offsets = [16, 0], sizes = [16, 32], strides = [1, 1]} : vector<32x32xf32> to vector<16x32xf32>
    %118 = vector.extract_strided_slice %4 {offsets = [1, 0, 0], sizes = [1, 1, 16], strides = [1, 1, 1]} : vector<2x1x16xi32> to vector<1x1x16xi32>
    %119 = vector.shape_cast %118 : vector<1x1x16xi32> to vector<1x16xi32>
    %c0_i32_41 = arith.constant 0 : i32
    %120 = vector.broadcast %c0_i32_41 : i32 to vector<1x16xi32>
    %121 = arith.cmpi sgt, %119, %120 : vector<1x16xi32>
    %122 = vector.extract_strided_slice %115 {offsets = [0, 0], sizes = [8, 16], strides = [1, 1]} : vector<8x32xf32> to vector<8x16xf32>
    %123 = arith.truncf %122 : vector<8x16xf32> to vector<8x16xbf16>
    %124 = vector.extract_strided_slice %116 {offsets = [0, 0], sizes = [16, 16], strides = [1, 1]} : vector<16x32xf32> to vector<16x16xf32>
    %125 = arith.truncf %124 : vector<16x16xf32> to vector<16x16xbf16>
    %126 = vector.extract_strided_slice %117 {offsets = [0, 0], sizes = [16, 16], strides = [1, 1]} : vector<16x32xf32> to vector<16x16xf32>
    %127 = arith.truncf %126 : vector<16x16xf32> to vector<16x16xbf16>
    %cst_42 = arith.constant dense<0.000000e+00> : vector<8x16xf32>
    %128 = tpu.matmul %123, %125, %cst_42 {dimension_numbers = #tpu.dot_dimension_numbers<[1], [1], [0], [0], [0, 0, 1, 0], [], []>} : vector<8x16xbf16>, vector<16x16xbf16>, vector<8x16xf32> -> vector<8x16xf32>
    %cst_43 = arith.constant -3.40282347E+38 : f32
    %129 = vector.shape_cast %121 : vector<1x16xi1> to vector<1x16xi1>
    %130 = vector.broadcast %129 : vector<1x16xi1> to vector<8x16xi1>
    %131 = vector.broadcast %cst_43 : f32 to vector<8x16xf32>
    %132 = arith.select %130, %128, %131 : vector<8x16xi1>, vector<8x16xf32>
    %cst_44 = arith.constant dense<0xFF800000> : vector<8xf32>
    %133 = vector.multi_reduction <maximumf>, %132, %cst_44 [1] : vector<8x16xf32> to vector<8xf32>
    %134 = vector.shape_cast %133 : vector<8xf32> to vector<8x1xf32>
    %135 = vector.broadcast %134 : vector<8x1xf32> to vector<8x16xf32>
    %136 = arith.subf %132, %135 : vector<8x16xf32>
    %137 = math.exp %136 : vector<8x16xf32>
    %cst_45 = arith.constant dense<0.000000e+00> : vector<8xf32>
    %138 = vector.multi_reduction <add>, %137, %cst_45 [1] : vector<8x16xf32> to vector<8xf32>
    %139 = vector.shape_cast %138 : vector<8xf32> to vector<8x1xf32>
    %140 = tpu.reciprocal %139 {approx = true} : vector<8x1xf32> -> vector<8x1xf32>
    %141 = vector.broadcast %140 : vector<8x1xf32> to vector<8x16xf32>
    %142 = arith.mulf %137, %141 : vector<8x16xf32>
    %143 = arith.truncf %142 : vector<8x16xf32> to vector<8x16xbf16>
    %cst_46 = arith.constant dense<0.000000e+00> : vector<8x16xf32>
    %144 = tpu.matmul %143, %127, %cst_46 {dimension_numbers = #tpu.dot_dimension_numbers<[1], [0], [0], [1], [0, 0, 1, 1], [], []>} : vector<8x16xbf16>, vector<16x16xbf16>, vector<8x16xf32> -> vector<8x16xf32>
    %145 = vector.extract_strided_slice %115 {offsets = [0, 16], sizes = [8, 16], strides = [1, 1]} : vector<8x32xf32> to vector<8x16xf32>
    %146 = arith.truncf %145 : vector<8x16xf32> to vector<8x16xbf16>
    %147 = vector.extract_strided_slice %116 {offsets = [0, 16], sizes = [16, 16], strides = [1, 1]} : vector<16x32xf32> to vector<16x16xf32>
    %148 = arith.truncf %147 : vector<16x16xf32> to vector<16x16xbf16>
    %149 = vector.extract_strided_slice %117 {offsets = [0, 16], sizes = [16, 16], strides = [1, 1]} : vector<16x32xf32> to vector<16x16xf32>
    %150 = arith.truncf %149 : vector<16x16xf32> to vector<16x16xbf16>
    %cst_47 = arith.constant dense<0.000000e+00> : vector<8x16xf32>
    %151 = tpu.matmul %146, %148, %cst_47 {dimension_numbers = #tpu.dot_dimension_numbers<[1], [1], [0], [0], [0, 0, 1, 0], [], []>} : vector<8x16xbf16>, vector<16x16xbf16>, vector<8x16xf32> -> vector<8x16xf32>
    %cst_48 = arith.constant -3.40282347E+38 : f32
    %152 = vector.shape_cast %121 : vector<1x16xi1> to vector<1x16xi1>
    %153 = vector.broadcast %152 : vector<1x16xi1> to vector<8x16xi1>
    %154 = vector.broadcast %cst_48 : f32 to vector<8x16xf32>
    %155 = arith.select %153, %151, %154 : vector<8x16xi1>, vector<8x16xf32>
    %cst_49 = arith.constant dense<0xFF800000> : vector<8xf32>
    %156 = vector.multi_reduction <maximumf>, %155, %cst_49 [1] : vector<8x16xf32> to vector<8xf32>
    %157 = vector.shape_cast %156 : vector<8xf32> to vector<8x1xf32>
    %158 = vector.broadcast %157 : vector<8x1xf32> to vector<8x16xf32>
    %159 = arith.subf %155, %158 : vector<8x16xf32>
    %160 = math.exp %159 : vector<8x16xf32>
    %cst_50 = arith.constant dense<0.000000e+00> : vector<8xf32>
    %161 = vector.multi_reduction <add>, %160, %cst_50 [1] : vector<8x16xf32> to vector<8xf32>
    %162 = vector.shape_cast %161 : vector<8xf32> to vector<8x1xf32>
    %163 = tpu.reciprocal %162 {approx = true} : vector<8x1xf32> -> vector<8x1xf32>
    %164 = vector.broadcast %163 : vector<8x1xf32> to vector<8x16xf32>
    %165 = arith.mulf %160, %164 : vector<8x16xf32>
    %166 = arith.truncf %165 : vector<8x16xf32> to vector<8x16xbf16>
    %cst_51 = arith.constant dense<0.000000e+00> : vector<8x16xf32>
    %167 = tpu.matmul %166, %150, %cst_51 {dimension_numbers = #tpu.dot_dimension_numbers<[1], [0], [0], [1], [0, 0, 1, 1], [], []>} : vector<8x16xbf16>, vector<16x16xbf16>, vector<8x16xf32> -> vector<8x16xf32>
    %168 = tpu.concatenate %144, %167 in 1 : vector<8x16xf32>, vector<8x16xf32> -> vector<8x32xf32>
    %169 = tpu.concatenate %114, %168 in 0 : vector<8x32xf32>, vector<8x32xf32> -> vector<16x32xf32>
    %170 = arith.truncf %169 : vector<16x32xf32> to vector<16x32xbf16>
    %c0_52 = arith.constant 0 : index
    %c0_53 = arith.constant 0 : index
    %171 = vector.load %arg10[%c0_52, %c0_53] : memref<32x32xbf16, #tpu.memory_space<vmem>>, vector<32x32xbf16>
    %cst_54 = arith.constant dense<0.000000e+00> : vector<16x32xf32>
    %172 = tpu.matmul %170, %171, %cst_54 {dimension_numbers = #tpu.dot_dimension_numbers<[1], [0], [0], [1], [0, 0, 1, 1], [], []>} : vector<16x32xbf16>, vector<32x32xbf16>, vector<16x32xf32> -> vector<16x32xf32>
    %c0_55 = arith.constant 0 : index
    %c0_56 = arith.constant 0 : index
    %173 = vector.load %arg11[%c0_55, %c0_56] : memref<1x32xf32, #tpu.memory_space<vmem>>, vector<1x32xf32>
    %174 = vector.broadcast %173 : vector<1x32xf32> to vector<16x32xf32>
    %175 = arith.addf %172, %174 : vector<16x32xf32>
    %176 = arith.truncf %28 : vector<32x32xf32> to vector<32x32xbf16>
    %c0_57 = arith.constant 0 : index
    %c0_58 = arith.constant 0 : index
    %177 = vector.load %arg12[%c0_57, %c0_58] : memref<32x32xbf16, #tpu.memory_space<vmem>>, vector<32x32xbf16>
    %cst_59 = arith.constant dense<0.000000e+00> : vector<32x32xf32>
    %178 = tpu.matmul %176, %177, %cst_59 {dimension_numbers = #tpu.dot_dimension_numbers<[1], [0], [0], [1], [0, 0, 1, 1], [], []>} : vector<32x32xbf16>, vector<32x32xbf16>, vector<32x32xf32> -> vector<32x32xf32>
    %179 = arith.truncf %175 : vector<16x32xf32> to vector<16x32xbf16>
    %c0_60 = arith.constant 0 : index
    %c0_61 = arith.constant 0 : index
    %180 = vector.load %arg13[%c0_60, %c0_61] : memref<32x64xbf16, #tpu.memory_space<vmem>>, vector<32x64xbf16>
    %cst_62 = arith.constant dense<0.000000e+00> : vector<16x64xf32>
    %181 = tpu.matmul %179, %180, %cst_62 {dimension_numbers = #tpu.dot_dimension_numbers<[1], [0], [0], [1], [0, 0, 1, 1], [], []>} : vector<16x32xbf16>, vector<32x64xbf16>, vector<16x64xf32> -> vector<16x64xf32>
    %182 = vector.extract_strided_slice %181 {offsets = [0, 0], sizes = [16, 32], strides = [1, 1]} : vector<16x64xf32> to vector<16x32xf32>
    %183 = vector.extract_strided_slice %181 {offsets = [0, 32], sizes = [16, 32], strides = [1, 1]} : vector<16x64xf32> to vector<16x32xf32>
    %184 = vector.extract_strided_slice %178 {offsets = [0, 0], sizes = [16, 32], strides = [1, 1]} : vector<32x32xf32> to vector<16x32xf32>
    %185 = vector.extract_strided_slice %182 {offsets = [0, 0], sizes = [8, 32], strides = [1, 1]} : vector<16x32xf32> to vector<8x32xf32>
    %186 = vector.extract_strided_slice %183 {offsets = [0, 0], sizes = [8, 32], strides = [1, 1]} : vector<16x32xf32> to vector<8x32xf32>
    %187 = vector.extract_strided_slice %184 {offsets = [0, 0], sizes = [16, 16], strides = [1, 1]} : vector<16x32xf32> to vector<16x16xf32>
    %188 = arith.truncf %187 : vector<16x16xf32> to vector<16x16xbf16>
    %189 = vector.extract_strided_slice %185 {offsets = [0, 0], sizes = [8, 16], strides = [1, 1]} : vector<8x32xf32> to vector<8x16xf32>
    %190 = arith.truncf %189 : vector<8x16xf32> to vector<8x16xbf16>
    %191 = vector.extract_strided_slice %186 {offsets = [0, 0], sizes = [8, 16], strides = [1, 1]} : vector<8x32xf32> to vector<8x16xf32>
    %192 = arith.truncf %191 : vector<8x16xf32> to vector<8x16xbf16>
    %cst_63 = arith.constant dense<0.000000e+00> : vector<16x8xf32>
    %193 = tpu.matmul %188, %190, %cst_63 {dimension_numbers = #tpu.dot_dimension_numbers<[1], [1], [0], [0], [0, 0, 1, 0], [], []>} : vector<16x16xbf16>, vector<8x16xbf16>, vector<16x8xf32> -> vector<16x8xf32>
    %cst_64 = arith.constant dense<0xFF800000> : vector<16xf32>
    %194 = vector.multi_reduction <maximumf>, %193, %cst_64 [1] : vector<16x8xf32> to vector<16xf32>
    %195 = vector.shape_cast %194 : vector<16xf32> to vector<16x1xf32>
    %196 = vector.broadcast %195 : vector<16x1xf32> to vector<16x8xf32>
    %197 = arith.subf %193, %196 : vector<16x8xf32>
    %198 = math.exp %197 : vector<16x8xf32>
    %cst_65 = arith.constant dense<0.000000e+00> : vector<16xf32>
    %199 = vector.multi_reduction <add>, %198, %cst_65 [1] : vector<16x8xf32> to vector<16xf32>
    %200 = vector.shape_cast %199 : vector<16xf32> to vector<16x1xf32>
    %201 = tpu.reciprocal %200 {approx = true} : vector<16x1xf32> -> vector<16x1xf32>
    %202 = vector.broadcast %201 : vector<16x1xf32> to vector<16x8xf32>
    %203 = arith.mulf %198, %202 : vector<16x8xf32>
    %204 = arith.truncf %203 : vector<16x8xf32> to vector<16x8xbf16>
    %cst_66 = arith.constant dense<0.000000e+00> : vector<16x16xf32>
    %205 = tpu.matmul %204, %192, %cst_66 {dimension_numbers = #tpu.dot_dimension_numbers<[1], [0], [0], [1], [0, 0, 1, 1], [], []>} : vector<16x8xbf16>, vector<8x16xbf16>, vector<16x16xf32> -> vector<16x16xf32>
    %206 = vector.extract_strided_slice %184 {offsets = [0, 16], sizes = [16, 16], strides = [1, 1]} : vector<16x32xf32> to vector<16x16xf32>
    %207 = arith.truncf %206 : vector<16x16xf32> to vector<16x16xbf16>
    %208 = vector.extract_strided_slice %185 {offsets = [0, 16], sizes = [8, 16], strides = [1, 1]} : vector<8x32xf32> to vector<8x16xf32>
    %209 = arith.truncf %208 : vector<8x16xf32> to vector<8x16xbf16>
    %210 = vector.extract_strided_slice %186 {offsets = [0, 16], sizes = [8, 16], strides = [1, 1]} : vector<8x32xf32> to vector<8x16xf32>
    %211 = arith.truncf %210 : vector<8x16xf32> to vector<8x16xbf16>
    %cst_67 = arith.constant dense<0.000000e+00> : vector<16x8xf32>
    %212 = tpu.matmul %207, %209, %cst_67 {dimension_numbers = #tpu.dot_dimension_numbers<[1], [1], [0], [0], [0, 0, 1, 0], [], []>} : vector<16x16xbf16>, vector<8x16xbf16>, vector<16x8xf32> -> vector<16x8xf32>
    %cst_68 = arith.constant dense<0xFF800000> : vector<16xf32>
    %213 = vector.multi_reduction <maximumf>, %212, %cst_68 [1] : vector<16x8xf32> to vector<16xf32>
    %214 = vector.shape_cast %213 : vector<16xf32> to vector<16x1xf32>
    %215 = vector.broadcast %214 : vector<16x1xf32> to vector<16x8xf32>
    %216 = arith.subf %212, %215 : vector<16x8xf32>
    %217 = math.exp %216 : vector<16x8xf32>
    %cst_69 = arith.constant dense<0.000000e+00> : vector<16xf32>
    %218 = vector.multi_reduction <add>, %217, %cst_69 [1] : vector<16x8xf32> to vector<16xf32>
    %219 = vector.shape_cast %218 : vector<16xf32> to vector<16x1xf32>
    %220 = tpu.reciprocal %219 {approx = true} : vector<16x1xf32> -> vector<16x1xf32>
    %221 = vector.broadcast %220 : vector<16x1xf32> to vector<16x8xf32>
    %222 = arith.mulf %217, %221 : vector<16x8xf32>
    %223 = arith.truncf %222 : vector<16x8xf32> to vector<16x8xbf16>
    %cst_70 = arith.constant dense<0.000000e+00> : vector<16x16xf32>
    %224 = tpu.matmul %223, %211, %cst_70 {dimension_numbers = #tpu.dot_dimension_numbers<[1], [0], [0], [1], [0, 0, 1, 1], [], []>} : vector<16x8xbf16>, vector<8x16xbf16>, vector<16x16xf32> -> vector<16x16xf32>
    %225 = tpu.concatenate %205, %224 in 1 : vector<16x16xf32>, vector<16x16xf32> -> vector<16x32xf32>
    %226 = vector.extract_strided_slice %178 {offsets = [16, 0], sizes = [16, 32], strides = [1, 1]} : vector<32x32xf32> to vector<16x32xf32>
    %227 = vector.extract_strided_slice %182 {offsets = [8, 0], sizes = [8, 32], strides = [1, 1]} : vector<16x32xf32> to vector<8x32xf32>
    %228 = vector.extract_strided_slice %183 {offsets = [8, 0], sizes = [8, 32], strides = [1, 1]} : vector<16x32xf32> to vector<8x32xf32>
    %229 = vector.extract_strided_slice %226 {offsets = [0, 0], sizes = [16, 16], strides = [1, 1]} : vector<16x32xf32> to vector<16x16xf32>
    %230 = arith.truncf %229 : vector<16x16xf32> to vector<16x16xbf16>
    %231 = vector.extract_strided_slice %227 {offsets = [0, 0], sizes = [8, 16], strides = [1, 1]} : vector<8x32xf32> to vector<8x16xf32>
    %232 = arith.truncf %231 : vector<8x16xf32> to vector<8x16xbf16>
    %233 = vector.extract_strided_slice %228 {offsets = [0, 0], sizes = [8, 16], strides = [1, 1]} : vector<8x32xf32> to vector<8x16xf32>
    %234 = arith.truncf %233 : vector<8x16xf32> to vector<8x16xbf16>
    %cst_71 = arith.constant dense<0.000000e+00> : vector<16x8xf32>
    %235 = tpu.matmul %230, %232, %cst_71 {dimension_numbers = #tpu.dot_dimension_numbers<[1], [1], [0], [0], [0, 0, 1, 0], [], []>} : vector<16x16xbf16>, vector<8x16xbf16>, vector<16x8xf32> -> vector<16x8xf32>
    %cst_72 = arith.constant dense<0xFF800000> : vector<16xf32>
    %236 = vector.multi_reduction <maximumf>, %235, %cst_72 [1] : vector<16x8xf32> to vector<16xf32>
    %237 = vector.shape_cast %236 : vector<16xf32> to vector<16x1xf32>
    %238 = vector.broadcast %237 : vector<16x1xf32> to vector<16x8xf32>
    %239 = arith.subf %235, %238 : vector<16x8xf32>
    %240 = math.exp %239 : vector<16x8xf32>
    %cst_73 = arith.constant dense<0.000000e+00> : vector<16xf32>
    %241 = vector.multi_reduction <add>, %240, %cst_73 [1] : vector<16x8xf32> to vector<16xf32>
    %242 = vector.shape_cast %241 : vector<16xf32> to vector<16x1xf32>
    %243 = tpu.reciprocal %242 {approx = true} : vector<16x1xf32> -> vector<16x1xf32>
    %244 = vector.broadcast %243 : vector<16x1xf32> to vector<16x8xf32>
    %245 = arith.mulf %240, %244 : vector<16x8xf32>
    %246 = arith.truncf %245 : vector<16x8xf32> to vector<16x8xbf16>
    %cst_74 = arith.constant dense<0.000000e+00> : vector<16x16xf32>
    %247 = tpu.matmul %246, %234, %cst_74 {dimension_numbers = #tpu.dot_dimension_numbers<[1], [0], [0], [1], [0, 0, 1, 1], [], []>} : vector<16x8xbf16>, vector<8x16xbf16>, vector<16x16xf32> -> vector<16x16xf32>
    %248 = vector.extract_strided_slice %226 {offsets = [0, 16], sizes = [16, 16], strides = [1, 1]} : vector<16x32xf32> to vector<16x16xf32>
    %249 = arith.truncf %248 : vector<16x16xf32> to vector<16x16xbf16>
    %250 = vector.extract_strided_slice %227 {offsets = [0, 16], sizes = [8, 16], strides = [1, 1]} : vector<8x32xf32> to vector<8x16xf32>
    %251 = arith.truncf %250 : vector<8x16xf32> to vector<8x16xbf16>
    %252 = vector.extract_strided_slice %228 {offsets = [0, 16], sizes = [8, 16], strides = [1, 1]} : vector<8x32xf32> to vector<8x16xf32>
    %253 = arith.truncf %252 : vector<8x16xf32> to vector<8x16xbf16>
    %cst_75 = arith.constant dense<0.000000e+00> : vector<16x8xf32>
    %254 = tpu.matmul %249, %251, %cst_75 {dimension_numbers = #tpu.dot_dimension_numbers<[1], [1], [0], [0], [0, 0, 1, 0], [], []>} : vector<16x16xbf16>, vector<8x16xbf16>, vector<16x8xf32> -> vector<16x8xf32>
    %cst_76 = arith.constant dense<0xFF800000> : vector<16xf32>
    %255 = vector.multi_reduction <maximumf>, %254, %cst_76 [1] : vector<16x8xf32> to vector<16xf32>
    %256 = vector.shape_cast %255 : vector<16xf32> to vector<16x1xf32>
    %257 = vector.broadcast %256 : vector<16x1xf32> to vector<16x8xf32>
    %258 = arith.subf %254, %257 : vector<16x8xf32>
    %259 = math.exp %258 : vector<16x8xf32>
    %cst_77 = arith.constant dense<0.000000e+00> : vector<16xf32>
    %260 = vector.multi_reduction <add>, %259, %cst_77 [1] : vector<16x8xf32> to vector<16xf32>
    %261 = vector.shape_cast %260 : vector<16xf32> to vector<16x1xf32>
    %262 = tpu.reciprocal %261 {approx = true} : vector<16x1xf32> -> vector<16x1xf32>
    %263 = vector.broadcast %262 : vector<16x1xf32> to vector<16x8xf32>
    %264 = arith.mulf %259, %263 : vector<16x8xf32>
    %265 = arith.truncf %264 : vector<16x8xf32> to vector<16x8xbf16>
    %cst_78 = arith.constant dense<0.000000e+00> : vector<16x16xf32>
    %266 = tpu.matmul %265, %253, %cst_78 {dimension_numbers = #tpu.dot_dimension_numbers<[1], [0], [0], [1], [0, 0, 1, 1], [], []>} : vector<16x8xbf16>, vector<8x16xbf16>, vector<16x16xf32> -> vector<16x16xf32>
    %267 = tpu.concatenate %247, %266 in 1 : vector<16x16xf32>, vector<16x16xf32> -> vector<16x32xf32>
    %268 = tpu.concatenate %225, %267 in 0 : vector<16x32xf32>, vector<16x32xf32> -> vector<32x32xf32>
    %269 = arith.truncf %268 : vector<32x32xf32> to vector<32x32xbf16>
    %c0_79 = arith.constant 0 : index
    %c0_80 = arith.constant 0 : index
    %270 = vector.load %arg14[%c0_79, %c0_80] : memref<32x32xbf16, #tpu.memory_space<vmem>>, vector<32x32xbf16>
    %cst_81 = arith.constant dense<0.000000e+00> : vector<32x32xf32>
    %271 = tpu.matmul %269, %270, %cst_81 {dimension_numbers = #tpu.dot_dimension_numbers<[1], [0], [0], [1], [0, 0, 1, 1], [], []>} : vector<32x32xbf16>, vector<32x32xbf16>, vector<32x32xf32> -> vector<32x32xf32>
    %c0_82 = arith.constant 0 : index
    %c0_83 = arith.constant 0 : index
    %272 = vector.load %arg15[%c0_82, %c0_83] : memref<1x32xf32, #tpu.memory_space<vmem>>, vector<1x32xf32>
    %273 = vector.broadcast %272 : vector<1x32xf32> to vector<32x32xf32>
    %274 = arith.addf %271, %273 : vector<32x32xf32>
    %275 = arith.addf %274, %1 : vector<32x32xf32>
    %276 = arith.addf %175, %3 : vector<16x32xf32>
    %277 = vector.shape_cast %276 : vector<16x32xf32> to vector<2x8x32xf32>
    %c0_84 = arith.constant 0 : index
    %c0_85 = arith.constant 0 : index
    %c0_86 = arith.constant 0 : index
    %278 = vector.load %arg23[%c0_84, %c0_85, %c0_86] : memref<2x8x32xf32, #tpu.memory_space<vmem>>, vector<2x8x32xf32>
    tpu.vector_store %arg23[%c0_84, %c0_85, %c0_86], %277 {strides = array<i32>} : memref<2x8x32xf32, #tpu.memory_space<vmem>>, vector<2x8x32xf32>,
    %c0_87 = arith.constant 0 : index
    %c0_88 = arith.constant 0 : index
    %279 = vector.load %arg16[%c0_87, %c0_88] : memref<1x32xf32, #tpu.memory_space<vmem>>, vector<1x32xf32>
    %c0_89 = arith.constant 0 : index
    %c0_90 = arith.constant 0 : index
    %280 = vector.load %arg17[%c0_89, %c0_90] : memref<1x32xf32, #tpu.memory_space<vmem>>, vector<1x32xf32>
    %cst_91 = arith.constant dense<0.000000e+00> : vector<32xf32>
    %281 = vector.multi_reduction <add>, %275, %cst_91 [1] : vector<32x32xf32> to vector<32xf32>
    %282 = vector.shape_cast %281 : vector<32xf32> to vector<32x1xf32>
    %cst_92 = arith.constant 3.200000e+01 : f32
    %283 = vector.broadcast %cst_92 : f32 to vector<32x1xf32>
    %284 = arith.divf %282, %283 : vector<32x1xf32>
    %285 = vector.broadcast %284 : vector<32x1xf32> to vector<32x32xf32>
    %286 = arith.subf %275, %285 : vector<32x32xf32>
    %287 = arith.mulf %286, %286 : vector<32x32xf32>
    %cst_93 = arith.constant dense<0.000000e+00> : vector<32xf32>
    %288 = vector.multi_reduction <add>, %287, %cst_93 [1] : vector<32x32xf32> to vector<32xf32>
    %289 = vector.shape_cast %288 : vector<32xf32> to vector<32x1xf32>
    %cst_94 = arith.constant 3.200000e+01 : f32
    %290 = vector.broadcast %cst_94 : f32 to vector<32x1xf32>
    %291 = arith.divf %289, %290 : vector<32x1xf32>
    %292 = vector.broadcast %284 : vector<32x1xf32> to vector<32x32xf32>
    %293 = arith.subf %275, %292 : vector<32x32xf32>
    %cst_95 = arith.constant 9.99999974E-6 : f32
    %294 = vector.broadcast %cst_95 : f32 to vector<32x1xf32>
    %295 = arith.addf %291, %294 : vector<32x1xf32>
    %296 = math.rsqrt %295 : vector<32x1xf32>
    %297 = vector.broadcast %296 : vector<32x1xf32> to vector<32x32xf32>
    %298 = arith.mulf %293, %297 : vector<32x32xf32>
    %299 = vector.broadcast %279 : vector<1x32xf32> to vector<32x32xf32>
    %300 = arith.mulf %298, %299 : vector<32x32xf32>
    %301 = vector.broadcast %280 : vector<1x32xf32> to vector<32x32xf32>
    %302 = arith.addf %300, %301 : vector<32x32xf32>
    %303 = arith.truncf %302 : vector<32x32xf32> to vector<32x32xbf16>
    %c0_96 = arith.constant 0 : index
    %c0_97 = arith.constant 0 : index
    %304 = vector.load %arg18[%c0_96, %c0_97] : memref<32x128xbf16, #tpu.memory_space<vmem>>, vector<32x128xbf16>
    %cst_98 = arith.constant dense<0.000000e+00> : vector<32x128xf32>
    %305 = tpu.matmul %303, %304, %cst_98 {dimension_numbers = #tpu.dot_dimension_numbers<[1], [0], [0], [1], [0, 0, 1, 1], [], []>} : vector<32x32xbf16>, vector<32x128xbf16>, vector<32x128xf32> -> vector<32x128xf32>
    %c0_99 = arith.constant 0 : index
    %c0_100 = arith.constant 0 : index
    %306 = vector.load %arg19[%c0_99, %c0_100] : memref<1x128xf32, #tpu.memory_space<vmem>>, vector<1x128xf32>
    %307 = vector.broadcast %306 : vector<1x128xf32> to vector<32x128xf32>
    %308 = arith.addf %305, %307 : vector<32x128xf32>
    %309 = arith.mulf %308, %308 : vector<32x128xf32>
    %310 = arith.mulf %308, %309 : vector<32x128xf32>
    %cst_101 = arith.constant 4.471500e-02 : f32
    %311 = vector.broadcast %cst_101 : f32 to vector<32x128xf32>
    %312 = arith.mulf %311, %310 : vector<32x128xf32>
    %313 = arith.addf %308, %312 : vector<32x128xf32>
    %cst_102 = arith.constant 0.797884583 : f32
    %314 = vector.broadcast %cst_102 : f32 to vector<32x128xf32>
    %315 = arith.mulf %314, %313 : vector<32x128xf32>
    %316 = math.tanh %315 : vector<32x128xf32>
    %cst_103 = arith.constant 1.000000e+00 : f32
    %317 = vector.broadcast %cst_103 : f32 to vector<32x128xf32>
    %318 = arith.addf %317, %316 : vector<32x128xf32>
    %cst_104 = arith.constant 5.000000e-01 : f32
    %319 = vector.broadcast %cst_104 : f32 to vector<32x128xf32>
    %320 = arith.mulf %319, %318 : vector<32x128xf32>
    %321 = arith.mulf %308, %320 : vector<32x128xf32>
    %322 = arith.truncf %321 : vector<32x128xf32> to vector<32x128xbf16>
    %c0_105 = arith.constant 0 : index
    %c0_106 = arith.constant 0 : index
    %323 = vector.load %arg20[%c0_105, %c0_106] : memref<128x32xbf16, #tpu.memory_space<vmem>>, vector<128x32xbf16>
    %cst_107 = arith.constant dense<0.000000e+00> : vector<32x32xf32>
    %324 = tpu.matmul %322, %323, %cst_107 {dimension_numbers = #tpu.dot_dimension_numbers<[1], [0], [0], [1], [0, 0, 1, 1], [], []>} : vector<32x128xbf16>, vector<128x32xbf16>, vector<32x32xf32> -> vector<32x32xf32>
    %c0_108 = arith.constant 0 : index
    %c0_109 = arith.constant 0 : index
    %325 = vector.load %arg21[%c0_108, %c0_109] : memref<1x32xf32, #tpu.memory_space<vmem>>, vector<1x32xf32>
    %326 = vector.broadcast %325 : vector<1x32xf32> to vector<32x32xf32>
    %327 = arith.addf %324, %326 : vector<32x32xf32>
    %328 = arith.addf %327, %275 : vector<32x32xf32>
    %329 = vector.shape_cast %328 : vector<32x32xf32> to vector<2x16x32xf32>
    %c0_110 = arith.constant 0 : index
    %c0_111 = arith.constant 0 : index
    %c0_112 = arith.constant 0 : index
    %330 = vector.load %arg22[%c0_110, %c0_111, %c0_112] : memref<2x16x32xf32, #tpu.memory_space<vmem>>, vector<2x16x32xf32>
    tpu.vector_store %arg22[%c0_110, %c0_111, %c0_112], %329 {strides = array<i32>} : memref<2x16x32xf32, #tpu.memory_space<vmem>>, vector<2x16x32xf32>,
    return
  }
  func.func @transform_0(%arg0: i32) -> (i32, i32, i32) {
    %c0_i32 = arith.constant 0 : i32
    %c0_i32_0 = arith.constant 0 : i32
    %c0_i32_1 = arith.constant 0 : i32
    return %arg0, %c0_i32, %c0_i32_0 : i32, i32, i32
  }
  func.func @transform_1(%arg0: i32) -> (i32, i32, i32) {
    %c0_i32 = arith.constant 0 : i32
    %c0_i32_0 = arith.constant 0 : i32
    %c0_i32_1 = arith.constant 0 : i32
    return %arg0, %c0_i32, %c0_i32_0 : i32, i32, i32
  }
  func.func @transform_2(%arg0: i32) -> (i32, i32, i32) {
    %c0_i32 = arith.constant 0 : i32
    %c0_i32_0 = arith.constant 0 : i32
    %c0_i32_1 = arith.constant 0 : i32
    return %arg0, %c0_i32, %c0_i32_0 : i32, i32, i32
  }
  func.func @transform_3(%arg0: i32) -> (i32, i32) {
    %c0_i32 = arith.constant 0 : i32
    %c0_i32_0 = arith.constant 0 : i32
    %c0_i32_1 = arith.constant 0 : i32
    return %c0_i32, %c0_i32_0 : i32, i32
  }
  func.func @transform_4(%arg0: i32) -> (i32, i32) {
    %c0_i32 = arith.constant 0 : i32
    %c0_i32_0 = arith.constant 0 : i32
    %c0_i32_1 = arith.constant 0 : i32
    return %c0_i32, %c0_i32_0 : i32, i32
  }
  func.func @transform_5(%arg0: i32) -> (i32, i32) {
    %c0_i32 = arith.constant 0 : i32
    %c0_i32_0 = arith.constant 0 : i32
    %c0_i32_1 = arith.constant 0 : i32
    return %c0_i32, %c0_i32_0 : i32, i32
  }
  func.func @transform_6(%arg0: i32) -> (i32, i32) {
    %c0_i32 = arith.constant 0 : i32
    %c0_i32_0 = arith.constant 0 : i32
    %c0_i32_1 = arith.constant 0 : i32
    return %c0_i32, %c0_i32_0 : i32, i32
  }
  func.func @transform_7(%arg0: i32) -> (i32, i32) {
    %c0_i32 = arith.constant 0 : i32
    %c0_i32_0 = arith.constant 0 : i32
    %c0_i32_1 = arith.constant 0 : i32
    return %c0_i32, %c0_i32_0 : i32, i32
  }
  func.func @transform_8(%arg0: i32) -> (i32, i32) {
    %c0_i32 = arith.constant 0 : i32
    %c0_i32_0 = arith.constant 0 : i32
    %c0_i32_1 = arith.constant 0 : i32
    return %c0_i32, %c0_i32_0 : i32, i32
  }
  func.func @transform_9(%arg0: i32) -> (i32, i32) {
    %c0_i32 = arith.constant 0 : i32
    %c0_i32_0 = arith.constant 0 : i32
    %c0_i32_1 = arith.constant 0 : i32
    return %c0_i32, %c0_i32_0 : i32, i32
  }
  func.func @transform_10(%arg0: i32) -> (i32, i32) {
    %c0_i32 = arith.constant 0 : i32
    %c0_i32_0 = arith.constant 0 : i32
    %c0_i32_1 = arith.constant 0 : i32
    return %c0_i32, %c0_i32_0 : i32, i32
  }
  func.func @transform_11(%arg0: i32) -> (i32, i32) {
    %c0_i32 = arith.constant 0 : i32
    %c0_i32_0 = arith.constant 0 : i32
    %c0_i32_1 = arith.constant 0 : i32
    return %c0_i32, %c0_i32_0 : i32, i32
  }
  func.func @transform_12(%arg0: i32) -> (i32, i32) {
    %c0_i32 = arith.constant 0 : i32
    %c0_i32_0 = arith.constant 0 : i32
    %c0_i32_1 = arith.constant 0 : i32
    return %c0_i32, %c0_i32_0 : i32, i32
  }
  func.func @transform_13(%arg0: i32) -> (i32, i32) {
    %c0_i32 = arith.constant 0 : i32
    %c0_i32_0 = arith.constant 0 : i32
    %c0_i32_1 = arith.constant 0 : i32
    return %c0_i32, %c0_i32_0 : i32, i32
  }
  func.func @transform_14(%arg0: i32) -> (i32, i32) {
    %c0_i32 = arith.constant 0 : i32
    %c0_i32_0 = arith.constant 0 : i32
    %c0_i32_1 = arith.constant 0 : i32
    return %c0_i32, %c0_i32_0 : i32, i32
  }
  func.func @transform_15(%arg0: i32) -> (i32, i32) {
    %c0_i32 = arith.constant 0 : i32
    %c0_i32_0 = arith.constant 0 : i32
    %c0_i32_1 = arith.constant 0 : i32
    return %c0_i32, %c0_i32_0 : i32, i32
  }
  func.func @transform_16(%arg0: i32) -> (i32, i32) {
    %c0_i32 = arith.constant 0 : i32
    %c0_i32_0 = arith.constant 0 : i32
    %c0_i32_1 = arith.constant 0 : i32
    return %c0_i32, %c0_i32_0 : i32, i32
  }
  func.func @transform_17(%arg0: i32) -> (i32, i32) {
    %c0_i32 = arith.constant 0 : i32
    %c0_i32_0 = arith.constant 0 : i32
    %c0_i32_1 = arith.constant 0 : i32
    return %c0_i32, %c0_i32_0 : i32, i32
  }
  func.func @transform_18(%arg0: i32) -> (i32, i32) {
    %c0_i32 = arith.constant 0 : i32
    %c0_i32_0 = arith.constant 0 : i32
    %c0_i32_1 = arith.constant 0 : i32
    return %c0_i32, %c0_i32_0 : i32, i32
  }
  func.func @transform_19(%arg0: i32) -> (i32, i32) {
    %c0_i32 = arith.constant 0 : i32
    %c0_i32_0 = arith.constant 0 : i32
    %c0_i32_1 = arith.constant 0 : i32
    return %c0_i32, %c0_i32_0 : i32, i32
  }
  func.func @transform_20(%arg0: i32) -> (i32, i32) {
    %c0_i32 = arith.constant 0 : i32
    %c0_i32_0 = arith.constant 0 : i32
    %c0_i32_1 = arith.constant 0 : i32
    return %c0_i32, %c0_i32_0 : i32, i32
  }
  func.func @transform_21(%arg0: i32) -> (i32, i32, i32) {
    %c0_i32 = arith.constant 0 : i32
    %c0_i32_0 = arith.constant 0 : i32
    %c0_i32_1 = arith.constant 0 : i32
    return %arg0, %c0_i32, %c0_i32_0 : i32, i32, i32
  }
  func.func @transform_22(%arg0: i32) -> (i32, i32, i32) {
    %c0_i32 = arith.constant 0 : i32
    %c0_i32_0 = arith.constant 0 : i32
    %c0_i32_1 = arith.constant 0 : i32
    return %arg0, %c0_i32, %c0_i32_0 : i32, i32, i32
  }
}

module attributes {stable_mosaic.version = 11 : i64} {
  func.func @fused_kernel(%arg0: i32, %arg1: memref<2x16x32xf32, #tpu.memory_space<vmem>>, %arg2: memref<2x8x32xf32, #tpu.memory_space<vmem>>, %arg3: memref<2x1x16xi32, #tpu.memory_space<vmem>>, %arg4: memref<1x32xf32, #tpu.memory_space<vmem>>, %arg5: memref<1x32xf32, #tpu.memory_space<vmem>>, %arg6: memref<1x32xf32, #tpu.memory_space<vmem>>, %arg7: memref<1x32xf32, #tpu.memory_space<vmem>>, %arg8: memref<32x32xbf16, #tpu.memory_space<vmem>>, %arg9: memref<32x64xbf16, #tpu.memory_space<vmem>>, %arg10: memref<32x32xbf16, #tpu.memory_space<vmem>>, %arg11: memref<1x32xf32, #tpu.memory_space<vmem>>, %arg12: memref<32x32xbf16, #tpu.memory_space<vmem>>, %arg13: memref<32x64xbf16, #tpu.memory_space<vmem>>, %arg14: memref<32x32xbf16, #tpu.memory_space<vmem>>, %arg15: memref<1x32xf32, #tpu.memory_space<vmem>>, %arg16: memref<1x32xf32, #tpu.memory_space<vmem>>, %arg17: memref<1x32xf32, #tpu.memory_space<vmem>>, %arg18: memref<32x128xbf16, #tpu.memory_space<vmem>>, %arg19: memref<1x128xf32, #tpu.memory_space<vmem>>, %arg20: memref<128x32xbf16, #tpu.memory_space<vmem>>, %arg21: memref<1x32xf32, #tpu.memory_space<vmem>>, %arg22: memref<2x16x32xf32, #tpu.memory_space<vmem>>, %arg23: memref<2x8x32xf32, #tpu.memory_space<vmem>>) attributes {dimension_semantics = [#tpu.dimension_semantics<parallel>], iteration_bounds = array<i64: 1>, scalar_prefetch = 0 : i64, scratch_operands = 0 : i64, tpu.core_type = #tpu.core_type<tc>, window_params = [{transform_indices = @transform_0, window_bounds = array<i64: 2, 16, 32>}, {transform_indices = @transform_1, window_bounds = array<i64: 2, 8, 32>}, {transform_indices = @transform_2, window_bounds = array<i64: 2, 1, 16>}, {pipeline_mode = #tpu.pipeline_mode<synchronous>, transform_indices = @transform_3, window_bounds = array<i64: 1, 32>}, {pipeline_mode = #tpu.pipeline_mode<synchronous>, transform_indices = @transform_4, window_bounds = array<i64: 1, 32>}, {pipeline_mode = #tpu.pipeline_mode<synchronous>, transform_indices = @transform_5, window_bounds = array<i64: 1, 32>}, {pipeline_mode = #tpu.pipeline_mode<synchronous>, transform_indices = @transform_6, window_bounds = array<i64: 1, 32>}, {pipeline_mode = #tpu.pipeline_mode<synchronous>, transform_indices = @transform_7, window_bounds = array<i64: 32, 32>}, {pipeline_mode = #tpu.pipeline_mode<synchronous>, transform_indices = @transform_8, window_bounds = array<i64: 32, 64>}, {pipeline_mode = #tpu.pipeline_mode<synchronous>, transform_indices = @transform_9, window_bounds = array<i64: 32, 32>}, {pipeline_mode = #tpu.pipeline_mode<synchronous>, transform_indices = @transform_10, window_bounds = array<i64: 1, 32>}, {pipeline_mode = #tpu.pipeline_mode<synchronous>, transform_indices = @transform_11, window_bounds = array<i64: 32, 32>}, {pipeline_mode = #tpu.pipeline_mode<synchronous>, transform_indices = @transform_12, window_bounds = array<i64: 32, 64>}, {pipeline_mode = #tpu.pipeline_mode<synchronous>, transform_indices = @transform_13, window_bounds = array<i64: 32, 32>}, {pipeline_mode = #tpu.pipeline_mode<synchronous>, transform_indices = @transform_14, window_bounds = array<i64: 1, 32>}, {pipeline_mode = #tpu.pipeline_mode<synchronous>, transform_indices = @transform_15, window_bounds = array<i64: 1, 32>}, {pipeline_mode = #tpu.pipeline_mode<synchronous>, transform_indices = @transform_16, window_bounds = array<i64: 1, 32>}, {pipeline_mode = #tpu.pipeline_mode<synchronous>, transform_indices = @transform_17, window_bounds = array<i64: 32, 128>}, {pipeline_mode = #tpu.pipeline_mode<synchronous>, transform_indices = @transform_18, window_bounds = array<i64: 1, 128>}, {pipeline_mode = #tpu.pipeline_mode<synchronous>, transform_indices = @transform_19, window_bounds = array<i64: 128, 32>}, {pipeline_mode = #tpu.pipeline_mode<synchronous>, transform_indices = @transform_20, window_bounds = array<i64: 1, 32>}, {transform_indices = @transform_21, window_bounds = array<i64: 2, 16, 32>}, {transform_indices = @transform_22, window_bounds = array<i64: 2, 8, 32>}]} {
    %c0 = arith.constant 0 : index
    %c0_0 = arith.constant 0 : index
    %c0_1 = arith.constant 0 : index
    %0 = vector.load %arg1[%c0, %c0_0, %c0_1] : memref<2x16x32xf32, #tpu.memory_space<vmem>>, vector<2x16x32xf32>
    %1 = vector.shape_cast %0 : vector<2x16x32xf32> to vector<32x32xf32>
    %c0_2 = arith.constant 0 : index
    %c0_3 = arith.constant 0 : index
    %c0_4 = arith.constant 0 : index
    %2 = vector.load %arg2[%c0_2, %c0_3, %c0_4] : memref<2x8x32xf32, #tpu.memory_space<vmem>>, vector<2x8x32xf32>
    %3 = vector.shape_cast %2 : vector<2x8x32xf32> to vector<16x32xf32>
    %c0_5 = arith.constant 0 : index
    %c0_6 = arith.constant 0 : index
    %c0_7 = arith.constant 0 : index
    %4 = vector.load %arg3[%c0_5, %c0_6, %c0_7] : memref<2x1x16xi32, #tpu.memory_space<vmem>>, vector<2x1x16xi32>
    %c0_8 = arith.constant 0 : index
    %c0_9 = arith.constant 0 : index
    %5 = vector.load %arg4[%c0_8, %c0_9] : memref<1x32xf32, #tpu.memory_space<vmem>>, vector<1x32xf32>
    %c0_10 = arith.constant 0 : index
    %c0_11 = arith.constant 0 : index
    %6 = vector.load %arg5[%c0_10, %c0_11] : memref<1x32xf32, #tpu.memory_space<vmem>>, vector<1x32xf32>
    %cst = arith.constant dense<0.000000e+00> : vector<32xf32>
    %7 = vector.multi_reduction <add>, %1, %cst [1] : vector<32x32xf32> to vector<32xf32>
    %8 = vector.shape_cast %7 : vector<32xf32> to vector<32x1xf32>
    %cst_12 = arith.constant 3.200000e+01 : f32
    %9 = vector.broadcast %cst_12 : f32 to vector<32x1xf32>
    %10 = arith.divf %8, %9 : vector<32x1xf32>
    %11 = vector.broadcast %10 : vector<32x1xf32> to vector<32x32xf32>
    %12 = arith.subf %1, %11 : vector<32x32xf32>
    %13 = arith.mulf %12, %12 : vector<32x32xf32>
    %cst_13 = arith.constant dense<0.000000e+00> : vector<32xf32>
    %14 = vector.multi_reduction <add>, %13, %cst_13 [1] : vector<32x32xf32> to vector<32xf32>
    %15 = vector.shape_cast %14 : vector<32xf32> to vector<32x1xf32>
    %cst_14 = arith.constant 3.200000e+01 : f32
    %16 = vector.broadcast %cst_14 : f32 to vector<32x1xf32>
    %17 = arith.divf %15, %16 : vector<32x1xf32>
    %18 = vector.broadcast %10 : vector<32x1xf32> to vector<32x32xf32>
    %19 = arith.subf %1, %18 : vector<32x32xf32>
    %cst_15 = arith.constant 9.99999974E-6 : f32
    %20 = vector.broadcast %cst_15 : f32 to vector<32x1xf32>
    %21 = arith.addf %17, %20 : vector<32x1xf32>
    %22 = math.rsqrt %21 : vector<32x1xf32>
    %23 = vector.broadcast %22 : vector<32x1xf32> to vector<32x32xf32>
    %24 = arith.mulf %19, %23 : vector<32x32xf32>
    %25 = vector.broadcast %5 : vector<1x32xf32> to vector<32x32xf32>
    %26 = arith.mulf %24, %25 : vector<32x32xf32>
    %27 = vector.broadcast %6 : vector<1x32xf32> to vector<32x32xf32>
    %28 = arith.addf %26, %27 : vector<32x32xf32>
    %c0_16 = arith.constant 0 : index
    %c0_17 = arith.constant 0 : index
    %29 = vector.load %arg6[%c0_16, %c0_17] : memref<1x32xf32, #tpu.memory_space<vmem>>, vector<1x32xf32>
    %c0_18 = arith.constant 0 : index
    %c0_19 = arith.constant 0 : index
    %30 = vector.load %arg7[%c0_18, %c0_19] : memref<1x32xf32, #tpu.memory_space<vmem>>, vector<1x32xf32>
    %cst_20 = arith.constant dense<0.000000e+00> : vector<16xf32>
    %31 = vector.multi_reduction <add>, %3, %cst_20 [1] : vector<16x32xf32> to vector<16xf32>
    %32 = vector.shape_cast %31 : vector<16xf32> to vector<16x1xf32>
    %cst_21 = arith.constant 3.200000e+01 : f32
    %33 = vector.broadcast %cst_21 : f32 to vector<16x1xf32>
    %34 = arith.divf %32, %33 : vector<16x1xf32>
    %35 = vector.broadcast %34 : vector<16x1xf32> to vector<16x32xf32>
    %36 = arith.subf %3, %35 : vector<16x32xf32>
    %37 = arith.mulf %36, %36 : vector<16x32xf32>
    %cst_22 = arith.constant dense<0.000000e+00> : vector<16xf32>
    %38 = vector.multi_reduction <add>, %37, %cst_22 [1] : vector<16x32xf32> to vector<16xf32>
    %39 = vector.shape_cast %38 : vector<16xf32> to vector<16x1xf32>
    %cst_23 = arith.constant 3.200000e+01 : f32
    %40 = vector.broadcast %cst_23 : f32 to vector<16x1xf32>
    %41 = arith.divf %39, %40 : vector<16x1xf32>
    %42 = vector.broadcast %34 : vector<16x1xf32> to vector<16x32xf32>
    %43 = arith.subf %3, %42 : vector<16x32xf32>
    %cst_24 = arith.constant 9.99999974E-6 : f32
    %44 = vector.broadcast %cst_24 : f32 to vector<16x1xf32>
    %45 = arith.addf %41, %44 : vector<16x1xf32>
    %46 = math.rsqrt %45 : vector<16x1xf32>
    %47 = vector.broadcast %46 : vector<16x1xf32> to vector<16x32xf32>
    %48 = arith.mulf %43, %47 : vector<16x32xf32>
    %49 = vector.broadcast %29 : vector<1x32xf32> to vector<16x32xf32>
    %50 = arith.mulf %48, %49 : vector<16x32xf32>
    %51 = vector.broadcast %30 : vector<1x32xf32> to vector<16x32xf32>
    %52 = arith.addf %50, %51 : vector<16x32xf32>
    %53 = arith.truncf %52 : vector<16x32xf32> to vector<16x32xbf16>
    %c0_25 = arith.constant 0 : index
    %c0_26 = arith.constant 0 : index
    %54 = vector.load %arg8[%c0_25, %c0_26] : memref<32x32xbf16, #tpu.memory_space<vmem>>, vector<32x32xbf16>
    %cst_27 = arith.constant dense<0.000000e+00> : vector<16x32xf32>
    %55 = tpu.matmul %53, %54, %cst_27 {dimension_numbers = #tpu.dot_dimension_numbers<[1], [0], [0], [1], [0, 0, 1, 1], [], []>} : vector<16x32xbf16>, vector<32x32xbf16>, vector<16x32xf32> -> vector<16x32xf32>
    %56 = arith.truncf %28 : vector<32x32xf32> to vector<32x32xbf16>
    %c0_28 = arith.constant 0 : index
    %c0_29 = arith.constant 0 : index
    %57 = vector.load %arg9[%c0_28, %c0_29] : memref<32x64xbf16, #tpu.memory_space<vmem>>, vector<32x64xbf16>
    %cst_30 = arith.constant dense<0.000000e+00> : vector<32x64xf32>
    %58 = tpu.matmul %56, %57, %cst_30 {dimension_numbers = #tpu.dot_dimension_numbers<[1], [0], [0], [1], [0, 0, 1, 1], [], []>} : vector<32x32xbf16>, vector<32x64xbf16>, vector<32x64xf32> -> vector<32x64xf32>
    %59 = vector.extract_strided_slice %58 {offsets = [0, 0], sizes = [32, 32], strides = [1, 1]} : vector<32x64xf32> to vector<32x32xf32>
    %60 = vector.extract_strided_slice %58 {offsets = [0, 32], sizes = [32, 32], strides = [1, 1]} : vector<32x64xf32> to vector<32x32xf32>
    %61 = vector.extract_strided_slice %55 {offsets = [0, 0], sizes = [8, 32], strides = [1, 1]} : vector<16x32xf32> to vector<8x32xf32>
    %62 = vector.extract_strided_slice %59 {offsets = [0, 0], sizes = [16, 32], strides = [1, 1]} : vector<32x32xf32> to vector<16x32xf32>
    %63 = vector.extract_strided_slice %60 {offsets = [0, 0], sizes = [16, 32], strides = [1, 1]} : vector<32x32xf32> to vector<16x32xf32>
    %64 = vector.extract_strided_slice %4 {offsets = [0, 0, 0], sizes = [1, 1, 16], strides = [1, 1, 1]} : vector<2x1x16xi32> to vector<1x1x16xi32>
    %65 = vector.shape_cast %64 : vector<1x1x16xi32> to vector<1x16xi32>
    %c0_i32 = arith.constant 0 : i32
    %66 = vector.broadcast %c0_i32 : i32 to vector<1x16xi32>
    %67 = arith.cmpi sgt, %65, %66 : vector<1x16xi32>
    %68 = vector.extract_strided_slice %61 {offsets = [0, 0], sizes = [8, 16], strides = [1, 1]} : vector<8x32xf32> to vector<8x16xf32>
    %69 = arith.truncf %68 : vector<8x16xf32> to vector<8x16xbf16>
    %70 = vector.extract_strided_slice %62 {offsets = [0, 0], sizes = [16, 16], strides = [1, 1]} : vector<16x32xf32> to vector<16x16xf32>
    %71 = arith.truncf %70 : vector<16x16xf32> to vector<16x16xbf16>
    %72 = vector.extract_strided_slice %63 {offsets = [0, 0], sizes = [16, 16], strides = [1, 1]} : vector<16x32xf32> to vector<16x16xf32>
    %73 = arith.truncf %72 : vector<16x16xf32> to vector<16x16xbf16>
    %cst_31 = arith.constant dense<0.000000e+00> : vector<8x16xf32>
    %74 = tpu.matmul %69, %71, %cst_31 {dimension_numbers = #tpu.dot_dimension_numbers<[1], [1], [0], [0], [0, 0, 1, 0], [], []>} : vector<8x16xbf16>, vector<16x16xbf16>, vector<8x16xf32> -> vector<8x16xf32>
    %cst_32 = arith.constant -3.40282347E+38 : f32
    %75 = vector.shape_cast %67 : vector<1x16xi1> to vector<1x16xi1>
    %76 = vector.broadcast %75 : vector<1x16xi1> to vector<8x16xi1>
    %77 = vector.broadcast %cst_32 : f32 to vector<8x16xf32>
    %78 = arith.select %76, %74, %77 : vector<8x16xi1>, vector<8x16xf32>
    %cst_33 = arith.constant dense<0xFF800000> : vector<8xf32>
    %79 = vector.multi_reduction <maximumf>, %78, %cst_33 [1] : vector<8x16xf32> to vector<8xf32>
    %80 = vector.shape_cast %79 : vector<8xf32> to vector<8x1xf32>
    %81 = vector.broadcast %80 : vector<8x1xf32> to vector<8x16xf32>
    %82 = arith.subf %78, %81 : vector<8x16xf32>
    %83 = math.exp %82 : vector<8x16xf32>
    %cst_34 = arith.constant dense<0.000000e+00> : vector<8xf32>
    %84 = vector.multi_reduction <add>, %83, %cst_34 [1] : vector<8x16xf32> to vector<8xf32>
    %85 = vector.shape_cast %84 : vector<8xf32> to vector<8x1xf32>
    %86 = tpu.reciprocal %85 {approx = true} : vector<8x1xf32> -> vector<8x1xf32>
    %87 = vector.broadcast %86 : vector<8x1xf32> to vector<8x16xf32>
    %88 = arith.mulf %83, %87 : vector<8x16xf32>
    %89 = arith.truncf %88 : vector<8x16xf32> to vector<8x16xbf16>
    %cst_35 = arith.constant dense<0.000000e+00> : vector<8x16xf32>
    %90 = tpu.matmul %89, %73, %cst_35 {dimension_numbers = #tpu.dot_dimension_numbers<[1], [0], [0], [1], [0, 0, 1, 1], [], []>} : vector<8x16xbf16>, vector<16x16xbf16>, vector<8x16xf32> -> vector<8x16xf32>
    %91 = vector.extract_strided_slice %61 {offsets = [0, 16], sizes = [8, 16], strides = [1, 1]} : vector<8x32xf32> to vector<8x16xf32>
    %92 = arith.truncf %91 : vector<8x16xf32> to vector<8x16xbf16>
    %93 = vector.extract_strided_slice %62 {offsets = [0, 16], sizes = [16, 16], strides = [1, 1]} : vector<16x32xf32> to vector<16x16xf32>
    %94 = arith.truncf %93 : vector<16x16xf32> to vector<16x16xbf16>
    %95 = vector.extract_strided_slice %63 {offsets = [0, 16], sizes = [16, 16], strides = [1, 1]} : vector<16x32xf32> to vector<16x16xf32>
    %96 = arith.truncf %95 : vector<16x16xf32> to vector<16x16xbf16>
    %cst_36 = arith.constant dense<0.000000e+00> : vector<8x16xf32>
    %97 = tpu.matmul %92, %94, %cst_36 {dimension_numbers = #tpu.dot_dimension_numbers<[1], [1], [0], [0], [0, 0, 1, 0], [], []>} : vector<8x16xbf16>, vector<16x16xbf16>, vector<8x16xf32> -> vector<8x16xf32>
    %cst_37 = arith.constant -3.40282347E+38 : f32
    %98 = vector.shape_cast %67 : vector<1x16xi1> to vector<1x16xi1>
    %99 = vector.broadcast %98 : vector<1x16xi1> to vector<8x16xi1>
    %100 = vector.broadcast %cst_37 : f32 to vector<8x16xf32>
    %101 = arith.select %99, %97, %100 : vector<8x16xi1>, vector<8x16xf32>
    %cst_38 = arith.constant dense<0xFF800000> : vector<8xf32>
    %102 = vector.multi_reduction <maximumf>, %101, %cst_38 [1] : vector<8x16xf32> to vector<8xf32>
    %103 = vector.shape_cast %102 : vector<8xf32> to vector<8x1xf32>
    %104 = vector.broadcast %103 : vector<8x1xf32> to vector<8x16xf32>
    %105 = arith.subf %101, %104 : vector<8x16xf32>
    %106 = math.exp %105 : vector<8x16xf32>
    %cst_39 = arith.constant dense<0.000000e+00> : vector<8xf32>
    %107 = vector.multi_reduction <add>, %106, %cst_39 [1] : vector<8x16xf32> to vector<8xf32>
    %108 = vector.shape_cast %107 : vector<8xf32> to vector<8x1xf32>
    %109 = tpu.reciprocal %108 {approx = true} : vector<8x1xf32> -> vector<8x1xf32>
    %110 = vector.broadcast %109 : vector<8x1xf32> to vector<8x16xf32>
    %111 = arith.mulf %106, %110 : vector<8x16xf32>
    %112 = arith.truncf %111 : vector<8x16xf32> to vector<8x16xbf16>
    %cst_40 = arith.constant dense<0.000000e+00> : vector<8x16xf32>
    %113 = tpu.matmul %112, %96, %cst_40 {dimension_numbers = #tpu.dot_dimension_numbers<[1], [0], [0], [1], [0, 0, 1, 1], [], []>} : vector<8x16xbf16>, vector<16x16xbf16>, vector<8x16xf32> -> vector<8x16xf32>
    %114 = tpu.concatenate %90, %113 in 1 : vector<8x16xf32>, vector<8x16xf32> -> vector<8x32xf32>
    %115 = vector.extract_strided_slice %55 {offsets = [8, 0], sizes = [8, 32], strides = [1, 1]} : vector<16x32xf32> to vector<8x32xf32>
    %116 = vector.extract_strided_slice %59 {offsets = [16, 0], sizes = [16, 32], strides = [1, 1]} : vector<32x32xf32> to vector<16x32xf32>
    %117 = vector.extract_strided_slice %60 {offsets = [16, 0], sizes = [16, 32], strides = [1, 1]} : vector<32x32xf32> to vector<16x32xf32>
    %118 = vector.extract_strided_slice %4 {offsets = [1, 0, 0], sizes = [1, 1, 16], strides = [1, 1, 1]} : vector<2x1x16xi32> to vector<1x1x16xi32>
    %119 = vector.shape_cast %118 : vector<1x1x16xi32> to vector<1x16xi32>
    %c0_i32_41 = arith.constant 0 : i32
    %120 = vector.broadcast %c0_i32_41 : i32 to vector<1x16xi32>
    %121 = arith.cmpi sgt, %119, %120 : vector<1x16xi32>
    %122 = vector.extract_strided_slice %115 {offsets = [0, 0], sizes = [8, 16], strides = [1, 1]} : vector<8x32xf32> to vector<8x16xf32>
    %123 = arith.truncf %122 : vector<8x16xf32> to vector<8x16xbf16>
    %124 = vector.extract_strided_slice %116 {offsets = [0, 0], sizes = [16, 16], strides = [1, 1]} : vector<16x32xf32> to vector<16x16xf32>
    %125 = arith.truncf %124 : vector<16x16xf32> to vector<16x16xbf16>
    %126 = vector.extract_strided_slice %117 {offsets = [0, 0], sizes = [16, 16], strides = [1, 1]} : vector<16x32xf32> to vector<16x16xf32>
    %127 = arith.truncf %126 : vector<16x16xf32> to vector<16x16xbf16>
    %cst_42 = arith.constant dense<0.000000e+00> : vector<8x16xf32>
    %128 = tpu.matmul %123, %125, %cst_42 {dimension_numbers = #tpu.dot_dimension_numbers<[1], [1], [0], [0], [0, 0, 1, 0], [], []>} : vector<8x16xbf16>, vector<16x16xbf16>, vector<8x16xf32> -> vector<8x16xf32>
    %cst_43 = arith.constant -3.40282347E+38 : f32
    %129 = vector.shape_cast %121 : vector<1x16xi1> to vector<1x16xi1>
    %130 = vector.broadcast %129 : vector<1x16xi1> to vector<8x16xi1>
    %131 = vector.broadcast %cst_43 : f32 to vector<8x16xf32>
    %132 = arith.select %130, %128, %131 : vector<8x16xi1>, vector<8x16xf32>
    %cst_44 = arith.constant dense<0xFF800000> : vector<8xf32>
    %133 = vector.multi_reduction <maximumf>, %132, %cst_44 [1] : vector<8x16xf32> to vector<8xf32>
    %134 = vector.shape_cast %133 : vector<8xf32> to vector<8x1xf32>
    %135 = vector.broadcast %134 : vector<8x1xf32> to vector<8x16xf32>
    %136 = arith.subf %132, %135 : vector<8x16xf32>
    %137 = math.exp %136 : vector<8x16xf32>
    %cst_45 = arith.constant dense<0.000000e+00> : vector<8xf32>
    %138 = vector.multi_reduction <add>, %137, %cst_45 [1] : vector<8x16xf32> to vector<8xf32>
    %139 = vector.shape_cast %138 : vector<8xf32> to vector<8x1xf32>
    %140 = tpu.reciprocal %139 {approx = true} : vector<8x1xf32> -> vector<8x1xf32>
    %141 = vector.broadcast %140 : vector<8x1xf32> to vector<8x16xf32>
    %142 = arith.mulf %137, %141 : vector<8x16xf32>
    %143 = arith.truncf %142 : vector<8x16xf32> to vector<8x16xbf16>
    %cst_46 = arith.constant dense<0.000000e+00> : vector<8x16xf32>
    %144 = tpu.matmul %143, %127, %cst_46 {dimension_numbers = #tpu.dot_dimension_numbers<[1], [0], [0], [1], [0, 0, 1, 1], [], []>} : vector<8x16xbf16>, vector<16x16xbf16>, vector<8x16xf32> -> vector<8x16xf32>
    %145 = vector.extract_strided_slice %115 {offsets = [0, 16], sizes = [8, 16], strides = [1, 1]} : vector<8x32xf32> to vector<8x16xf32>
    %146 = arith.truncf %145 : vector<8x16xf32> to vector<8x16xbf16>
    %147 = vector.extract_strided_slice %116 {offsets = [0, 16], sizes = [16, 16], strides = [1, 1]} : vector<16x32xf32> to vector<16x16xf32>
    %148 = arith.truncf %147 : vector<16x16xf32> to vector<16x16xbf16>
    %149 = vector.extract_strided_slice %117 {offsets = [0, 16], sizes = [16, 16], strides = [1, 1]} : vector<16x32xf32> to vector<16x16xf32>
    %150 = arith.truncf %149 : vector<16x16xf32> to vector<16x16xbf16>
    %cst_47 = arith.constant dense<0.000000e+00> : vector<8x16xf32>
    %151 = tpu.matmul %146, %148, %cst_47 {dimension_numbers = #tpu.dot_dimension_numbers<[1], [1], [0], [0], [0, 0, 1, 0], [], []>} : vector<8x16xbf16>, vector<16x16xbf16>, vector<8x16xf32> -> vector<8x16xf32>
    %cst_48 = arith.constant -3.40282347E+38 : f32
    %152 = vector.shape_cast %121 : vector<1x16xi1> to vector<1x16xi1>
    %153 = vector.broadcast %152 : vector<1x16xi1> to vector<8x16xi1>
    %154 = vector.broadcast %cst_48 : f32 to vector<8x16xf32>
    %155 = arith.select %153, %151, %154 : vector<8x16xi1>, vector<8x16xf32>
    %cst_49 = arith.constant dense<0xFF800000> : vector<8xf32>
    %156 = vector.multi_reduction <maximumf>, %155, %cst_49 [1] : vector<8x16xf32> to vector<8xf32>
    %157 = vector.shape_cast %156 : vector<8xf32> to vector<8x1xf32>
    %158 = vector.broadcast %157 : vector<8x1xf32> to vector<8x16xf32>
    %159 = arith.subf %155, %158 : vector<8x16xf32>
    %160 = math.exp %159 : vector<8x16xf32>
    %cst_50 = arith.constant dense<0.000000e+00> : vector<8xf32>
    %161 = vector.multi_reduction <add>, %160, %cst_50 [1] : vector<8x16xf32> to vector<8xf32>
    %162 = vector.shape_cast %161 : vector<8xf32> to vector<8x1xf32>
    %163 = tpu.reciprocal %162 {approx = true} : vector<8x1xf32> -> vector<8x1xf32>
    %164 = vector.broadcast %163 : vector<8x1xf32> to vector<8x16xf32>
    %165 = arith.mulf %160, %164 : vector<8x16xf32>
    %166 = arith.truncf %165 : vector<8x16xf32> to vector<8x16xbf16>
    %cst_51 = arith.constant dense<0.000000e+00> : vector<8x16xf32>
    %167 = tpu.matmul %166, %150, %cst_51 {dimension_numbers = #tpu.dot_dimension_numbers<[1], [0], [0], [1], [0, 0, 1, 1], [], []>} : vector<8x16xbf16>, vector<16x16xbf16>, vector<8x16xf32> -> vector<8x16xf32>
    %168 = tpu.concatenate %144, %167 in 1 : vector<8x16xf32>, vector<8x16xf32> -> vector<8x32xf32>
    %169 = tpu.concatenate %114, %168 in 0 : vector<8x32xf32>, vector<8x32xf32> -> vector<16x32xf32>
    %170 = arith.truncf %169 : vector<16x32xf32> to vector<16x32xbf16>
    %c0_52 = arith.constant 0 : index
    %c0_53 = arith.constant 0 : index
    %171 = vector.load %arg10[%c0_52, %c0_53] : memref<32x32xbf16, #tpu.memory_space<vmem>>, vector<32x32xbf16>
    %cst_54 = arith.constant dense<0.000000e+00> : vector<16x32xf32>
    %172 = tpu.matmul %170, %171, %cst_54 {dimension_numbers = #tpu.dot_dimension_numbers<[1], [0], [0], [1], [0, 0, 1, 1], [], []>} : vector<16x32xbf16>, vector<32x32xbf16>, vector<16x32xf32> -> vector<16x32xf32>
    %c0_55 = arith.constant 0 : index
    %c0_56 = arith.constant 0 : index
    %173 = vector.load %arg11[%c0_55, %c0_56] : memref<1x32xf32, #tpu.memory_space<vmem>>, vector<1x32xf32>
    %174 = vector.broadcast %173 : vector<1x32xf32> to vector<16x32xf32>
    %175 = arith.addf %172, %174 : vector<16x32xf32>
    %176 = arith.truncf %28 : vector<32x32xf32> to vector<32x32xbf16>
    %c0_57 = arith.constant 0 : index
    %c0_58 = arith.constant 0 : index
    %177 = vector.load %arg12[%c0_57, %c0_58] : memref<32x32xbf16, #tpu.memory_space<vmem>>, vector<32x32xbf16>
    %cst_59 = arith.constant dense<0.000000e+00> : vector<32x32xf32>
    %178 = tpu.matmul %176, %177, %cst_59 {dimension_numbers = #tpu.dot_dimension_numbers<[1], [0], [0], [1], [0, 0, 1, 1], [], []>} : vector<32x32xbf16>, vector<32x32xbf16>, vector<32x32xf32> -> vector<32x32xf32>
    %179 = arith.truncf %175 : vector<16x32xf32> to vector<16x32xbf16>
    %c0_60 = arith.constant 0 : index
    %c0_61 = arith.constant 0 : index
    %180 = vector.load %arg13[%c0_60, %c0_61] : memref<32x64xbf16, #tpu.memory_space<vmem>>, vector<32x64xbf16>
    %cst_62 = arith.constant dense<0.000000e+00> : vector<16x64xf32>
    %181 = tpu.matmul %179, %180, %cst_62 {dimension_numbers = #tpu.dot_dimension_numbers<[1], [0], [0], [1], [0, 0, 1, 1], [], []>} : vector<16x32xbf16>, vector<32x64xbf16>, vector<16x64xf32> -> vector<16x64xf32>
    %182 = vector.extract_strided_slice %181 {offsets = [0, 0], sizes = [16, 32], strides = [1, 1]} : vector<16x64xf32> to vector<16x32xf32>
    %183 = vector.extract_strided_slice %181 {offsets = [0, 32], sizes = [16, 32], strides = [1, 1]} : vector<16x64xf32> to vector<16x32xf32>
    %184 = vector.extract_strided_slice %178 {offsets = [0, 0], sizes = [16, 32], strides = [1, 1]} : vector<32x32xf32> to vector<16x32xf32>
    %185 = vector.extract_strided_slice %182 {offsets = [0, 0], sizes = [8, 32], strides = [1, 1]} : vector<16x32xf32> to vector<8x32xf32>
    %186 = vector.extract_strided_slice %183 {offsets = [0, 0], sizes = [8, 32], strides = [1, 1]} : vector<16x32xf32> to vector<8x32xf32>
    %187 = vector.extract_strided_slice %184 {offsets = [0, 0], sizes = [16, 16], strides = [1, 1]} : vector<16x32xf32> to vector<16x16xf32>
    %188 = arith.truncf %187 : vector<16x16xf32> to vector<16x16xbf16>
    %189 = vector.extract_strided_slice %185 {offsets = [0, 0], sizes = [8, 16], strides = [1, 1]} : vector<8x32xf32> to vector<8x16xf32>
    %190 = arith.truncf %189 : vector<8x16xf32> to vector<8x16xbf16>
    %191 = vector.extract_strided_slice %186 {offsets = [0, 0], sizes = [8, 16], strides = [1, 1]} : vector<8x32xf32> to vector<8x16xf32>
    %192 = arith.truncf %191 : vector<8x16xf32> to vector<8x16xbf16>
    %cst_63 = arith.constant dense<0.000000e+00> : vector<16x8xf32>
    %193 = tpu.matmul %188, %190, %cst_63 {dimension_numbers = #tpu.dot_dimension_numbers<[1], [1], [0], [0], [0, 0, 1, 0], [], []>} : vector<16x16xbf16>, vector<8x16xbf16>, vector<16x8xf32> -> vector<16x8xf32>
    %cst_64 = arith.constant dense<0xFF800000> : vector<16xf32>
    %194 = vector.multi_reduction <maximumf>, %193, %cst_64 [1] : vector<16x8xf32> to vector<16xf32>
    %195 = vector.shape_cast %194 : vector<16xf32> to vector<16x1xf32>
    %196 = vector.broadcast %195 : vector<16x1xf32> to vector<16x8xf32>
    %197 = arith.subf %193, %196 : vector<16x8xf32>
    %198 = math.exp %197 : vector<16x8xf32>
    %cst_65 = arith.constant dense<0.000000e+00> : vector<16xf32>
    %199 = vector.multi_reduction <add>, %198, %cst_65 [1] : vector<16x8xf32> to vector<16xf32>
    %200 = vector.shape_cast %199 : vector<16xf32> to vector<16x1xf32>
    %201 = tpu.reciprocal %200 {approx = true} : vector<16x1xf32> -> vector<16x1xf32>
    %202 = vector.broadcast %201 : vector<16x1xf32> to vector<16x8xf32>
    %203 = arith.mulf %198, %202 : vector<16x8xf32>
    %204 = arith.truncf %203 : vector<16x8xf32> to vector<16x8xbf16>
    %cst_66 = arith.constant dense<0.000000e+00> : vector<16x16xf32>
    %205 = tpu.matmul %204, %192, %cst_66 {dimension_numbers = #tpu.dot_dimension_numbers<[1], [0], [0], [1], [0, 0, 1, 1], [], []>} : vector<16x8xbf16>, vector<8x16xbf16>, vector<16x16xf32> -> vector<16x16xf32>
    %206 = vector.extract_strided_slice %184 {offsets = [0, 16], sizes = [16, 16], strides = [1, 1]} : vector<16x32xf32> to vector<16x16xf32>
    %207 = arith.truncf %206 : vector<16x16xf32> to vector<16x16xbf16>
    %208 = vector.extract_strided_slice %185 {offsets = [0, 16], sizes = [8, 16], strides = [1, 1]} : vector<8x32xf32> to vector<8x16xf32>
    %209 = arith.truncf %208 : vector<8x16xf32> to vector<8x16xbf16>
    %210 = vector.extract_strided_slice %186 {offsets = [0, 16], sizes = [8, 16], strides = [1, 1]} : vector<8x32xf32> to vector<8x16xf32>
    %211 = arith.truncf %210 : vector<8x16xf32> to vector<8x16xbf16>
    %cst_67 = arith.constant dense<0.000000e+00> : vector<16x8xf32>
    %212 = tpu.matmul %207, %209, %cst_67 {dimension_numbers = #tpu.dot_dimension_numbers<[1], [1], [0], [0], [0, 0, 1, 0], [], []>} : vector<16x16xbf16>, vector<8x16xbf16>, vector<16x8xf32> -> vector<16x8xf32>
    %cst_68 = arith.constant dense<0xFF800000> : vector<16xf32>
    %213 = vector.multi_reduction <maximumf>, %212, %cst_68 [1] : vector<16x8xf32> to vector<16xf32>
    %214 = vector.shape_cast %213 : vector<16xf32> to vector<16x1xf32>
    %215 = vector.broadcast %214 : vector<16x1xf32> to vector<16x8xf32>
    %216 = arith.subf %212, %215 : vector<16x8xf32>
    %217 = math.exp %216 : vector<16x8xf32>
    %cst_69 = arith.constant dense<0.000000e+00> : vector<16xf32>
    %218 = vector.multi_reduction <add>, %217, %cst_69 [1] : vector<16x8xf32> to vector<16xf32>
    %219 = vector.shape_cast %218 : vector<16xf32> to vector<16x1xf32>
    %220 = tpu.reciprocal %219 {approx = true} : vector<16x1xf32> -> vector<16x1xf32>
    %221 = vector.broadcast %220 : vector<16x1xf32> to vector<16x8xf32>
    %222 = arith.mulf %217, %221 : vector<16x8xf32>
    %223 = arith.truncf %222 : vector<16x8xf32> to vector<16x8xbf16>
    %cst_70 = arith.constant dense<0.000000e+00> : vector<16x16xf32>
    %224 = tpu.matmul %223, %211, %cst_70 {dimension_numbers = #tpu.dot_dimension_numbers<[1], [0], [0], [1], [0, 0, 1, 1], [], []>} : vector<16x8xbf16>, vector<8x16xbf16>, vector<16x16xf32> -> vector<16x16xf32>
    %225 = tpu.concatenate %205, %224 in 1 : vector<16x16xf32>, vector<16x16xf32> -> vector<16x32xf32>
    %226 = vector.extract_strided_slice %178 {offsets = [16, 0], sizes = [16, 32], strides = [1, 1]} : vector<32x32xf32> to vector<16x32xf32>
    %227 = vector.extract_strided_slice %182 {offsets = [8, 0], sizes = [8, 32], strides = [1, 1]} : vector<16x32xf32> to vector<8x32xf32>
    %228 = vector.extract_strided_slice %183 {offsets = [8, 0], sizes = [8, 32], strides = [1, 1]} : vector<16x32xf32> to vector<8x32xf32>
    %229 = vector.extract_strided_slice %226 {offsets = [0, 0], sizes = [16, 16], strides = [1, 1]} : vector<16x32xf32> to vector<16x16xf32>
    %230 = arith.truncf %229 : vector<16x16xf32> to vector<16x16xbf16>
    %231 = vector.extract_strided_slice %227 {offsets = [0, 0], sizes = [8, 16], strides = [1, 1]} : vector<8x32xf32> to vector<8x16xf32>
    %232 = arith.truncf %231 : vector<8x16xf32> to vector<8x16xbf16>
    %233 = vector.extract_strided_slice %228 {offsets = [0, 0], sizes = [8, 16], strides = [1, 1]} : vector<8x32xf32> to vector<8x16xf32>
    %234 = arith.truncf %233 : vector<8x16xf32> to vector<8x16xbf16>
    %cst_71 = arith.constant dense<0.000000e+00> : vector<16x8xf32>
    %235 = tpu.matmul %230, %232, %cst_71 {dimension_numbers = #tpu.dot_dimension_numbers<[1], [1], [0], [0], [0, 0, 1, 0], [], []>} : vector<16x16xbf16>, vector<8x16xbf16>, vector<16x8xf32> -> vector<16x8xf32>
    %cst_72 = arith.constant dense<0xFF800000> : vector<16xf32>
    %236 = vector.multi_reduction <maximumf>, %235, %cst_72 [1] : vector<16x8xf32> to vector<16xf32>
    %237 = vector.shape_cast %236 : vector<16xf32> to vector<16x1xf32>
    %238 = vector.broadcast %237 : vector<16x1xf32> to vector<16x8xf32>
    %239 = arith.subf %235, %238 : vector<16x8xf32>
    %240 = math.exp %239 : vector<16x8xf32>
    %cst_73 = arith.constant dense<0.000000e+00> : vector<16xf32>
    %241 = vector.multi_reduction <add>, %240, %cst_73 [1] : vector<16x8xf32> to vector<16xf32>
    %242 = vector.shape_cast %241 : vector<16xf32> to vector<16x1xf32>
    %243 = tpu.reciprocal %242 {approx = true} : vector<16x1xf32> -> vector<16x1xf32>
    %244 = vector.broadcast %243 : vector<16x1xf32> to vector<16x8xf32>
    %245 = arith.mulf %240, %244 : vector<16x8xf32>
    %246 = arith.truncf %245 : vector<16x8xf32> to vector<16x8xbf16>
    %cst_74 = arith.constant dense<0.000000e+00> : vector<16x16xf32>
    %247 = tpu.matmul %246, %234, %cst_74 {dimension_numbers = #tpu.dot_dimension_numbers<[1], [0], [0], [1], [0, 0, 1, 1], [], []>} : vector<16x8xbf16>, vector<8x16xbf16>, vector<16x16xf32> -> vector<16x16xf32>
    %248 = vector.extract_strided_slice %226 {offsets = [0, 16], sizes = [16, 16], strides = [1, 1]} : vector<16x32xf32> to vector<16x16xf32>
    %249 = arith.truncf %248 : vector<16x16xf32> to vector<16x16xbf16>
    %250 = vector.extract_strided_slice %227 {offsets = [0, 16], sizes = [8, 16], strides = [1, 1]} : vector<8x32xf32> to vector<8x16xf32>
    %251 = arith.truncf %250 : vector<8x16xf32> to vector<8x16xbf16>
    %252 = vector.extract_strided_slice %228 {offsets = [0, 16], sizes = [8, 16], strides = [1, 1]} : vector<8x32xf32> to vector<8x16xf32>
    %253 = arith.truncf %252 : vector<8x16xf32> to vector<8x16xbf16>
    %cst_75 = arith.constant dense<0.000000e+00> : vector<16x8xf32>
    %254 = tpu.matmul %249, %251, %cst_75 {dimension_numbers = #tpu.dot_dimension_numbers<[1], [1], [0], [0], [0, 0, 1, 0], [], []>} : vector<16x16xbf16>, vector<8x16xbf16>, vector<16x8xf32> -> vector<16x8xf32>
    %cst_76 = arith.constant dense<0xFF800000> : vector<16xf32>
    %255 = vector.multi_reduction <maximumf>, %254, %cst_76 [1] : vector<16x8xf32> to vector<16xf32>
    %256 = vector.shape_cast %255 : vector<16xf32> to vector<16x1xf32>
    %257 = vector.broadcast %256 : vector<16x1xf32> to vector<16x8xf32>
    %258 = arith.subf %254, %257 : vector<16x8xf32>
    %259 = math.exp %258 : vector<16x8xf32>
    %cst_77 = arith.constant dense<0.000000e+00> : vector<16xf32>
    %260 = vector.multi_reduction <add>, %259, %cst_77 [1] : vector<16x8xf32> to vector<16xf32>
    %261 = vector.shape_cast %260 : vector<16xf32> to vector<16x1xf32>
    %262 = tpu.reciprocal %261 {approx = true} : vector<16x1xf32> -> vector<16x1xf32>
    %263 = vector.broadcast %262 : vector<16x1xf32> to vector<16x8xf32>
    %264 = arith.mulf %259, %263 : vector<16x8xf32>
    %265 = arith.truncf %264 : vector<16x8xf32> to vector<16x8xbf16>
    %cst_78 = arith.constant dense<0.000000e+00> : vector<16x16xf32>
    %266 = tpu.matmul %265, %253, %cst_78 {dimension_numbers = #tpu.dot_dimension_numbers<[1], [0], [0], [1], [0, 0, 1, 1], [], []>} : vector<16x8xbf16>, vector<8x16xbf16>, vector<16x16xf32> -> vector<16x16xf32>
    %267 = tpu.concatenate %247, %266 in 1 : vector<16x16xf32>, vector<16x16xf32> -> vector<16x32xf32>
    %268 = tpu.concatenate %225, %267 in 0 : vector<16x32xf32>, vector<16x32xf32> -> vector<32x32xf32>
    %269 = arith.truncf %268 : vector<32x32xf32> to vector<32x32xbf16>
    %c0_79 = arith.constant 0 : index
    %c0_80 = arith.constant 0 : index
    %270 = vector.load %arg14[%c0_79, %c0_80] : memref<32x32xbf16, #tpu.memory_space<vmem>>, vector<32x32xbf16>
    %cst_81 = arith.constant dense<0.000000e+00> : vector<32x32xf32>
    %271 = tpu.matmul %269, %270, %cst_81 {dimension_numbers = #tpu.dot_dimension_numbers<[1], [0], [0], [1], [0, 0, 1, 1], [], []>} : vector<32x32xbf16>, vector<32x32xbf16>, vector<32x32xf32> -> vector<32x32xf32>
    %c0_82 = arith.constant 0 : index
    %c0_83 = arith.constant 0 : index
    %272 = vector.load %arg15[%c0_82, %c0_83] : memref<1x32xf32, #tpu.memory_space<vmem>>, vector<1x32xf32>
    %273 = vector.broadcast %272 : vector<1x32xf32> to vector<32x32xf32>
    %274 = arith.addf %271, %273 : vector<32x32xf32>
    %275 = arith.addf %274, %1 : vector<32x32xf32>
    %276 = arith.addf %175, %3 : vector<16x32xf32>
    %277 = vector.shape_cast %276 : vector<16x32xf32> to vector<2x8x32xf32>
    %c0_84 = arith.constant 0 : index
    %c0_85 = arith.constant 0 : index
    %c0_86 = arith.constant 0 : index
    %278 = vector.load %arg23[%c0_84, %c0_85, %c0_86] : memref<2x8x32xf32, #tpu.memory_space<vmem>>, vector<2x8x32xf32>
    tpu.vector_store %arg23[%c0_84, %c0_85, %c0_86], %277 {strides = array<i32>} : memref<2x8x32xf32, #tpu.memory_space<vmem>>, vector<2x8x32xf32>,
    %c0_87 = arith.constant 0 : index
    %c0_88 = arith.constant 0 : index
    %279 = vector.load %arg16[%c0_87, %c0_88] : memref<1x32xf32, #tpu.memory_space<vmem>>, vector<1x32xf32>
    %c0_89 = arith.constant 0 : index
    %c0_90 = arith.constant 0 : index
    %280 = vector.load %arg17[%c0_89, %c0_90] : memref<1x32xf32, #tpu.memory_space<vmem>>, vector<1x32xf32>
    %cst_91 = arith.constant dense<0.000000e+00> : vector<32xf32>
    %281 = vector.multi_reduction <add>, %275, %cst_91 [1] : vector<32x32xf32> to vector<32xf32>
    %282 = vector.shape_cast %281 : vector<32xf32> to vector<32x1xf32>
    %cst_92 = arith.constant 3.200000e+01 : f32
    %283 = vector.broadcast %cst_92 : f32 to vector<32x1xf32>
    %284 = arith.divf %282, %283 : vector<32x1xf32>
    %285 = vector.broadcast %284 : vector<32x1xf32> to vector<32x32xf32>
    %286 = arith.subf %275, %285 : vector<32x32xf32>
    %287 = arith.mulf %286, %286 : vector<32x32xf32>
    %cst_93 = arith.constant dense<0.000000e+00> : vector<32xf32>
    %288 = vector.multi_reduction <add>, %287, %cst_93 [1] : vector<32x32xf32> to vector<32xf32>
    %289 = vector.shape_cast %288 : vector<32xf32> to vector<32x1xf32>
    %cst_94 = arith.constant 3.200000e+01 : f32
    %290 = vector.broadcast %cst_94 : f32 to vector<32x1xf32>
    %291 = arith.divf %289, %290 : vector<32x1xf32>
    %292 = vector.broadcast %284 : vector<32x1xf32> to vector<32x32xf32>
    %293 = arith.subf %275, %292 : vector<32x32xf32>
    %cst_95 = arith.constant 9.99999974E-6 : f32
    %294 = vector.broadcast %cst_95 : f32 to vector<32x1xf32>
    %295 = arith.addf %291, %294 : vector<32x1xf32>
    %296 = math.rsqrt %295 : vector<32x1xf32>
    %297 = vector.broadcast %296 : vector<32x1xf32> to vector<32x32xf32>
    %298 = arith.mulf %293, %297 : vector<32x32xf32>
    %299 = vector.broadcast %279 : vector<1x32xf32> to vector<32x32xf32>
    %300 = arith.mulf %298, %299 : vector<32x32xf32>
    %301 = vector.broadcast %280 : vector<1x32xf32> to vector<32x32xf32>
    %302 = arith.addf %300, %301 : vector<32x32xf32>
    %303 = arith.truncf %302 : vector<32x32xf32> to vector<32x32xbf16>
    %c0_96 = arith.constant 0 : index
    %c0_97 = arith.constant 0 : index
    %304 = vector.load %arg18[%c0_96, %c0_97] : memref<32x128xbf16, #tpu.memory_space<vmem>>, vector<32x128xbf16>
    %cst_98 = arith.constant dense<0.000000e+00> : vector<32x128xf32>
    %305 = tpu.matmul %303, %304, %cst_98 {dimension_numbers = #tpu.dot_dimension_numbers<[1], [0], [0], [1], [0, 0, 1, 1], [], []>} : vector<32x32xbf16>, vector<32x128xbf16>, vector<32x128xf32> -> vector<32x128xf32>
    %c0_99 = arith.constant 0 : index
    %c0_100 = arith.constant 0 : index
    %306 = vector.load %arg19[%c0_99, %c0_100] : memref<1x128xf32, #tpu.memory_space<vmem>>, vector<1x128xf32>
    %307 = vector.broadcast %306 : vector<1x128xf32> to vector<32x128xf32>
    %308 = arith.addf %305, %307 : vector<32x128xf32>
    %309 = arith.mulf %308, %308 : vector<32x128xf32>
    %310 = arith.mulf %308, %309 : vector<32x128xf32>
    %cst_101 = arith.constant 4.471500e-02 : f32
    %311 = vector.broadcast %cst_101 : f32 to vector<32x128xf32>
    %312 = arith.mulf %311, %310 : vector<32x128xf32>
    %313 = arith.addf %308, %312 : vector<32x128xf32>
    %cst_102 = arith.constant 0.797884583 : f32
    %314 = vector.broadcast %cst_102 : f32 to vector<32x128xf32>
    %315 = arith.mulf %314, %313 : vector<32x128xf32>
    %316 = math.tanh %315 : vector<32x128xf32>
    %cst_103 = arith.constant 1.000000e+00 : f32
    %317 = vector.broadcast %cst_103 : f32 to vector<32x128xf32>
    %318 = arith.addf %317, %316 : vector<32x128xf32>
    %cst_104 = arith.constant 5.000000e-01 : f32
    %319 = vector.broadcast %cst_104 : f32 to vector<32x128xf32>
    %320 = arith.mulf %319, %318 : vector<32x128xf32>
    %321 = arith.mulf %308, %320 : vector<32x128xf32>
    %322 = arith.truncf %321 : vector<32x128xf32> to vector<32x128xbf16>
    %c0_105 = arith.constant 0 : index
    %c0_106 = arith.constant 0 : index
    %323 = vector.load %arg20[%c0_105, %c0_106] : memref<128x32xbf16, #tpu.memory_space<vmem>>, vector<128x32xbf16>
    %cst_107 = arith.constant dense<0.000000e+00> : vector<32x32xf32>
    %324 = tpu.matmul %322, %323, %cst_107 {dimension_numbers = #tpu.dot_dimension_numbers<[1], [0], [0], [1], [0, 0, 1, 1], [], []>} : vector<32x128xbf16>, vector<128x32xbf16>, vector<32x32xf32> -> vector<32x32xf32>
    %c0_108 = arith.constant 0 : index
    %c0_109 = arith.constant 0 : index
    %325 = vector.load %arg21[%c0_108, %c0_109] : memref<1x32xf32, #tpu.memory_space<vmem>>, vector<1x32xf32>
    %326 = vector.broadcast %325 : vector<1x32xf32> to vector<32x32xf32>
    %327 = arith.addf %324, %326 : vector<32x32xf32>
    %328 = arith.addf %327, %275 : vector<32x32xf32>
    %329 = vector.shape_cast %328 : vector<32x32xf32> to vector<2x16x32xf32>
    %c0_110 = arith.constant 0 : index
    %c0_111 = arith.constant 0 : index
    %c0_112 = arith.constant 0 : index
    %330 = vector.load %arg22[%c0_110, %c0_111, %c0_112] : memref<2x16x32xf32, #tpu.memory_space<vmem>>, vector<2x16x32xf32>
    tpu.vector_store %arg22[%c0_110, %c0_111, %c0_112], %329 {strides = array<i32>} : memref<2x16x32xf32, #tpu.memory_space<vmem>>, vector<2x16x32xf32>,
    return
  }
  func.func @transform_0(%arg0: i32) -> (i32, i32, i32) {
    %c0_i32 = arith.constant 0 : i32
    %c0_i32_0 = arith.constant 0 : i32
    %c0_i32_1 = arith.constant 0 : i32
    return %arg0, %c0_i32, %c0_i32_0 : i32, i32, i32
  }
  func.func @transform_1(%arg0: i32) -> (i32, i32, i32) {
    %c0_i32 = arith.constant 0 : i32
    %c0_i32_0 = arith.constant 0 : i32
    %c0_i32_1 = arith.constant 0 : i32
    return %arg0, %c0_i32, %c0_i32_0 : i32, i32, i32
  }
  func.func @transform_2(%arg0: i32) -> (i32, i32, i32) {
    %c0_i32 = arith.constant 0 : i32
    %c0_i32_0 = arith.constant 0 : i32
    %c0_i32_1 = arith.constant 0 : i32
    return %arg0, %c0_i32, %c0_i32_0 : i32, i32, i32
  }
  func.func @transform_3(%arg0: i32) -> (i32, i32) {
    %c0_i32 = arith.constant 0 : i32
    %c0_i32_0 = arith.constant 0 : i32
    %c0_i32_1 = arith.constant 0 : i32
    return %c0_i32, %c0_i32_0 : i32, i32
  }
  func.func @transform_4(%arg0: i32) -> (i32, i32) {
    %c0_i32 = arith.constant 0 : i32
    %c0_i32_0 = arith.constant 0 : i32
    %c0_i32_1 = arith.constant 0 : i32
    return %c0_i32, %c0_i32_0 : i32, i32
  }
  func.func @transform_5(%arg0: i32) -> (i32, i32) {
    %c0_i32 = arith.constant 0 : i32
    %c0_i32_0 = arith.constant 0 : i32
    %c0_i32_1 = arith.constant 0 : i32
    return %c0_i32, %c0_i32_0 : i32, i32
  }
  func.func @transform_6(%arg0: i32) -> (i32, i32) {
    %c0_i32 = arith.constant 0 : i32
    %c0_i32_0 = arith.constant 0 : i32
    %c0_i32_1 = arith.constant 0 : i32
    return %c0_i32, %c0_i32_0 : i32, i32
  }
  func.func @transform_7(%arg0: i32) -> (i32, i32) {
    %c0_i32 = arith.constant 0 : i32
    %c0_i32_0 = arith.constant 0 : i32
    %c0_i32_1 = arith.constant 0 : i32
    return %c0_i32, %c0_i32_0 : i32, i32
  }
  func.func @transform_8(%arg0: i32) -> (i32, i32) {
    %c0_i32 = arith.constant 0 : i32
    %c0_i32_0 = arith.constant 0 : i32
    %c0_i32_1 = arith.constant 0 : i32
    return %c0_i32, %c0_i32_0 : i32, i32
  }
  func.func @transform_9(%arg0: i32) -> (i32, i32) {
    %c0_i32 = arith.constant 0 : i32
    %c0_i32_0 = arith.constant 0 : i32
    %c0_i32_1 = arith.constant 0 : i32
    return %c0_i32, %c0_i32_0 : i32, i32
  }
  func.func @transform_10(%arg0: i32) -> (i32, i32) {
    %c0_i32 = arith.constant 0 : i32
    %c0_i32_0 = arith.constant 0 : i32
    %c0_i32_1 = arith.constant 0 : i32
    return %c0_i32, %c0_i32_0 : i32, i32
  }
  func.func @transform_11(%arg0: i32) -> (i32, i32) {
    %c0_i32 = arith.constant 0 : i32
    %c0_i32_0 = arith.constant 0 : i32
    %c0_i32_1 = arith.constant 0 : i32
    return %c0_i32, %c0_i32_0 : i32, i32
  }
  func.func @transform_12(%arg0: i32) -> (i32, i32) {
    %c0_i32 = arith.constant 0 : i32
    %c0_i32_0 = arith.constant 0 : i32
    %c0_i32_1 = arith.constant 0 : i32
    return %c0_i32, %c0_i32_0 : i32, i32
  }
  func.func @transform_13(%arg0: i32) -> (i32, i32) {
    %c0_i32 = arith.constant 0 : i32
    %c0_i32_0 = arith.constant 0 : i32
    %c0_i32_1 = arith.constant 0 : i32
    return %c0_i32, %c0_i32_0 : i32, i32
  }
  func.func @transform_14(%arg0: i32) -> (i32, i32) {
    %c0_i32 = arith.constant 0 : i32
    %c0_i32_0 = arith.constant 0 : i32
    %c0_i32_1 = arith.constant 0 : i32
    return %c0_i32, %c0_i32_0 : i32, i32
  }
  func.func @transform_15(%arg0: i32) -> (i32, i32) {
    %c0_i32 = arith.constant 0 : i32
    %c0_i32_0 = arith.constant 0 : i32
    %c0_i32_1 = arith.constant 0 : i32
    return %c0_i32, %c0_i32_0 : i32, i32
  }
  func.func @transform_16(%arg0: i32) -> (i32, i32) {
    %c0_i32 = arith.constant 0 : i32
    %c0_i32_0 = arith.constant 0 : i32
    %c0_i32_1 = arith.constant 0 : i32
    return %c0_i32, %c0_i32_0 : i32, i32
  }
  func.func @transform_17(%arg0: i32) -> (i32, i32) {
    %c0_i32 = arith.constant 0 : i32
    %c0_i32_0 = arith.constant 0 : i32
    %c0_i32_1 = arith.constant 0 : i32
    return %c0_i32, %c0_i32_0 : i32, i32
  }
  func.func @transform_18(%arg0: i32) -> (i32, i32) {
    %c0_i32 = arith.constant 0 : i32
    %c0_i32_0 = arith.constant 0 : i32
    %c0_i32_1 = arith.constant 0 : i32
    return %c0_i32, %c0_i32_0 : i32, i32
  }
  func.func @transform_19(%arg0: i32) -> (i32, i32) {
    %c0_i32 = arith.constant 0 : i32
    %c0_i32_0 = arith.constant 0 : i32
    %c0_i32_1 = arith.constant 0 : i32
    return %c0_i32, %c0_i32_0 : i32, i32
  }
  func.func @transform_20(%arg0: i32) -> (i32, i32) {
    %c0_i32 = arith.constant 0 : i32
    %c0_i32_0 = arith.constant 0 : i32
    %c0_i32_1 = arith.constant 0 : i32
    return %c0_i32, %c0_i32_0 : i32, i32
  }
  func.func @transform_21(%arg0: i32) -> (i32, i32, i32) {
    %c0_i32 = arith.constant 0 : i32
    %c0_i32_0 = arith.constant 0 : i32
    %c0_i32_1 = arith.constant 0 : i32
    return %arg0, %c0_i32, %c0_i32_0 : i32, i32, i32
  }
  func.func @transform_22(%arg0: i32) -> (i32, i32, i32) {
    %c0_i32 = arith.constant 0 : i32
    %c0_i32_0 = arith.constant 0 : i32
    %c0_i32_1 = arith.constant 0 : i32
    return %arg0, %c0_i32, %c0_i32_0 : i32, i32, i32
  }
}

</mosaic_0001>

<bundles_post_ra>
// kernel: tpu_custom_call.1
= control target key start
LH: loop header
LB: loop body
LE: loop exit
PB: predicated region body
PF: predicated region fallthrough
CT: control target
= control target key end

     0   :  { %s2730_s0 = inlined_call_operand.vmem [shape: f32[2,16,32], index: 0, kind: input, shape index: {}]   ;;  %s2731_s1 = inlined_call_operand.vmem [shape: f32[2,8,32], index: 1, kind: input, shape index: {}]   ;;  %s2732_s2 = inlined_call_operand.hbm [shape: s32[2,1,16], index: 2, kind: input, shape index: {}]   ;;  %s2733_s3 = inlined_call_operand.vmem [shape: f32[1,32], index: 3, kind: input, shape index: {}]   ;;  %s2734_s4 = inlined_call_operand.vmem [shape: f32[1,32], index: 4, kind: input, shape index: {}]   ;;  %s2735_s5 = inlined_call_operand.hbm [shape: f32[1,32], index: 5, kind: input, shape index: {}]   ;;  %s2736_s6 = inlined_call_operand.hbm [shape: f32[1,32], index: 6, kind: input, shape index: {}]   ;;  %s2737_s7 = inlined_call_operand.vmem [shape: bf16[32,32], index: 7, kind: input, shape index: {}]   ;;  %s2738_s8 = inlined_call_operand.vmem [shape: bf16[32,64], index: 8, kind: input, shape index: {}]   ;;  %s2739_s9 = inlined_call_operand.hbm [shape: bf16[32,32], index: 9, kind: input, shape index: {}]   ;;  %s2740_s10 = inlined_call_operand.hbm [shape: f32[1,32], index: 10, kind: input, shape index: {}]   ;;  %s2741_s11 = inlined_call_operand.hbm [shape: bf16[32,32], index: 11, kind: input, shape index: {}]   ;;  %s2742_s12 = inlined_call_operand.hbm [shape: bf16[32,64], index: 12, kind: input, shape index: {}]   ;;  %s2743_s13 = inlined_call_operand.hbm [shape: bf16[32,32], index: 13, kind: input, shape index: {}]   ;;  %s2744_s14 = inlined_call_operand.hbm [shape: f32[1,32], index: 14, kind: input, shape index: {}]   ;;  %s2745_s15 = inlined_call_operand.hbm [shape: f32[1,32], index: 15, kind: input, shape index: {}]   ;;  %s2746_s16 = inlined_call_operand.hbm [shape: f32[1,32], index: 16, kind: input, shape index: {}]   ;;  %s2747_s17 = inlined_call_operand.hbm [shape: bf16[32,128], index: 17, kind: input, shape index: {}]   ;;  %s2748_s18 = inlined_call_operand.hbm [shape: f32[1,128], index: 18, kind: input, shape index: {}]   ;;  %s2749_s19 = inlined_call_operand.vmem [shape: bf16[128,32], index: 19, kind: input, shape index: {}]   ;;  %s2750_s20 = inlined_call_operand.vmem [shape: f32[1,32], index: 20, kind: input, shape index: {}]   ;;  %s2751_s21 = inlined_call_operand.hbm [shape: f32[2,16,32], index: 21, kind: output, shape index: {0}]   ;;  %s2752_s22 = inlined_call_operand.hbm [shape: f32[2,8,32], index: 22, kind: output, shape index: {1}]  }
   0x1   :  { %2755 = sst [smem:[#allocation35_spill]] %s2730_s0 }
   0x2   :  { %2756 = sst [smem:[#allocation36_spill]] %s2731_s1 }
   0x3   :  { %2757 = sst [smem:[#allocation37_spill]] %s2732_s2 }
   0x4   :  { %2758 = sst [smem:[#allocation38_spill]] %s2733_s3 }
   0x5   :  { %2759 = sst [smem:[#allocation39_spill]] %s2734_s4 }
   0x6   :  { %2760 = sst [smem:[#allocation40_spill]] %s2735_s5 }
   0x7   :  { %2761 = sst [smem:[#allocation41_spill]] %s2736_s6 }
   0x8   :  { %28 = vsyncpa [#allocation3], 0 }
   0x9   :  { %29 = vsyncpa [#allocation6], 0 }
   0xa   :  { %30 = vsyncpa [#allocation9], 0 }
   0xb   :  { %31 = vsyncpa [#allocation12], 0 }
   0xc   :  { %32 = vsyncpa [#allocation15], 0 }
   0xd   :  { %33 = vsyncpa [#allocation18], 0 }
   0xe   :  { %34 = vsyncpa [#allocation21], 0 }
   0xf   :  { %35 = vsyncpa [#allocation4], 0  ;;  %s2762_s29 = sld [smem:[#allocation40_spill]] }
  0x15   :  { %s63_s30 = sshll.u32 %s2762_s29, 4  ;;  %s64_s30 = int_to_ptr.hbm [resolvable:$true] %s63_s30 }
  0x16   :  { %36 = vsyncpa [#allocation25], 0  ;;  %s2186_s4 = smov [#allocation5]   ;;  %s88_s5 = sshll.u32 %s2739_s9, 4  ;;  %s89_s5 = int_to_ptr.hbm [resolvable:$true] %s88_s5 }
  0x17   :  { %s65_s0 = sshll.u32 %s2186_s4, 4  ;;  %s2187_s24 = smov [#allocation8]   ;;  %s66_s0 = int_to_ptr.vmem [resolvable:$true] %s65_s0 }
  0x18   :  { %68 = dma.hbm_to_vmem [thread:$0]  %s64_s30, 16, %s66_s0, [#allocation6]  }
  0x19   :  { %s90_s6 = sshll.u32 %s2187_s24, 4  ;;  %s2188_s25 = smov 64   ;;  %s91_s6 = int_to_ptr.vmem [resolvable:$true] %s90_s6 }
  0x1a   :  { %s2189_s26 = smov 4   ;;  %s112_s3 = sshll.u32 %s2741_s11, 4  ;;  %s113_s3 = int_to_ptr.hbm [resolvable:$true] %s112_s3 }
  0x1b   :  { %96 = dma.hbm_to_vmem [thread:$0]  %s89_s5, 256, %s91_s6, [#allocation9], %s2188_s25, %s2188_s25, %s2189_s26  }
  0x1c   :  { %s2190_s28 = smov [#allocation11]   ;;  %s138_s4 = sshll.u32 %s2743_s13, 4  ;;  %s139_s4 = int_to_ptr.hbm [resolvable:$true] %s138_s4 }
  0x1d   :  { %s114_s29 = sshll.u32 %s2190_s28, 4  ;;  %s2191_s0 = smov [#allocation14]   ;;  %s115_s29 = int_to_ptr.vmem [resolvable:$true] %s114_s29 }
  0x1e   :  { %120 = dma.hbm_to_vmem [thread:$0]  %s113_s3, 256, %s115_s29, [#allocation12], %s2188_s25, %s2188_s25, %s2189_s26  }
  0x1f   :  { %s140_s23 = sshll.u32 %s2191_s0, 4  ;;  %s163_s24 = sshll.u32 %s2745_s15, 4  ;;  %s141_s23 = int_to_ptr.vmem [resolvable:$true] %s140_s23  ;;  %s164_s24 = int_to_ptr.hbm [resolvable:$true] %s163_s24 }
  0x20   :  { %146 = dma.hbm_to_vmem [thread:$0]  %s139_s4, 256, %s141_s23, [#allocation15], %s2188_s25, %s2188_s25, %s2189_s26  }
  0x21   :  { %s184_s13 = sshll.u32 %s2747_s17, 4  ;;  %s2192_s2 = smov [#allocation17]   ;;  %s185_s13 = int_to_ptr.hbm [resolvable:$true] %s184_s13 }
  0x22   :  { %s165_s27 = sshll.u32 %s2192_s2, 4  ;;  %s2193_s3 = smov [#allocation20]   ;;  %s166_s27 = int_to_ptr.vmem [resolvable:$true] %s165_s27 }
  0x23   :  { %168 = dma.hbm_to_vmem [thread:$0]  %s164_s24, 16, %s166_s27, [#allocation18]  }
  0x24   :  { %s186_s28 = sshll.u32 %s2193_s3, 4  ;;  %s2763_s15 = sld [smem:[#allocation37_spill]]  ;;  %s187_s28 = int_to_ptr.vmem [resolvable:$true] %s186_s28 }
  0x25   :  { %192 = dma.hbm_to_vmem [thread:$0]  %s185_s13, 256, %s187_s28, [#allocation21], %s2188_s25, %s2188_s25, %s2189_s26  }
  0x26   :  { %s2194_s4 = smov [#allocation2]   ;;  %s2764_s1 = sld [smem:[#allocation41_spill]] }
  0x27   :  { %s47_s0 = sshll.u32 %s2194_s4, 4  ;;  %s2195_s24 = smov 16   ;;  %s48_s0 = int_to_ptr.vmem [resolvable:$true] %s47_s0 }
  0x28   :  { %s2196_s11 = smov 1   ;;  %s2197_s6 = smov [#allocation7]  }
  0x29   :  { %s76_s2 = sshll.u32 %s2197_s6, 4  ;;  %s102_s29 = sshll.u32 %s2740_s10, 4  ;;  %s77_s2 = int_to_ptr.vmem [resolvable:$true] %s76_s2  ;;  %s103_s29 = int_to_ptr.hbm [resolvable:$true] %s102_s29 }
  0x2a   :  { %s45_s30 = sshll.u32 %s2763_s15, 4  ;;  %s125_s9 = sshll.u32 %s2742_s12, 4  ;;  %s46_s30 = int_to_ptr.hbm [resolvable:$true] %s45_s30  ;;  %s126_s9 = int_to_ptr.hbm [resolvable:$true] %s125_s9 }
  0x2b   :  { %53 = dma.hbm_to_vmem [thread:$0]  %s46_s30, 32, %s48_s0, [#allocation3], %s2195_s24, %s2195_s24, %s2196_s11  }
  0x2c   :  { %s74_s5 = sshll.u32 %s2764_s1, 4  ;;  %s2198_s15 = smov [#allocation10]   ;;  %s75_s5 = int_to_ptr.hbm [resolvable:$true] %s74_s5 }
  0x2d   :  { %79 = dma.hbm_to_vmem [thread:$0]  %s75_s5, 16, %s77_s2, [#allocation6]  }
  0x2e   :  { %s104_s4 = sshll.u32 %s2198_s15, 4  ;;  %s2199_s30 = smov [#allocation13]   ;;  %s105_s4 = int_to_ptr.vmem [resolvable:$true] %s104_s4 }
  0x2f   :  { %107 = dma.hbm_to_vmem [thread:$0]  %s103_s29, 16, %s105_s4, [#allocation9]  }
  0x30   :  { %s127_s0 = sshll.u32 %s2199_s30, 4  ;;  %s152_s1 = sshll.u32 %s2744_s14, 4  ;;  %s128_s0 = int_to_ptr.vmem [resolvable:$true] %s127_s0  ;;  %s153_s1 = int_to_ptr.hbm [resolvable:$true] %s152_s1 }
  0x31   :  { %133 = dma.hbm_to_vmem [thread:$0]  %s126_s9, 256, %s128_s0, [#allocation12], %s2188_s25, %s2188_s25, %s2189_s26  }
  0x32   :  { %s174_s12 = sshll.u32 %s2746_s16, 4  ;;  %s2200_s11 = smov [#allocation16]   ;;  %s175_s12 = int_to_ptr.hbm [resolvable:$true] %s174_s12 }
  0x33   :  { %s154_s6 = sshll.u32 %s2200_s11, 4  ;;  %s2201_s2 = smov [#allocation19]   ;;  %s155_s6 = int_to_ptr.vmem [resolvable:$true] %s154_s6 }
  0x34   :  { %157 = dma.hbm_to_vmem [thread:$0]  %s153_s1, 16, %s155_s6, [#allocation15]  }
  0x35   :  { %s176_s27 = sshll.u32 %s2201_s2, 4  ;;  %s198_s14 = sshll.u32 %s2748_s18, 4  ;;  %s177_s27 = int_to_ptr.vmem [resolvable:$true] %s176_s27  ;;  %s199_s14 = int_to_ptr.hbm [resolvable:$true] %s198_s14 }
  0x36   :  { %179 = dma.hbm_to_vmem [thread:$0]  %s175_s12, 16, %s177_s27, [#allocation18]  }
  0x37   :  { %s2202_s13 = smov [#allocation22]  }
  0x38   :  { %s200_s25 = sshll.u32 %s2202_s13, 4  ;;  %s201_s25 = int_to_ptr.vmem [resolvable:$true] %s200_s25 }
  0x39   :  { %203 = dma.hbm_to_vmem [thread:$0]  %s199_s14, 16, %s201_s25, [#allocation21]  }
  0x3a   :  { %2168 = dma.done.wait [#allocation3], 32  }
  0x3b   :  { %2169 = vsyncadd [#allocation3], 4294967264 }
  0x3c   :  { %2170 = dma.done.wait [#allocation6], 32  }
  0x3d   :  { %2171 = vsyncadd [#allocation6], 4294967264 }
  0x3e   :  { %2172 = dma.done.wait [#allocation9], 272  }
  0x3f   :  { %2173 = vsyncadd [#allocation9], 4294967024 }
  0x40   :  { %2174 = dma.done.wait [#allocation12], 512  }
  0x41   :  { %2175 = vsyncadd [#allocation12], 4294966784 }
  0x42   :  { %2176 = dma.done.wait [#allocation15], 272  }
  0x43   :  { %2177 = vsyncadd [#allocation15], 4294967024 }
  0x44   :  { %2178 = dma.done.wait [#allocation18], 32  }
  0x45   :  { %2179 = vsyncadd [#allocation18], 4294967264 }
  0x46   :  { %2180 = dma.done.wait [#allocation21], 272  }
  0x47   :  { %2181 = vsyncadd [#allocation21], 4294967024  ;;  %vm271_vm0 = vcmask 261120   ;;  %s2765_s26 = sld [smem:[#allocation36_spill]]  ;;  %v2203_v8 = vmov 32.0   ;;  %v1656_v35 = vld [vmem:[%s2737_s7 + $0x8] sm:$0xff] }
  0x48   :  { %s2766_s15 = sld [smem:[#allocation35_spill]]  ;;  %1728 = vrcp.f32 %v2203_v8  ;;  %463 = vmatpush.bf16.msra.mxu1 %v1656_v35  ;;  %v1655_v39 = vld [vmem:[%s2737_s7] sm:$0xff]  ;;  %v1658_v43 = vld [vmem:[%s2738_s8 + $0x8] sm:$0xff]  ;;  %vm517_vm14 = vcmask 130048   ;;  %s2204_s16 = smov 96  }
  0x49   :  { %v1657_v48 = vld [vmem:[%s2738_s8] sm:$0xff]  ;;  %s2767_s27 = sld [smem:[#allocation38_spill]]  ;;  %s2206_s28 = smov 112  }
  0x4a   :  { %s2768_s14 = sld [smem:[#allocation39_spill]]  ;;  %s2207_s9 = smov 80  }
  0x4b   :  { %s1516_s18 = sshll.u32 %s2752_s22, 4  ;;  %s1503_s0 = sshll.u32 %s2751_s21, 4  ;;  %s1517_s18 = int_to_ptr.hbm [resolvable:$true] %s1516_s18  ;;  %s1504_s0 = int_to_ptr.hbm [resolvable:$true] %s1503_s0 }
  0x4c   :  { %464 = vmatpush.bf16.msra.mxu1 %v1655_v39 }
  0x4d   :  { %v2386_v0 = vld [vmem:[%s2765_s26] sm:$0xff]  ;;  %v2397_v4 = vld [vmem:[%s2765_s26 + $0x8] sm:$0xff]  ;;  %s2209_s26 = smov 128  }
  0x4e   :  { %v261_v1 = vld [vmem:[%s2766_s15] sm:$0xff]  ;;  %v383_v2 = vsel %vm271_vm0, %v2386_v0, 0.0  ;;  %v262_v5 = vld [vmem:[%s2766_s15 + $0x8] sm:$0xff]  ;;  %v386_v6 = vsel %vm271_vm0, %v2397_v4, 0.0  ;;  %v1729_v9 = vpop.eup %1728 }
  0x4f   :  { %v272_v3 = vsel %vm271_vm0, %v261_v1, 0.0  ;;  %384 = vadd.xlane.f32.xlu0 %v383_v2  ;;  %v275_v7 = vsel %vm271_vm0, %v262_v5, 0.0  ;;  %v285_v10 = vmul.f32 32.0, %v1729_v9  ;;  %vm289_vm1 = vweird.f32 %v1729_v9 }
  0x50   :  { %273 = vadd.xlane.f32.xlu1 %v272_v3  ;;  %501 = vmatpush.bf16.msrb.mxu1 %v1658_v43 }
  0x51   :  { %v286_v11 = vsub.f32 1.0, %v285_v10 }
  0x53   :  { %v287_v12 = vmul.f32 %v1729_v9, %v286_v11 }
  0x54   :  { %502 = vmatpush.bf16.msrb.mxu1 %v1657_v48 }
  0x55   :  { %v288_v13 = vadd.f32 %v1729_v9, %v287_v12 }
  0x57   :  { %387 = vadd.xlane.f32.xlu0 %v386_v6  ;;  %v2405_v14 = vsel %vm289_vm1, %v1729_v9, %v288_v13  ;;  %v1718_v9 = vld [vmem:[#allocation5] ss:$0 sm:$0xff] }
  0x58   :  { %276 = vadd.xlane.f32.xlu1 %v275_v7 }
  0xc2   :  { %v385_v15 = vpop.xlane.xlu0 %384 }
  0xc3   :  { %v274_v16 = vpop.xlane.xlu1 %273  ;;  %v389_v17 = vmul.f32 %v385_v15, %v2405_v14 }
  0xc4   :  { %v291_v18 = vmul.f32 %v2405_v14, %v274_v16 }
  0xc5   :  { %v2410_v19 = vsub.f32 %v2386_v0, %v389_v17  ;;  %v1719_v17 = vld [vmem:[#allocation7] ss:$0 sm:$0xff] }
  0xc6   :  { %v2412_v20 = vsub.f32 %v261_v1, %v291_v18 }
  0xc7   :  { %v393_v21 = vmul.f32 %v2410_v19, %v2410_v19 }
  0xc8   :  { %v299_v22 = vmul.f32 %v2412_v20, %v2412_v20 }
  0xc9   :  { %v395_v23 = vsel %vm271_vm0, %v393_v21, 0.0 }
  0xca   :  { %v303_v24 = vsel %vm271_vm0, %v299_v22, 0.0  ;;  %396 = vadd.xlane.f32.xlu2 %v395_v23  ;;  %v388_v25 = vpop.xlane.xlu0 %387 }
  0xcb   :  { %304 = vadd.xlane.f32.xlu0 %v303_v24  ;;  %v277_v26 = vpop.xlane.xlu1 %276  ;;  %v390_v27 = vmul.f32 %v388_v25, %v2405_v14 }
  0xcc   :  { %v292_v28 = vmul.f32 %v2405_v14, %v277_v26 }
  0xcd   :  { %v2423_v29 = vsub.f32 %v2397_v4, %v390_v27 }
  0xce   :  { %v2425_v30 = vsub.f32 %v262_v5, %v292_v28 }
  0xcf   :  { %v394_v31 = vmul.f32 %v2423_v29, %v2423_v29 }
  0xd0   :  { %v300_v32 = vmul.f32 %v2425_v30, %v2425_v30 }
  0xd1   :  { %v398_v33 = vsel %vm271_vm0, %v394_v31, 0.0  ;;  %v2457_v31 = vld [vmem:[%s2767_s27] ss:$0 sm:$0xff] }
  0xd2   :  { %v306_v34 = vsel %vm271_vm0, %v300_v32, 0.0  ;;  %399 = vadd.xlane.f32.xlu2 %v398_v33 }
  0xd3   :  { %307 = vadd.xlane.f32.xlu1 %v306_v34  ;;  %v2464_v34 = vld [vmem:[%s2768_s14] ss:$0 sm:$0xff] }
 0x13d   :  { %v397_v36 = vpop.xlane.xlu2 %396 }
 0x13e   :  { %v305_v37 = vpop.xlane.xlu0 %304  ;;  %v401_v38 = vmul.f32 %v397_v36, %v2405_v14 }
 0x13f   :  { %v315_v41 = vmul.f32 %v305_v37, %v2405_v14  ;;  %v2475_v37 = vld [vmem:[%s2766_s15 + $0x18] sm:$0xff] }
 0x140   :  { %v403_v40 = vadd.f32 1e-05, %v401_v38  ;;  %v281_v38 = vsel %vm271_vm0, %v2475_v37, 0.0 }
 0x141   :  { %v319_v42 = vadd.f32 1e-05, %v315_v41  ;;  %282 = vadd.xlane.f32.xlu0 %v281_v38 }
 0x142   :  { %1730 = vrsqrt.f32 %v403_v40  ;;  %vm411_vm3 = vweird.f32 %v403_v40 }
 0x143   :  { %1732 = vrsqrt.f32 %v319_v42  ;;  %vm329_vm10 = vweird.f32 %v319_v42 }
 0x145   :  { %v400_v44 = vpop.xlane.xlu2 %399 }
 0x146   :  { %v308_v45 = vpop.xlane.xlu1 %307  ;;  %v402_v46 = vmul.f32 %v400_v44, %v2405_v14 }
 0x147   :  { %v316_v47 = vmul.f32 %v308_v45, %v2405_v14 }
 0x148   :  { %v1731_v49 = vpop.eup %1730  ;;  %v404_v50 = vadd.f32 1e-05, %v402_v46  ;;  %v267_v46 = vld [vmem:[#allocation2] sm:$0x1] }
 0x149   :  { %v320_v51 = vadd.f32 1e-05, %v316_v47  ;;  %v406_v52 = vmul.f32 %v1731_v49, %v403_v40  ;;  %v1733_v55 = vpop.eup %1732  ;;  %vm412_vm2 = vweird.f32 %v1731_v49  ;;  %vm514_vm15 = vcmp.gt.s32.totalorder %v267_v46, 0 }
 0x14a   :  { %1734 = vrsqrt.f32 %v404_v50  ;;  %v324_v60 = vmul.f32 %v1733_v55, %v319_v42  ;;  %vm413_vm4 = vmor %vm411_vm3, %vm412_vm2  ;;  %vm421_vm6 = vweird.f32 %v404_v50  ;;  %vm330_vm11 = vweird.f32 %v1733_v55 }
 0x14b   :  { %v407_v53 = vmul.f32 %v1731_v49, %v406_v52  ;;  %1736 = vrsqrt.f32 %v320_v51  ;;  %vm339_vm8 = vweird.f32 %v320_v51  ;;  %vm331_vm13 = vmor %vm329_vm10, %vm330_vm11  ;;  %v2205_v47 = vmov 0  }
 0x14c   :  { %v325_v3 = vmul.f32 %v1733_v55, %v324_v60  ;;  %v537_v48 = vsel %vm514_vm15, 1, %v2205_v47  ;;  %vm882_vm10 = vcmask 64512   ;;  %vm912_vm11 = vcmask 1043456  }
 0x14d   :  { %v408_v54 = vmul.f32 0.5, %v407_v53 }
 0x14e   :  { %v326_v10 = vmul.f32 0.5, %v325_v3 }
 0x14f   :  { %v409_v56 = vsub.f32 1.5, %v408_v54  ;;  %v2495_v54 = vld [vmem:[%s2766_s15 + $0x10] sm:$0xff] }
 0x150   :  { %v1735_v57 = vpop.eup %1734  ;;  %v327_v18 = vsub.f32 1.5, %v326_v10 }
 0x151   :  { %v1737_v58 = vpop.eup %1736  ;;  %v410_v59 = vmul.f32 %v1731_v49, %v409_v56  ;;  %v416_v61 = vmul.f32 %v1735_v57, %v404_v50  ;;  %vm422_vm5 = vweird.f32 %v1735_v57  ;;  %v278_v56 = vsel %vm271_vm0, %v2495_v54, 0.0 }
 0x152   :  { %v334_v62 = vmul.f32 %v1737_v58, %v320_v51  ;;  %vm423_vm7 = vmor %vm421_vm6, %vm422_vm5  ;;  %vm340_vm9 = vweird.f32 %v1737_v58  ;;  %v328_v24 = vmul.f32 %v1733_v55, %v327_v18 }
 0x153   :  { %v417_v63 = vmul.f32 %v1735_v57, %v416_v61  ;;  %v414_v2 = vsel %vm413_vm4, %v1731_v49, %v410_v59  ;;  %vm341_vm12 = vmor %vm339_vm8, %vm340_vm9  ;;  %v538_v49 = vperm.slane %v537_v48, 0 }
 0x154   :  { %v335_v1 = vmul.f32 %v1737_v58, %v334_v62  ;;  %v425_v8 = vmul.f32 %v414_v2, %v2410_v19  ;;  %v332_v27 = vsel %vm331_vm13, %v1733_v55, %v328_v24 }
 0x155   :  { %v418_v5 = vmul.f32 0.5, %v417_v63  ;;  %vm2485_vm1 = vcmp.eq.s32.totalorder %v538_v49, 1 }
 0x156   :  { %v336_v7 = vmul.f32 0.5, %v335_v1  ;;  %v430_v16 = vmul.f32 %v1718_v9, %v425_v8 }
 0x157   :  { %v419_v6 = vsub.f32 1.5, %v418_v5 }
 0x158   :  { %v337_v13 = vsub.f32 1.5, %v336_v7  ;;  %v435_v19 = vadd.f32 %v1719_v17, %v430_v16 }
 0x159   :  { %v420_v11 = vmul.f32 %v1735_v57, %v419_v6 }
 0x15a   :  { %v338_v22 = vmul.f32 %v1737_v58, %v337_v13 }
 0x15b   :  { %v424_v12 = vsel %vm423_vm7, %v1735_v57, %v420_v11 }
 0x15c   :  { %v426_v15 = vmul.f32 %v424_v12, %v2423_v29  ;;  %v342_v26 = vsel %vm341_vm12, %v1737_v58, %v338_v22  ;;  %v363_v29 = vmul.f32 %v332_v27, %v2412_v20 }
 0x15d   :  { %v364_v28 = vmul.f32 %v342_v26, %v2425_v30 }
 0x15e   :  { %v431_v21 = vmul.f32 %v1718_v9, %v426_v15  ;;  %v370_v33 = vmul.f32 %v2457_v31, %v363_v29 }
 0x15f   :  { %v371_v32 = vmul.f32 %v2457_v31, %v364_v28 }
 0x160   :  { %v436_v23 = vadd.f32 %v1719_v17, %v431_v21  ;;  %v377_v30 = vadd.f32 %v2464_v34, %v370_v33 }
 0x161   :  { %v378_v35 = vadd.f32 %v2464_v34, %v371_v32 }
 0x162   :  { %v437_v25 = vpack.c.bf16 %v436_v23, %v435_v19 }
 0x163   :  { %v2468_v36 = vpack.c.bf16 %v378_v35, %v377_v30 }
 0x164   :  { %1548 = vmatmul.msk.bf16.vlgmr.msra.gmra.mxu1 %vm271_vm0, %v437_v25 }
 0x174   :  { %1557 = vmatmul.msk.bf16.vlgmr.msrb.gmra.mxu1 %vm271_vm0, %v2468_v36 }
 0x1b4   :  { %v283_v57 = vpop.xlane.xlu0 %282 }
 0x1b5   :  { %v294_v58 = vmul.f32 %v2405_v14, %v283_v57 }
 0x1b7   :  { %v298_v59 = vsub.f32 %v2475_v37, %v294_v58 }
 0x1b9   :  { %v302_v60 = vmul.f32 %v298_v59, %v298_v59 }
 0x1bb   :  { %v312_v61 = vsel %vm271_vm0, %v302_v60, 0.0 }
 0x1e1   :  { %v466_v20 = vpop.f32.mrf.mxu1 }
 0x1e2   :  { %v515_v44 = vpack.c.bf16 %v466_v20, %v466_v20 }
 0x1e9   :  { %v2479_v39 = vpop.f32.mrf.mxu1 }
 0x1f1   :  { %v504_v40 = vpop.f32.mrf.mxu1 }
 0x1f9   :  { %v506_v41 = vpop.f32.mrf.mxu1 }
 0x1fa   :  { %v516_v42 = vpack.c.bf16 %v506_v41, %v504_v40 }
 0x1fc   :  { %554 = vrot.lane.b32.xlu1 %v516_v42, %s2204_s16  ;;  %v522_v43 = vsel %vm517_vm14, %v516_v42, 0 }
 0x1fd   :  { %531 = vmatpush.bf16.xpose.msra.mxu2 %v522_v43 }
 0x204   :  { %1559 = vmatmul.msk.bf16.vlgmr.msra.gmra.mxu2 %vm517_vm14, %v515_v44 }
 0x26e   :  { %v555_v45 = vpop.permute.xlu1 %554 }
 0x26f   :  { %567 = vmatpush.bf16.msra.mxu3 %v555_v45 }
 0x287   :  { %v533_v51 = vpop.f32.mrf.mxu2 }
 0x288   :  { %v540_v52 = vsel %vm2485_vm1, %v533_v51, -3.4028235e+38 }
 0x289   :  { %v541_v53 = vsel %vm517_vm14, %v540_v52, -inf }
 0x28a   :  { %542 = vmax.xlane.f32.xlu2 %v541_v53 }
 0x28f   :  { %v535_v55 = vpop.f32.mrf.mxu2 }
 0x292   :  { %279 = vadd.xlane.f32.xlu2 %v278_v56 }
 0x2aa   :  { %576 = vrot.lane.b32.xlu2 %v516_v42, %s2206_s28 }
 0x2d3   :  { %313 = vadd.xlane.f32.xlu2 %v312_v61 }
 0x2eb   :  { %610 = vrot.lane.b32.xlu2 %v516_v42, %s2207_s9 }
 0x2fd   :  { %v543_v62 = vpop.xlane.xlu2 %542 }
 0x2fe   :  { %v544_v63 = vsub.f32 %v540_v52, %v543_v62  ;;  %v635_v62 = vpack.c.bf16 %v2479_v39, %v2479_v39 }
 0x300   :  { %v545_v1 = vmul.f32 1.442695, %v544_v63 }
 0x302   :  { %1738 = vpow2.f32 %v545_v1 }
 0x305   :  { %v280_v2 = vpop.xlane.xlu2 %279 }
 0x306   :  { %v293_v3 = vmul.f32 %v2405_v14, %v280_v2 }
 0x308   :  { %v1739_v5 = vpop.eup %1738  ;;  %v297_v6 = vsub.f32 %v2495_v54, %v293_v3 }
 0x309   :  { %v547_v7 = vsel %vm517_vm14, %v1739_v5, 0.0 }
 0x30a   :  { %548 = vadd.xlane.f32.xlu0 %v547_v7  ;;  %v301_v8 = vmul.f32 %v297_v6, %v297_v6 }
 0x30c   :  { %v309_v9 = vsel %vm271_vm0, %v301_v8, 0.0 }
 0x30d   :  { %310 = vadd.xlane.f32.xlu1 %v309_v9  ;;  %v577_v10 = vpop.permute.xlu2 %576 }
 0x30e   :  { %v582_v11 = vsel %vm517_vm14, %v577_v10, 0 }
 0x30f   :  { %591 = vmatpush.bf16.xpose.msrb.mxu3 %v582_v11 }
 0x31e   :  { %574 = vrot.lane.b32.xlu0 %v515_v44, %s2206_s28 }
 0x346   :  { %v314_v12 = vpop.xlane.xlu2 %313 }
 0x347   :  { %v318_v15 = vmul.f32 %v314_v12, %v2405_v14 }
 0x349   :  { %v322_v16 = vadd.f32 1e-05, %v318_v15 }
 0x34b   :  { %1740 = vrsqrt.f32 %v322_v16  ;;  %vm359_vm2 = vweird.f32 %v322_v16 }
 0x34e   :  { %v611_v13 = vpop.permute.xlu2 %610 }
 0x34f   :  { %623 = vmatpush.bf16.msra.mxu0 %v611_v13 }
 0x351   :  { %v1741_v17 = vpop.eup %1740 }
 0x352   :  { %v354_v18 = vmul.f32 %v1741_v17, %v322_v16  ;;  %vm360_vm3 = vweird.f32 %v1741_v17 }
 0x353   :  { %vm361_vm4 = vmor %vm359_vm2, %vm360_vm3 }
 0x354   :  { %v355_v22 = vmul.f32 %v1741_v17, %v354_v18 }
 0x356   :  { %v356_v26 = vmul.f32 0.5, %v355_v22 }
 0x358   :  { %v357_v29 = vsub.f32 1.5, %v356_v26 }
 0x35a   :  { %v358_v33 = vmul.f32 %v1741_v17, %v357_v29 }
 0x35c   :  { %v362_v20 = vsel %vm361_vm4, %v1741_v17, %v358_v33 }
 0x35d   :  { %v366_v41 = vmul.f32 %v362_v20, %v298_v59 }
 0x35f   :  { %v373_v45 = vmul.f32 %v2457_v31, %v366_v41 }
 0x361   :  { %v380_v51 = vadd.f32 %v2464_v34, %v373_v45 }
 0x37d   :  { %v549_v21 = vpop.xlane.xlu0 %548 }
 0x37e   :  { %1742 = vrcp.f32 %v549_v21 }
 0x380   :  { %v311_v19 = vpop.xlane.xlu1 %310 }
 0x381   :  { %v317_v23 = vmul.f32 %v311_v19, %v2405_v14 }
 0x383   :  { %v321_v24 = vadd.f32 1e-05, %v317_v23 }
 0x384   :  { %v1743_v25 = vpop.eup %1742 }
 0x385   :  { %1744 = vrsqrt.f32 %v321_v24  ;;  %v551_v27 = vmul.f32 %v1743_v25, %v1739_v5  ;;  %vm349_vm5 = vweird.f32 %v321_v24  ;;  %v268_v5 = vld [vmem:[#allocation2 + $0x1] sm:$0x1] }
 0x386   :  { %vm634_vm8 = vcmp.gt.s32.totalorder %v268_v5, 0  ;;  %v1722_v5 = vld [vmem:[#allocation10] ss:$0 sm:$0xff] }
 0x387   :  { %v552_v28 = vpack.c.bf16 %v551_v27, %v551_v27 }
 0x389   :  { %1560 = vmatmul.msk.bf16.vlgmr.msra.gmra.mxu3 %vm517_vm14, %v552_v28 }
 0x38b   :  { %v1745_v32 = vpop.eup %1744 }
 0x38c   :  { %v344_v35 = vmul.f32 %v1745_v32, %v321_v24  ;;  %vm350_vm6 = vweird.f32 %v1745_v32 }
 0x38d   :  { %vm351_vm7 = vmor %vm349_vm5, %vm350_vm6 }
 0x38e   :  { %v345_v30 = vmul.f32 %v1745_v32, %v344_v35 }
 0x390   :  { %v346_v38 = vmul.f32 0.5, %v345_v30  ;;  %v575_v46 = vpop.permute.xlu0 %574 }
 0x392   :  { %v347_v40 = vsub.f32 1.5, %v346_v38 }
 0x394   :  { %v348_v42 = vmul.f32 %v1745_v32, %v347_v40 }
 0x396   :  { %v352_v43 = vsel %vm351_vm7, %v1745_v32, %v348_v42 }
 0x397   :  { %v365_v44 = vmul.f32 %v352_v43, %v297_v6  ;;  %v656_v6 = vsel %vm634_vm8, 1, %v2205_v47 }
 0x398   :  { %v657_v7 = vperm.slane %v656_v6, 0 }
 0x399   :  { %1561 = vmatmul.msk.bf16.vlgmr.msrb.gmra.mxu3 %vm517_vm14, %v575_v46  ;;  %v372_v48 = vmul.f32 %v2457_v31, %v365_v44 }
 0x39a   :  { %vm2534_vm9 = vcmp.eq.s32.totalorder %v657_v7, 1 }
 0x39b   :  { %v379_v49 = vadd.f32 %v2464_v34, %v372_v48 }
 0x39d   :  { %v2518_v52 = vpack.c.bf16 %v380_v51, %v379_v49  ;;  %v1662_v49 = vld [vmem:[#allocation11 + $0x8] sm:$0xff] }
 0x39f   :  { %1558 = vmatmul.msk.bf16.gmra.mxu1 %vm271_vm0, %v2518_v52 }
 0x40c   :  { %v2522_v53 = vpop.f32.mrf.mxu3 }
 0x414   :  { %v571_v55 = vpop.f32.mrf.mxu3 }
 0x41c   :  { %v509_v56 = vpop.f32.mrf.mxu1  ;;  %v593_v57 = vpop.f32.mrf.mxu3 }
 0x41d   :  { %v597_v58 = vsel %vm2485_vm1, %v593_v57, -3.4028235e+38 }
 0x41e   :  { %v598_v59 = vsel %vm517_vm14, %v597_v58, -inf }
 0x41f   :  { %599 = vmax.xlane.f32.xlu0 %v598_v59 }
 0x424   :  { %v511_v31 = vpop.f32.mrf.mxu1  ;;  %v595_v60 = vpop.f32.mrf.mxu3 }
 0x425   :  { %v636_v61 = vpack.c.bf16 %v511_v31, %v509_v56  ;;  %v1661_v56 = vld [vmem:[#allocation11] sm:$0xff] }
 0x427   :  { %v641_v34 = vsel %vm517_vm14, %v636_v61, 0 }
 0x428   :  { %650 = vmatpush.bf16.xpose.msrb.mxu2 %v641_v34  ;;  %v1659_v34 = vld [vmem:[#allocation8] sm:$0xff] }
 0x42f   :  { %1563 = vmatmul.msk.bf16.vlgmr.msrb.gmra.mxu2 %vm517_vm14, %v635_v62 }
 0x433   :  { %693 = vrot.lane.b32.xlu0 %v635_v62, %s2206_s28 }
 0x492   :  { %v600_v63 = vpop.xlane.xlu0 %599 }
 0x493   :  { %v601_v1 = vsub.f32 %v597_v58, %v600_v63 }
 0x495   :  { %v602_v50 = vmul.f32 1.442695, %v601_v1 }
 0x497   :  { %1746 = vpow2.f32 %v602_v50 }
 0x49d   :  { %v1747_v2 = vpop.eup %1746 }
 0x49e   :  { %v604_v3 = vsel %vm517_vm14, %v1747_v2, 0.0 }
 0x49f   :  { %605 = vadd.xlane.f32.xlu1 %v604_v3  ;;  %v1663_v3 = vld [vmem:[#allocation13] sm:$0xff] }
 0x4a5   :  { %v694_v16 = vpop.permute.xlu0 %693 }
 0x4b2   :  { %v652_v39 = vpop.f32.mrf.mxu2 }
 0x4b3   :  { %v659_v9 = vsel %vm2534_vm9, %v652_v39, -3.4028235e+38 }
 0x4b4   :  { %v660_v10 = vsel %vm517_vm14, %v659_v9, -inf }
 0x4b5   :  { %661 = vmax.xlane.f32.xlu0 %v660_v10 }
 0x4b8   :  { %695 = vrot.lane.b32.xlu1 %v636_v61, %s2206_s28 }
 0x4ba   :  { %v654_v11 = vpop.f32.mrf.mxu2 }
 0x512   :  { %v606_v12 = vpop.xlane.xlu1 %605 }
 0x513   :  { %1748 = vrcp.f32 %v606_v12 }
 0x519   :  { %v1749_v13 = vpop.eup %1748 }
 0x51a   :  { %v608_v15 = vmul.f32 %v1749_v13, %v1747_v2  ;;  %v1664_v2 = vld [vmem:[#allocation13 + $0x8] sm:$0xff] }
 0x51c   :  { %v609_v47 = vpack.c.bf16 %v608_v15, %v608_v15 }
 0x51e   :  { %1562 = vmatmul.msk.bf16.vlgmr.msra.gmra.mxu0 %vm517_vm14, %v609_v47 }
 0x528   :  { %v662_v17 = vpop.xlane.xlu0 %661 }
 0x529   :  { %v663_v18 = vsub.f32 %v659_v9, %v662_v17 }
 0x52a   :  { %v696_v21 = vpop.permute.xlu1 %695 }
 0x52b   :  { %v664_v22 = vmul.f32 1.442695, %v663_v18  ;;  %v701_v19 = vsel %vm517_vm14, %v696_v21, 0 }
 0x52c   :  { %710 = vmatpush.bf16.xpose.msrb.mxu0 %v701_v19 }
 0x52d   :  { %1750 = vpow2.f32 %v664_v22 }
 0x533   :  { %v1751_v23 = vpop.eup %1750  ;;  %1565 = vmatmul.msk.bf16.vlgmr.msrb.gmra.mxu0 %vm517_vm14, %v694_v16 }
 0x534   :  { %v666_v24 = vsel %vm517_vm14, %v1751_v23, 0.0  ;;  %852 = vmatpush.bf16.msra.mxu0 %v1664_v2 }
 0x535   :  { %667 = vadd.xlane.f32.xlu0 %v666_v24 }
 0x538   :  { %853 = vmatpush.bf16.msra.mxu0 %v1663_v3 }
 0x59b   :  { %v625_v25 = vpop.f32.mrf.mxu0 }
 0x5a3   :  { %v627_v26 = vpop.f32.mrf.mxu0 }
 0x5a8   :  { %v668_v44 = vpop.xlane.xlu0 %667 }
 0x5b0   :  { %v712_v27 = vpop.f32.mrf.mxu0 }
 0x5b1   :  { %v716_v28 = vsel %vm2534_vm9, %v712_v27, -3.4028235e+38 }
 0x5b2   :  { %v717_v29 = vsel %vm517_vm14, %v716_v28, -inf }
 0x5b3   :  { %718 = vmax.xlane.f32.xlu2 %v717_v29 }
 0x5b8   :  { %v714_v32 = vpop.f32.mrf.mxu0 }
 0x5cb   :  { %729 = vrot.lane.b32.xlu2 %v636_v61, %s2207_s9 }
 0x626   :  { %v719_v33 = vpop.xlane.xlu2 %718 }
 0x627   :  { %v720_v35 = vsub.f32 %v716_v28, %v719_v33 }
 0x629   :  { %v721_v30 = vmul.f32 1.442695, %v720_v35 }
 0x62b   :  { %1752 = vpow2.f32 %v721_v30 }
 0x62e   :  { %v730_v20 = vpop.permute.xlu2 %729 }
 0x62f   :  { %742 = vmatpush.bf16.msra.mxu1 %v730_v20 }
 0x631   :  { %v1753_v38 = vpop.eup %1752 }
 0x632   :  { %v723_v40 = vsel %vm517_vm14, %v1753_v38, 0.0 }
 0x633   :  { %724 = vadd.xlane.f32.xlu1 %v723_v40 }
 0x64c   :  { %673 = vrot.lane.b32.xlu1 %v636_v61, %s2204_s16  ;;  %v1660_v61 = vld [vmem:[#allocation8 + $0x8] sm:$0xff] }
 0x64d   :  { %783 = vmatpush.bf16.msra.mxu2 %v1660_v61 }
 0x651   :  { %784 = vmatpush.bf16.msra.mxu2 %v1659_v34 }
 0x6a6   :  { %v725_v41 = vpop.xlane.xlu1 %724 }
 0x6a7   :  { %1754 = vrcp.f32 %v725_v41 }
 0x6a8   :  { %1756 = vrcp.f32 %v668_v44 }
 0x6ad   :  { %v1755_v42 = vpop.eup %1754 }
 0x6ae   :  { %v727_v43 = vmul.f32 %v1755_v42, %v1753_v38  ;;  %v1757_v46 = vpop.eup %1756 }
 0x6af   :  { %v670_v48 = vmul.f32 %v1757_v46, %v1751_v23 }
 0x6b0   :  { %v728_v45 = vpack.c.bf16 %v727_v43, %v727_v43 }
 0x6b1   :  { %v671_v55 = vpack.c.bf16 %v670_v48, %v670_v48 }
 0x6b2   :  { %1566 = vmatmul.msk.bf16.vlgmr.msra.gmra.mxu1 %vm517_vm14, %v728_v45 }
 0x6be   :  { %v674_v51 = vpop.permute.xlu1 %673 }
 0x6bf   :  { %686 = vmatpush.bf16.msra.mxu3 %v674_v51 }
 0x6c2   :  { %1564 = vmatmul.msk.bf16.vlgmr.msra.gmra.mxu3 %vm517_vm14, %v671_v55 }
 0x6c3   :  { %813 = vmatpush.bf16.msrb.mxu3 %v1662_v49 }
 0x6c7   :  { %814 = vmatpush.bf16.msrb.mxu3 %v1661_v56 }
 0x6d2   :  { %1584 = vmatmul.msk.bf16.vlgmr.msrb.gmra.mxu3 %vm271_vm0, %v2468_v36 }
 0x6e2   :  { %1585 = vmatmul.msk.bf16.gmra.mxu3 %vm271_vm0, %v2518_v52 }
 0x72f   :  { %v744_v57 = vpop.f32.mrf.mxu1 }
 0x730   :  { %v1703_v58 = vpack.i.bf16 %v744_v57, %v625_v25 }
 0x732   :  { %1704 = vrot.lane.b32.xlu0 %v1703_v58, %s2195_s24 }
 0x737   :  { %v746_v59 = vpop.f32.mrf.mxu1 }
 0x745   :  { %v688_v31 = vpop.f32.mrf.mxu3 }
 0x74d   :  { %v690_v60 = vpop.f32.mrf.mxu3 }
 0x7a4   :  { %v1705_v62 = vpop.permute.xlu0 %1704 }
 0x7a5   :  { %v1707_v63 = vunpack.i.h.bf16 %v1705_v62  ;;  %v1706_v1 = vunpack.i.l.bf16 %v1705_v62 }
 0x7a7   :  { %v752_v50 = vsel %vm517_vm14, %v688_v31, %v1707_v63  ;;  %v633_v36 = vsel %vm517_vm14, %v2522_v53, %v1706_v1  ;;  %v816_v53 = vpop.f32.mrf.mxu3 }
 0x7a8   :  { %v753_v52 = vpack.c.bf16 %v752_v50, %v633_v36 }
 0x7aa   :  { %1575 = vmatmul.msk.bf16.vlgmr.msra.gmra.mxu2 %vm271_vm0, %v753_v52 }
 0x82d   :  { %v786_v6 = vpop.f32.mrf.mxu2 }
 0x82e   :  { %v787_v7 = vadd.f32 %v1722_v5, %v786_v6 }
 0x830   :  { %v1209_v8 = vadd.f32 %v787_v7, %v2386_v0  ;;  %v818_v0 = vpop.f32.mrf.mxu3 }
 0x831   :  { %v860_v47 = vpack.c.bf16 %v818_v0, %v816_v53 }
 0x832   :  { %1211 = vst.msk [vmem:[#allocation24] sm:$0xff] %vm271_vm0, %v1209_v8 }
 0x835   :  { %v788_v39 = vpop.f32.mrf.mxu2 }
 0x836   :  { %v789_v9 = vadd.f32 %v1722_v5, %v788_v39 }
 0x838   :  { %v826_v10 = vpack.c.bf16 %v789_v9, %v787_v7  ;;  %v1210_v11 = vadd.f32 %v789_v9, %v2397_v4  ;;  %v821_v27 = vpop.f32.mrf.mxu3 }
 0x83a   :  { %1212 = vst.msk [vmem:[#allocation24 + $0x8] sm:$0xff] %vm271_vm0, %v1210_v11  ;;  %1594 = vmatmul.msk.bf16.vlgmr.msra.gmra.mxu0 %vm271_vm0, %v826_v10 }
 0x840   :  { %v823_v28 = vpop.f32.mrf.mxu3 }
 0x841   :  { %v1010_v29 = vpack.c.bf16 %v823_v28, %v821_v27 }
 0x8b7   :  { %v855_v12 = vpop.f32.mrf.mxu0 }
 0x8b8   :  { %v861_v13 = vpack.c.bf16 %v855_v12, %v855_v12 }
 0x8ba   :  { %933 = vrot.lane.b32.xlu0 %v861_v13, %s2206_s28  ;;  %v866_v15 = vsel %vm517_vm14, %v861_v13, 0 }
 0x8bb   :  { %875 = vmatpush.bf16.xpose.msrb.mxu1 %v866_v15 }
 0x8bf   :  { %v857_v16 = vpop.f32.mrf.mxu0 }
 0x8c0   :  { %v2572_v4 = vpack.c.bf16 %v857_v16, %v857_v16 }
 0x8c2   :  { %931 = vrot.lane.b32.xlu0 %v860_v47, %s2206_s28  ;;  %1595 = vmatmul.msk.bf16.vlgmr.msrb.gmra.mxu1 %vm517_vm14, %v860_v47  ;;  %v1016_v62 = vsel %vm517_vm14, %v2572_v4, 0 }
 0x8ca   :  { %1081 = vrot.lane.b32.xlu0 %v2572_v4, %s2206_s28 }
 0x92c   :  { %v934_v17 = vpop.permute.xlu0 %933 }
 0x92d   :  { %v939_v18 = vsel %vm517_vm14, %v934_v17, 0 }
 0x92e   :  { %948 = vmatpush.bf16.xpose.msrb.mxu0 %v939_v18 }
 0x934   :  { %v932_v21 = vpop.permute.xlu0 %931 }
 0x935   :  { %1597 = vmatmul.msk.bf16.vlgmr.msrb.gmra.mxu0 %vm517_vm14, %v932_v21 }
 0x93c   :  { %v1082_v22 = vpop.permute.xlu0 %1081 }
 0x93d   :  { %v1087_v19 = vsel %vm517_vm14, %v1082_v22, 0 }
 0x93e   :  { %1096 = vmatpush.bf16.xpose.msra.mxu0 %v1087_v19 }
 0x93f   :  { %v877_v23 = vpop.f32.mrf.mxu1 }
 0x940   :  { %v883_v24 = vsel %vm882_vm10, %v877_v23, -inf }
 0x941   :  { %884 = vmax.xlane.f32.xlu2 %v883_v24 }
 0x947   :  { %v879_v25 = vpop.f32.mrf.mxu1 }
 0x948   :  { %v886_v26 = vsel %vm882_vm10, %v879_v25, -inf }
 0x949   :  { %887 = vmax.xlane.f32.xlu1 %v886_v26 }
 0x962   :  { %1079 = vrot.lane.b32.xlu1 %v1010_v29, %s2206_s28  ;;  %s2210_s28 = smov 8  }
 0x9b2   :  { %v950_v32 = vpop.f32.mrf.mxu0 }
 0x9b3   :  { %v955_v48 = vsel %vm882_vm10, %v950_v32, -inf }
 0x9b4   :  { %v885_v33 = vpop.xlane.xlu2 %884 }
 0x9b5   :  { %v889_v35 = vsub.f32 %v877_v23, %v885_v33 }
 0x9b7   :  { %v891_v30 = vmul.f32 1.442695, %v889_v35 }
 0x9b9   :  { %1758 = vpow2.f32 %v891_v30 }
 0x9ba   :  { %v2582_v20 = vpop.f32.mrf.mxu0 }
 0x9bb   :  { %v958_v38 = vsel %vm882_vm10, %v2582_v20, -inf }
 0x9bc   :  { %v888_v40 = vpop.xlane.xlu1 %887  ;;  %959 = vmax.xlane.f32.xlu1 %v958_v38 }
 0x9bd   :  { %v890_v41 = vsub.f32 %v879_v25, %v888_v40 }
 0x9bf   :  { %v1759_v42 = vpop.eup %1758  ;;  %v893_v43 = vmul.f32 1.442695, %v890_v41 }
 0x9c0   :  { %v895_v44 = vsel %vm882_vm10, %v1759_v42, 0.0 }
 0x9c1   :  { %1760 = vpow2.f32 %v893_v43  ;;  %896 = vadd.xlane.f32.xlu0 %v895_v44 }
 0x9c7   :  { %v1761_v45 = vpop.eup %1760 }
 0x9c8   :  { %v898_v46 = vsel %vm882_vm10, %v1761_v45, 0.0 }
 0x9c9   :  { %899 = vadd.xlane.f32.xlu2 %v898_v46  ;;  %956 = vmax.xlane.f32.xlu0 %v955_v48 }
 0x9d4   :  { %v1080_v49 = vpop.permute.xlu1 %1079 }
 0x9d5   :  { %1601 = vmatmul.msk.bf16.vlgmr.msra.gmra.mxu0 %vm517_vm14, %v1080_v49  ;;  %978 = vrot.lane.b32.xlu1 %v861_v13, %s2207_s9 }
 0x9dd   :  { %1056 = vrot.lane.b32.xlu1 %v2572_v4, %s2204_s16 }
 0x9e1   :  { %907 = vrot.lane.b32.xlu2 %v861_v13, %s2204_s16 }
 0xa2f   :  { %v960_v56 = vpop.xlane.xlu1 %959 }
 0xa30   :  { %v962_v47 = vsub.f32 %v2582_v20, %v960_v56 }
 0xa32   :  { %v965_v18 = vmul.f32 1.442695, %v962_v47 }
 0xa34   :  { %v897_v51 = vpop.xlane.xlu0 %896 }
 0xa35   :  { %1762 = vrcp.f32 %v897_v51 }
 0xa3b   :  { %v1763_v57 = vpop.eup %1762 }
 0xa3c   :  { %v900_v55 = vpop.xlane.xlu2 %899  ;;  %v903_v59 = vmul.f32 %v1763_v57, %v1759_v42  ;;  %v957_v50 = vpop.xlane.xlu0 %956 }
 0xa3d   :  { %1764 = vrcp.f32 %v900_v55  ;;  %v961_v2 = vsub.f32 %v950_v32, %v957_v50 }
 0xa3f   :  { %v963_v6 = vmul.f32 1.442695, %v961_v2 }
 0xa41   :  { %1766 = vpow2.f32 %v963_v6 }
 0xa43   :  { %v1765_v58 = vpop.eup %1764 }
 0xa44   :  { %v904_v31 = vmul.f32 %v1765_v58, %v1761_v45  ;;  %v908_v60 = vpop.permute.xlu2 %907 }
 0xa45   :  { %v914_v61 = vsel %vm912_vm11, %v908_v60, 0 }
 0xa46   :  { %v905_v34 = vpack.c.bf16 %v904_v31, %v903_v59  ;;  %923 = vmatpush.bf16.msrb.mxu2 %v914_v61 }
 0xa47   :  { %v979_v63 = vpop.permute.xlu1 %978  ;;  %v1767_v39 = vpop.eup %1766 }
 0xa48   :  { %v984_v1 = vsel %vm912_vm11, %v979_v63, 0  ;;  %v967_v9 = vsel %vm882_vm10, %v1767_v39, 0.0 }
 0xa49   :  { %1596 = vmatmul.msk.bf16.vlgmr.msrb.gmra.mxu2 %vm882_vm10, %v905_v34  ;;  %993 = vmatpush.bf16.msra.mxu1 %v984_v1 }
 0xa4a   :  { %1025 = vmatpush.bf16.xpose.msra.mxu2 %v1016_v62 }
 0xa4f   :  { %v1057_v36 = vpop.permute.xlu1 %1056 }
 0xa50   :  { %v1062_v52 = vsel %vm912_vm11, %v1057_v36, 0 }
 0xa51   :  { %1071 = vmatpush.bf16.msra.mxu3 %v1062_v52 }
 0xa52   :  { %v1098_v3 = vpop.f32.mrf.mxu0 }
 0xa53   :  { %v1103_v5 = vsel %vm882_vm10, %v1098_v3, -inf }
 0xa54   :  { %1104 = vmax.xlane.f32.xlu2 %v1103_v5 }
 0xa59   :  { %1599 = vmatmul.msk.bf16.vlgmr.msra.gmra.mxu2 %vm517_vm14, %v1010_v29 }
 0xa5a   :  { %v1100_v7 = vpop.f32.mrf.mxu0 }
 0xa5b   :  { %v1106_v8 = vsel %vm882_vm10, %v1100_v7, -inf }
 0xa5c   :  { %1107 = vmax.xlane.f32.xlu0 %v1106_v8 }
 0xa64   :  { %968 = vadd.xlane.f32.xlu0 %v967_v9  ;;  %v1665_v9 = vld [vmem:[#allocation14] sm:$0xff] }
 0xac7   :  { %v1105_v10 = vpop.xlane.xlu2 %1104 }
 0xac8   :  { %v1109_v11 = vsub.f32 %v1098_v3, %v1105_v10 }
 0xaca   :  { %v1111_v53 = vmul.f32 1.442695, %v1109_v11 }
 0xacc   :  { %1768 = vpow2.f32 %v1111_v53  ;;  %v2604_v12 = vpop.f32.mrf.mxu2 }
 0xacd   :  { %1770 = vpow2.f32 %v965_v18 }
 0xacf   :  { %v1108_v21 = vpop.xlane.xlu0 %1107 }
 0xad0   :  { %v1110_v22 = vsub.f32 %v1100_v7, %v1108_v21 }
 0xad2   :  { %v1769_v13 = vpop.eup %1768  ;;  %v1113_v24 = vmul.f32 1.442695, %v1110_v22 }
 0xad3   :  { %v1115_v15 = vsel %vm882_vm10, %v1769_v13, 0.0  ;;  %v1771_v25 = vpop.eup %1770 }
 0xad4   :  { %v2607_v0 = vpop.f32.mrf.mxu2  ;;  %1116 = vadd.xlane.f32.xlu2 %v1115_v15  ;;  %1772 = vpow2.f32 %v1113_v24  ;;  %v970_v26 = vsel %vm882_vm10, %v1771_v25, 0.0 }
 0xad7   :  { %v969_v32 = vpop.xlane.xlu0 %968 }
 0xada   :  { %v1773_v27 = vpop.eup %1772 }
 0xadb   :  { %v1118_v28 = vsel %vm882_vm10, %v1773_v27, 0.0 }
 0xadc   :  { %v1027_v16 = vpop.f32.mrf.mxu2 }
 0xadd   :  { %v1032_v17 = vsel %vm882_vm10, %v1027_v16, -inf }
 0xade   :  { %1033 = vmax.xlane.f32.xlu0 %v1032_v17 }
 0xae4   :  { %v1029_v19 = vpop.f32.mrf.mxu2 }
 0xae5   :  { %v1035_v23 = vsel %vm882_vm10, %v1029_v19, -inf }
 0xae6   :  { %1036 = vmax.xlane.f32.xlu0 %v1035_v23 }
 0xaec   :  { %1126 = vrot.lane.b32.xlu2 %v2572_v4, %s2207_s9 }
 0xaee   :  { %971 = vadd.xlane.f32.xlu0 %v970_v26 }
 0xaf6   :  { %1119 = vadd.xlane.f32.xlu0 %v1118_v28 }
 0xb47   :  { %v1117_v29 = vpop.xlane.xlu2 %1116 }
 0xb4f   :  { %v1127_v33 = vpop.permute.xlu2 %1126 }
 0xb50   :  { %v1132_v35 = vsel %vm912_vm11, %v1127_v33, 0  ;;  %v1807_v33 = vld [vmem:[%s2766_s15 + $0x8] sm:$0xff] }
 0xb51   :  { %v1034_v30 = vpop.xlane.xlu0 %1033  ;;  %1141 = vmatpush.bf16.msrb.mxu1 %v1132_v35 }
 0xb52   :  { %v1038_v20 = vsub.f32 %v1027_v16, %v1034_v30 }
 0xb54   :  { %v1040_v38 = vmul.f32 1.442695, %v1038_v20 }
 0xb56   :  { %1774 = vpow2.f32 %v1040_v38 }
 0xb59   :  { %v1037_v40 = vpop.xlane.xlu0 %1036 }
 0xb5a   :  { %v1039_v41 = vsub.f32 %v1029_v19, %v1037_v40 }
 0xb5c   :  { %v1775_v4 = vpop.eup %1774  ;;  %v1042_v42 = vmul.f32 1.442695, %v1039_v41 }
 0xb5d   :  { %v1044_v43 = vsel %vm882_vm10, %v1775_v4, 0.0 }
 0xb5e   :  { %1776 = vpow2.f32 %v1042_v42  ;;  %1045 = vadd.xlane.f32.xlu0 %v1044_v43 }
 0xb5f   :  { %1778 = vrcp.f32 %v969_v32 }
 0xb61   :  { %v972_v44 = vpop.xlane.xlu0 %971 }
 0xb62   :  { %1780 = vrcp.f32 %v972_v44 }
 0xb64   :  { %v1777_v45 = vpop.eup %1776 }
 0xb65   :  { %v1047_v46 = vsel %vm882_vm10, %v1777_v45, 0.0  ;;  %v1779_v48 = vpop.eup %1778 }
 0xb66   :  { %1048 = vadd.xlane.f32.xlu0 %v1047_v46  ;;  %v975_v51 = vmul.f32 %v1779_v48, %v1767_v39  ;;  %v1666_v39 = vld [vmem:[#allocation14 + $0x8] sm:$0xff] }
 0xb67   :  { %1192 = vmatpush.bf16.msrb.mxu2 %v1666_v39 }
 0xb68   :  { %v1781_v49 = vpop.eup %1780 }
 0xb69   :  { %v976_v55 = vmul.f32 %v1781_v49, %v1771_v25  ;;  %v1120_v57 = vpop.xlane.xlu0 %1119  ;;  %v1723_v25 = vld [vmem:[#allocation16] ss:$0 sm:$0xff] }
 0xb6a   :  { %1782 = vrcp.f32 %v1120_v57 }
 0xb6b   :  { %v977_v56 = vpack.c.bf16 %v976_v55, %v975_v51  ;;  %1784 = vrcp.f32 %v1117_v29  ;;  %1193 = vmatpush.bf16.msrb.mxu2 %v1665_v9 }
 0xb6d   :  { %1598 = vmatmul.msk.bf16.vlgmr.msra.gmra.mxu1 %vm882_vm10, %v977_v56 }
 0xb70   :  { %v1783_v58 = vpop.eup %1782 }
 0xb71   :  { %v1785_v59 = vpop.eup %1784  ;;  %v1124_v31 = vmul.f32 %v1783_v58, %v1773_v27 }
 0xb72   :  { %v1123_v60 = vmul.f32 %v1785_v59, %v1769_v13 }
 0xb74   :  { %v1125_v61 = vpack.c.bf16 %v1124_v31, %v1123_v60 }
 0xb7d   :  { %1602 = vmatmul.msk.bf16.vlgmr.msrb.gmra.mxu1 %vm882_vm10, %v1125_v61 }
 0xbd1   :  { %v1046_v34 = vpop.xlane.xlu0 %1045 }
 0xbd2   :  { %1786 = vrcp.f32 %v1046_v34 }
 0xbd8   :  { %v1787_v63 = vpop.eup %1786 }
 0xbd9   :  { %v1049_v62 = vpop.xlane.xlu0 %1048  ;;  %v1052_v50 = vmul.f32 %v1787_v63, %v1775_v4 }
 0xbda   :  { %1788 = vrcp.f32 %v1049_v62 }
 0xbe0   :  { %v1789_v1 = vpop.eup %1788 }
 0xbe1   :  { %v1053_v36 = vmul.f32 %v1789_v1, %v1777_v45 }
 0xbe3   :  { %v1054_v52 = vpack.c.bf16 %v1053_v36, %v1052_v50  ;;  %v1668_v36 = vld [vmem:[#allocation20 + $0x8] sm:$0xff] }
 0xbe4   :  { %1351 = vmatpush.bf16.msrb.mxu3 %v1668_v36  ;;  %v1676_v36 = vld [vmem:[%s2749_s19 + $0x38] sm:$0xff] }
 0xbe5   :  { %1600 = vmatmul.msk.bf16.vlgmr.msra.gmra.mxu3 %vm882_vm10, %v1054_v52  ;;  %1470 = vmatpush.bf16.msrb.mxu0 %v1676_v36 }
 0xbea   :  { %v995_v2 = vpop.f32.mrf.mxu1 }
 0xbf2   :  { %v997_v3 = vpop.f32.mrf.mxu1 }
 0xbf3   :  { %v1708_v5 = vpack.i.bf16 %v997_v3, %v995_v2 }
 0xbf5   :  { %1709 = vrot.lane.b32.xlu0 %v1708_v5, %s2195_s24  ;;  %v1667_v5 = vld [vmem:[#allocation20] sm:$0xff] }
 0xbf6   :  { %1352 = vmatpush.bf16.msrb.mxu3 %v1667_v5  ;;  %v1670_v5 = vld [vmem:[%s2749_s19 + $0x8] sm:$0xff] }
 0xbfa   :  { %v1143_v6 = vpop.f32.mrf.mxu1 }
 0xc02   :  { %v1145_v7 = vpop.f32.mrf.mxu1 }
 0xc03   :  { %v1713_v8 = vpack.i.bf16 %v1145_v7, %v1143_v6 }
 0xc05   :  { %1714 = vrot.lane.b32.xlu2 %v1713_v8, %s2195_s24 }
 0xc5f   :  { %v1715_v17 = vpop.permute.xlu2 %1714 }
 0xc60   :  { %v1717_v21 = vunpack.i.h.bf16 %v1715_v17  ;;  %v1716_v22 = vunpack.i.l.bf16 %v1715_v17 }
 0xc67   :  { %v1710_v10 = vpop.permute.xlu0 %1709 }
 0xc68   :  { %v1712_v11 = vunpack.i.h.bf16 %v1710_v10  ;;  %v1711_v53 = vunpack.i.l.bf16 %v1710_v10  ;;  %v1073_v16 = vpop.f32.mrf.mxu3 }
 0xc69   :  { %v1156_v23 = vsel %vm517_vm14, %v1073_v16, %v1716_v22 }
 0xc6a   :  { %v1009_v13 = vsel %vm517_vm14, %v2607_v0, %v1712_v11  ;;  %v1008_v15 = vsel %vm517_vm14, %v2604_v12, %v1711_v53  ;;  %v1806_v12 = vld [vmem:[%s2766_s15] sm:$0xff] }
 0xc6b   :  { %v1158_v47 = vpack.c.bf16 %v1009_v13, %v1008_v15 }
 0xc6d   :  { %1611 = vmatmul.msk.bf16.vlgmr.msrb.gmra.mxu2 %vm271_vm0, %v1158_v47 }
 0xc70   :  { %v1075_v18 = vpop.f32.mrf.mxu3 }
 0xc71   :  { %v1157_v19 = vsel %vm517_vm14, %v1075_v18, %v1717_v21 }
 0xc72   :  { %v1159_v24 = vpack.c.bf16 %v1157_v19, %v1156_v23 }
 0xc7d   :  { %1612 = vmatmul.msk.bf16.gmra.mxu2 %vm271_vm0, %v1159_v24 }
 0xcf0   :  { %v1195_v0 = vpop.f32.mrf.mxu2 }
 0xcf1   :  { %v1196_v26 = vadd.f32 %v1723_v25, %v1195_v0 }
 0xcf3   :  { %v2635_v27 = vadd.f32 %v1806_v12, %v1196_v26  ;;  %v1724_v26 = vld [vmem:[#allocation17] ss:$0 sm:$0xff] }
 0xcf5   :  { %v1215_v28 = vsel %vm271_vm0, %v2635_v27, 0.0 }
 0xcf6   :  { %1216 = vadd.xlane.f32.xlu1 %v1215_v28 }
 0xcf8   :  { %v1197_v29 = vpop.f32.mrf.mxu2 }
 0xcf9   :  { %v1198_v32 = vadd.f32 %v1723_v25, %v1197_v29 }
 0xcfb   :  { %v2642_v35 = vadd.f32 %v1807_v33, %v1198_v32 }
 0xcfd   :  { %v1218_v30 = vsel %vm271_vm0, %v2642_v35, 0.0 }
 0xcfe   :  { %1219 = vadd.xlane.f32.xlu2 %v1218_v30 }
 0xd00   :  { %v1200_v20 = vpop.f32.mrf.mxu2 }
 0xd01   :  { %v1201_v38 = vadd.f32 %v1723_v25, %v1200_v20  ;;  %v1725_v20 = vld [vmem:[#allocation19] ss:$0 sm:$0xff] }
 0xd03   :  { %v2647_v40 = vadd.f32 %v1201_v38, %v2495_v54 }
 0xd05   :  { %v1221_v41 = vsel %vm271_vm0, %v2647_v40, 0.0 }
 0xd06   :  { %1222 = vadd.xlane.f32.xlu0 %v1221_v41 }
 0xd08   :  { %v1202_v4 = vpop.f32.mrf.mxu2 }
 0xd09   :  { %v1203_v42 = vadd.f32 %v1723_v25, %v1202_v4 }
 0xd0b   :  { %v2652_v43 = vadd.f32 %v1203_v42, %v2475_v37 }
 0xd0d   :  { %v1224_v44 = vsel %vm271_vm0, %v2652_v43, 0.0 }
 0xd0e   :  { %1225 = vadd.xlane.f32.xlu1 %v1224_v44 }
 0xd69   :  { %v1217_v45 = vpop.xlane.xlu1 %1216 }
 0xd6a   :  { %v1227_v46 = vmul.f32 %v1217_v45, %v2405_v14 }
 0xd6c   :  { %v1231_v48 = vsub.f32 %v2635_v27, %v1227_v46 }
 0xd6e   :  { %v1235_v54 = vmul.f32 %v1231_v48, %v1231_v48 }
 0xd70   :  { %v1239_v49 = vsel %vm271_vm0, %v1235_v54, 0.0 }
 0xd71   :  { %v1220_v51 = vpop.xlane.xlu2 %1219  ;;  %1240 = vadd.xlane.f32.xlu2 %v1239_v49 }
 0xd72   :  { %v1228_v55 = vmul.f32 %v1220_v51, %v2405_v14 }
 0xd74   :  { %v2661_v56 = vsub.f32 %v2642_v35, %v1228_v55 }
 0xd76   :  { %v1236_v37 = vmul.f32 %v2661_v56, %v2661_v56 }
 0xd78   :  { %v1242_v57 = vsel %vm271_vm0, %v1236_v37, 0.0 }
 0xd79   :  { %1243 = vadd.xlane.f32.xlu1 %v1242_v57  ;;  %v1223_v58 = vpop.xlane.xlu0 %1222 }
 0xd7a   :  { %v1229_v59 = vmul.f32 %v1223_v58, %v2405_v14 }
 0xd7c   :  { %v2668_v31 = vsub.f32 %v2647_v40, %v1229_v59 }
 0xd7e   :  { %v1237_v60 = vmul.f32 %v2668_v31, %v2668_v31 }
 0xd80   :  { %v1245_v61 = vsel %vm271_vm0, %v1237_v60, 0.0 }
 0xd81   :  { %1246 = vadd.xlane.f32.xlu2 %v1245_v61  ;;  %v1226_v34 = vpop.xlane.xlu1 %1225 }
 0xd82   :  { %v1230_v62 = vmul.f32 %v1226_v34, %v2405_v14 }
 0xd84   :  { %v2675_v63 = vsub.f32 %v2652_v43, %v1230_v62 }
 0xd86   :  { %v1238_v1 = vmul.f32 %v2675_v63, %v2675_v63 }
 0xd88   :  { %v1248_v50 = vsel %vm271_vm0, %v1238_v1, 0.0 }
 0xd89   :  { %1249 = vadd.xlane.f32.xlu1 %v1248_v50 }
 0xde4   :  { %v1241_v52 = vpop.xlane.xlu2 %1240 }
 0xde5   :  { %v1251_v2 = vmul.f32 %v1241_v52, %v2405_v14  ;;  %v1673_v52 = vld [vmem:[%s2749_s19 + $0x20] sm:$0xff] }
 0xde7   :  { %v1255_v3 = vadd.f32 1e-05, %v1251_v2  ;;  %v1672_v2 = vld [vmem:[%s2749_s19 + $0x18] sm:$0xff] }
 0xde9   :  { %1790 = vrsqrt.f32 %v1255_v3  ;;  %vm1265_vm13 = vweird.f32 %v1255_v3 }
 0xdec   :  { %v1244_v6 = vpop.xlane.xlu1 %1243 }
 0xded   :  { %v1252_v7 = vmul.f32 %v1244_v6, %v2405_v14  ;;  %v1726_v6 = vld [vmem:[#allocation22] ss:$0 sm:$0xff] }
 0xdef   :  { %v1791_v8 = vpop.eup %1790  ;;  %v1256_v39 = vadd.f32 1e-05, %v1252_v7 }
 0xdf0   :  { %v1260_v9 = vmul.f32 %v1791_v8, %v1255_v3  ;;  %vm1266_vm12 = vweird.f32 %v1791_v8  ;;  %v1671_v3 = vld [vmem:[%s2749_s19 + $0x10] sm:$0xff] }
 0xdf1   :  { %1792 = vrsqrt.f32 %v1256_v39  ;;  %vm1267_vm14 = vmor %vm1265_vm13, %vm1266_vm12  ;;  %vm1275_vm1 = vweird.f32 %v1256_v39 }
 0xdf2   :  { %v1261_v10 = vmul.f32 %v1791_v8, %v1260_v9 }
 0xdf4   :  { %v1262_v11 = vmul.f32 0.5, %v1261_v10  ;;  %v1247_v53 = vpop.xlane.xlu2 %1246 }
 0xdf5   :  { %v1253_v13 = vmul.f32 %v1247_v53, %v2405_v14 }
 0xdf6   :  { %v1263_v15 = vsub.f32 1.5, %v1262_v11 }
 0xdf7   :  { %v1793_v47 = vpop.eup %1792  ;;  %v1257_v16 = vadd.f32 1e-05, %v1253_v13 }
 0xdf8   :  { %v1264_v17 = vmul.f32 %v1791_v8, %v1263_v15  ;;  %v1270_v18 = vmul.f32 %v1793_v47, %v1256_v39  ;;  %vm1276_vm15 = vweird.f32 %v1793_v47 }
 0xdf9   :  { %1794 = vrsqrt.f32 %v1257_v16  ;;  %vm1277_vm2 = vmor %vm1275_vm1, %vm1276_vm15  ;;  %vm1285_vm4 = vweird.f32 %v1257_v16 }
 0xdfa   :  { %v1271_v21 = vmul.f32 %v1793_v47, %v1270_v18  ;;  %v1268_v22 = vsel %vm1267_vm14, %v1791_v8, %v1264_v17  ;;  %v1669_v8 = vld [vmem:[%s2749_s19] sm:$0xff] }
 0xdfb   :  { %v1299_v12 = vmul.f32 %v1268_v22, %v1231_v48 }
 0xdfc   :  { %v1272_v19 = vmul.f32 0.5, %v1271_v21  ;;  %v1250_v23 = vpop.xlane.xlu1 %1249 }
 0xdfd   :  { %v1254_v24 = vmul.f32 %v1250_v23, %v2405_v14  ;;  %v1306_v38 = vmul.f32 %v1724_v26, %v1299_v12 }
 0xdfe   :  { %v1273_v25 = vsub.f32 1.5, %v1272_v19 }
 0xdff   :  { %v1795_v0 = vpop.eup %1794  ;;  %v1258_v28 = vadd.f32 1e-05, %v1254_v24  ;;  %v1313_v45 = vadd.f32 %v1725_v20, %v1306_v38 }
 0xe00   :  { %v1274_v29 = vmul.f32 %v1793_v47, %v1273_v25  ;;  %v1280_v32 = vmul.f32 %v1795_v0, %v1257_v16  ;;  %vm1286_vm3 = vweird.f32 %v1795_v0 }
 0xe01   :  { %1796 = vrsqrt.f32 %v1258_v28  ;;  %vm1287_vm5 = vmor %vm1285_vm4, %vm1286_vm3  ;;  %vm1295_vm7 = vweird.f32 %v1258_v28 }
 0xe02   :  { %v1278_v33 = vsel %vm1277_vm2, %v1793_v47, %v1274_v29  ;;  %v1281_v30 = vmul.f32 %v1795_v0, %v1280_v32 }
 0xe03   :  { %v1300_v41 = vmul.f32 %v1278_v33, %v2661_v56 }
 0xe04   :  { %v1282_v4 = vmul.f32 0.5, %v1281_v30 }
 0xe05   :  { %v1307_v42 = vmul.f32 %v1724_v26, %v1300_v41 }
 0xe06   :  { %v1283_v14 = vsub.f32 1.5, %v1282_v4 }
 0xe07   :  { %v1797_v44 = vpop.eup %1796  ;;  %v1314_v46 = vadd.f32 %v1725_v20, %v1307_v42 }
 0xe08   :  { %v1284_v54 = vmul.f32 %v1795_v0, %v1283_v14  ;;  %v1290_v48 = vmul.f32 %v1797_v44, %v1258_v28  ;;  %vm1296_vm6 = vweird.f32 %v1797_v44 }
 0xe09   :  { %v1317_v49 = vpack.c.bf16 %v1314_v46, %v1313_v45  ;;  %vm1297_vm8 = vmor %vm1295_vm7, %vm1296_vm6 }
 0xe0a   :  { %v1291_v51 = vmul.f32 %v1797_v44, %v1290_v48  ;;  %v1288_v55 = vsel %vm1287_vm5, %v1795_v0, %v1284_v54 }
 0xe0b   :  { %1621 = vmatmul.msk.bf16.vlgmr.msrb.gmra.mxu3 %vm271_vm0, %v1317_v49  ;;  %v1301_v56 = vmul.f32 %v1288_v55, %v2668_v31  ;;  %v1675_v31 = vld [vmem:[%s2749_s19 + $0x30] sm:$0xff] }
 0xe0c   :  { %v1292_v37 = vmul.f32 0.5, %v1291_v51  ;;  %1471 = vmatpush.bf16.msrb.mxu0 %v1675_v31 }
 0xe0d   :  { %v1308_v61 = vmul.f32 %v1724_v26, %v1301_v56 }
 0xe0e   :  { %v1293_v57 = vsub.f32 1.5, %v1292_v37 }
 0xe0f   :  { %v1315_v62 = vadd.f32 %v1725_v20, %v1308_v61  ;;  %v1727_v61 = vld [vmem:[%s2750_s20] ss:$0 sm:$0xff]  ;;  %s2211_s20 = smov [#allocation23]  }
 0xe10   :  { %v1294_v58 = vmul.f32 %v1797_v44, %v1293_v57  ;;  %s1501_s22 = sshll.u32 %s2211_s20, 4  ;;  %s1502_s22 = int_to_ptr.vmem [resolvable:$true] %s1501_s22 }
 0xe12   :  { %v1298_v59 = vsel %vm1297_vm8, %v1797_v44, %v1294_v58 }
 0xe13   :  { %v1302_v60 = vmul.f32 %v1298_v59, %v2675_v63  ;;  %v1674_v63 = vld [vmem:[%s2749_s19 + $0x28] sm:$0xff]  ;;  %s2208_s19 = smov [#allocation24]  }
 0xe14   :  { %1472 = vmatpush.bf16.msrb.mxu0 %v1674_v63  ;;  %s1514_s13 = sshll.u32 %s2208_s19, 4  ;;  %s1515_s13 = int_to_ptr.vmem [resolvable:$true] %s1514_s13 }
 0xe15   :  { %v1309_v34 = vmul.f32 %v1724_v26, %v1302_v60  ;;  %1522 = dma.vmem_to_hbm [thread:$0]  %s1515_s13, 256, %s1517_s18, [#allocation25], %s2209_s26, %s2209_s26, %s2210_s28  }
 0xe17   :  { %v1316_v1 = vadd.f32 %v1725_v20, %v1309_v34 }
 0xe18   :  { %1473 = vmatpush.bf16.msrb.mxu0 %v1673_v52 }
 0xe19   :  { %v1318_v50 = vpack.c.bf16 %v1316_v1, %v1315_v62 }
 0xe1b   :  { %1622 = vmatmul.msk.bf16.gmra.mxu3 %vm271_vm0, %v1318_v50 }
 0xe1c   :  { %1474 = vmatpush.bf16.msrb.mxu0 %v1672_v2 }
 0xe20   :  { %1475 = vmatpush.bf16.msrb.mxu0 %v1671_v3 }
 0xe24   :  { %1476 = vmatpush.bf16.msrb.mxu0 %v1670_v5 }
 0xe28   :  { %1477 = vmatpush.bf16.msrb.mxu0 %v1669_v8 }
 0xe8e   :  { %v1354_v7 = vpop.f32.mrf.mxu3 }
 0xe8f   :  { %v1355_v39 = vadd.f32 %v1726_v6, %v1354_v7 }
 0xe91   :  { %v1364_v9 = vmul.f32 %v1355_v39, %v1355_v39 }
 0xe93   :  { %v1368_v10 = vmul.f32 %v1364_v9, %v1355_v39 }
 0xe95   :  { %v1372_v11 = vmul.f32 0.044715, %v1368_v10 }
 0xe96   :  { %v1356_v53 = vpop.f32.mrf.mxu3 }
 0xe97   :  { %v1376_v13 = vadd.f32 %v1372_v11, %v1355_v39  ;;  %v1357_v15 = vadd.f32 %v1726_v6, %v1356_v53 }
 0xe99   :  { %v1380_v47 = vmul.f32 0.7978846, %v1376_v13  ;;  %v1365_v16 = vmul.f32 %v1357_v15, %v1357_v15 }
 0xe9b   :  { %v1369_v17 = vmul.f32 %v1365_v16, %v1357_v15  ;;  %1798 = vtanh.f32 %v1380_v47 }
 0xe9d   :  { %v1373_v18 = vmul.f32 0.044715, %v1369_v17 }
 0xe9e   :  { %v1359_v21 = vpop.f32.mrf.mxu3 }
 0xe9f   :  { %v1377_v22 = vadd.f32 %v1373_v18, %v1357_v15  ;;  %v1360_v19 = vadd.f32 %v1726_v6, %v1359_v21 }
 0xea1   :  { %v1381_v23 = vmul.f32 0.7978846, %v1377_v22  ;;  %v1366_v24 = vmul.f32 %v1360_v19, %v1360_v19  ;;  %v1799_v25 = vpop.eup %1798 }
 0xea2   :  { %v1388_v12 = vadd.f32 1.0, %v1799_v25 }
 0xea3   :  { %1800 = vtanh.f32 %v1381_v23  ;;  %v1370_v0 = vmul.f32 %v1366_v24, %v1360_v19 }
 0xea4   :  { %v1392_v38 = vmul.f32 0.5, %v1388_v12 }
 0xea5   :  { %v1374_v26 = vmul.f32 0.044715, %v1370_v0 }
 0xea6   :  { %v1361_v28 = vpop.f32.mrf.mxu3  ;;  %v1396_v44 = vmul.f32 %v1392_v38, %v1355_v39 }
 0xea7   :  { %v1378_v29 = vadd.f32 %v1374_v26, %v1360_v19  ;;  %v1362_v32 = vadd.f32 %v1726_v6, %v1361_v28 }
 0xea9   :  { %v1801_v33 = vpop.eup %1800  ;;  %v1367_v30 = vmul.f32 %v1362_v32, %v1362_v32  ;;  %v1382_v20 = vmul.f32 0.7978846, %v1378_v29 }
 0xeaa   :  { %v1389_v41 = vadd.f32 1.0, %v1801_v33 }
 0xeab   :  { %v1371_v4 = vmul.f32 %v1367_v30, %v1362_v32  ;;  %1802 = vtanh.f32 %v1382_v20 }
 0xeac   :  { %v1393_v42 = vmul.f32 0.5, %v1389_v41 }
 0xead   :  { %v1375_v14 = vmul.f32 0.044715, %v1371_v4 }
 0xeae   :  { %v1397_v45 = vmul.f32 %v1393_v42, %v1357_v15 }
 0xeaf   :  { %v1379_v46 = vadd.f32 %v1375_v14, %v1362_v32 }
 0xeb0   :  { %v1400_v54 = vpack.c.bf16 %v1397_v45, %v1396_v44 }
 0xeb1   :  { %v1383_v48 = vmul.f32 0.7978846, %v1379_v46  ;;  %v1803_v49 = vpop.eup %1802 }
 0xeb2   :  { %1478 = vmatmul.bf16.vlgmr.msrb.gmra.mxu0 %v1400_v54  ;;  %v1390_v51 = vadd.f32 1.0, %v1803_v49 }
 0xeb3   :  { %1804 = vtanh.f32 %v1383_v48 }
 0xeb4   :  { %v1394_v57 = vmul.f32 0.5, %v1390_v51 }
 0xeb6   :  { %v1398_v58 = vmul.f32 %v1394_v57, %v1360_v19 }
 0xeb9   :  { %v1805_v55 = vpop.eup %1804 }
 0xeba   :  { %v1391_v37 = vadd.f32 1.0, %v1805_v55 }
 0xebc   :  { %v1395_v56 = vmul.f32 0.5, %v1391_v37 }
 0xebe   :  { %v1399_v59 = vmul.f32 %v1395_v56, %v1362_v32 }
 0xec0   :  { %v1401_v60 = vpack.c.bf16 %v1399_v59, %v1398_v58 }
 0xec2   :  { %1483 = vmatmul.bf16.gmra.mxu0 %v1401_v60 }
 0xf2f   :  { %v1479_v34 = vpop.f32.mrf.mxu0 }
 0xf30   :  { %v1480_v62 = vadd.f32 %v1727_v61, %v1479_v34 }
 0xf32   :  { %v1489_v1 = vadd.f32 %v1480_v62, %v2635_v27 }
 0xf34   :  { %1493 = vst.msk [vmem:[#allocation23] sm:$0xff] %vm271_vm0, %v1489_v1 }
 0xf37   :  { %v1481_v50 = vpop.f32.mrf.mxu0 }
 0xf38   :  { %v1482_v36 = vadd.f32 %v1727_v61, %v1481_v50 }
 0xf3a   :  { %v1490_v31 = vadd.f32 %v1482_v36, %v2642_v35 }
 0xf3c   :  { %1494 = vst.msk [vmem:[#allocation23 + $0x8] sm:$0xff] %vm271_vm0, %v1490_v31 }
 0xf3f   :  { %v1484_v63 = vpop.f32.mrf.mxu0 }
 0xf40   :  { %v1485_v52 = vadd.f32 %v1727_v61, %v1484_v63 }
 0xf42   :  { %v1491_v2 = vadd.f32 %v1485_v52, %v2647_v40 }
 0xf44   :  { %1495 = vst.msk [vmem:[#allocation23 + $0x10] sm:$0xff] %vm271_vm0, %v1491_v2 }
 0xf47   :  { %v1486_v3 = vpop.f32.mrf.mxu0 }
 0xf48   :  { %v1487_v27 = vadd.f32 %v1727_v61, %v1486_v3 }
 0xf4a   :  { %v1492_v5 = vadd.f32 %v1487_v27, %v2652_v43 }
 0xf4c   :  { %1496 = vst.msk [vmem:[#allocation23 + $0x18] sm:$0xff] %vm271_vm0, %v1492_v5 }
 0xf4d   :  { %1509 = dma.vmem_to_hbm [thread:$0]  %s1502_s22, 512, %s1504_s0, [#allocation4], %s2209_s26, %s2209_s26, %s2210_s28  }
 0xf4e   :  { %2182 = dma.done.wait [#allocation4], 512  }
 0xf4f   :  { %2183 = vsyncadd [#allocation4], 4294966784 }
 0xf50   :  { %2184 = dma.done.wait [#allocation25], 256  }
 0xf51   :  { %2185 = vsyncadd [#allocation25], 4294967040 }
 0xf52   :  { %1531 = vsyncpa [#allocation3], 1 }
 0xf53   :  { %1532 = vsyncpa [#allocation6], 1 }
 0xf54   :  { %1533 = vsyncpa [#allocation9], 1 }
 0xf55   :  { %1534 = vsyncpa [#allocation12], 1 }
 0xf56   :  { %1535 = vsyncpa [#allocation15], 1 }
 0xf57   :  { %1536 = vsyncpa [#allocation18], 1 }
 0xf58   :  { %1537 = vsyncpa [#allocation21], 1 }
 0xf59   :  { %1538 = vsyncpa [#allocation4], 1 }
 0xf5a   :  { %1539 = vsyncpa [#allocation25], 1 }

// kernel: tpu_custom_call.1
= control target key start
LH: loop header
LB: loop body
LE: loop exit
PB: predicated region body
PF: predicated region fallthrough
CT: control target
= control target key end

     0   :  { %s2730_s0 = inlined_call_operand.vmem [shape: f32[2,16,32], index: 0, kind: input, shape index: {}]   ;;  %s2731_s1 = inlined_call_operand.vmem [shape: f32[2,8,32], index: 1, kind: input, shape index: {}]   ;;  %s2732_s2 = inlined_call_operand.hbm [shape: s32[2,1,16], index: 2, kind: input, shape index: {}]   ;;  %s2733_s3 = inlined_call_operand.vmem [shape: f32[1,32], index: 3, kind: input, shape index: {}]   ;;  %s2734_s4 = inlined_call_operand.vmem [shape: f32[1,32], index: 4, kind: input, shape index: {}]   ;;  %s2735_s5 = inlined_call_operand.hbm [shape: f32[1,32], index: 5, kind: input, shape index: {}]   ;;  %s2736_s6 = inlined_call_operand.hbm [shape: f32[1,32], index: 6, kind: input, shape index: {}]   ;;  %s2737_s7 = inlined_call_operand.vmem [shape: bf16[32,32], index: 7, kind: input, shape index: {}]   ;;  %s2738_s8 = inlined_call_operand.vmem [shape: bf16[32,64], index: 8, kind: input, shape index: {}]   ;;  %s2739_s9 = inlined_call_operand.hbm [shape: bf16[32,32], index: 9, kind: input, shape index: {}]   ;;  %s2740_s10 = inlined_call_operand.hbm [shape: f32[1,32], index: 10, kind: input, shape index: {}]   ;;  %s2741_s11 = inlined_call_operand.hbm [shape: bf16[32,32], index: 11, kind: input, shape index: {}]   ;;  %s2742_s12 = inlined_call_operand.hbm [shape: bf16[32,64], index: 12, kind: input, shape index: {}]   ;;  %s2743_s13 = inlined_call_operand.hbm [shape: bf16[32,32], index: 13, kind: input, shape index: {}]   ;;  %s2744_s14 = inlined_call_operand.hbm [shape: f32[1,32], index: 14, kind: input, shape index: {}]   ;;  %s2745_s15 = inlined_call_operand.hbm [shape: f32[1,32], index: 15, kind: input, shape index: {}]   ;;  %s2746_s16 = inlined_call_operand.hbm [shape: f32[1,32], index: 16, kind: input, shape index: {}]   ;;  %s2747_s17 = inlined_call_operand.hbm [shape: bf16[32,128], index: 17, kind: input, shape index: {}]   ;;  %s2748_s18 = inlined_call_operand.hbm [shape: f32[1,128], index: 18, kind: input, shape index: {}]   ;;  %s2749_s19 = inlined_call_operand.vmem [shape: bf16[128,32], index: 19, kind: input, shape index: {}]   ;;  %s2750_s20 = inlined_call_operand.vmem [shape: f32[1,32], index: 20, kind: input, shape index: {}]   ;;  %s2751_s21 = inlined_call_operand.hbm [shape: f32[2,16,32], index: 21, kind: output, shape index: {0}]   ;;  %s2752_s22 = inlined_call_operand.hbm [shape: f32[2,8,32], index: 22, kind: output, shape index: {1}]  }
   0x1   :  { %2755 = sst [smem:[#allocation35_spill]] %s2730_s0 }
   0x2   :  { %2756 = sst [smem:[#allocation36_spill]] %s2731_s1 }
   0x3   :  { %2757 = sst [smem:[#allocation37_spill]] %s2732_s2 }
   0x4   :  { %2758 = sst [smem:[#allocation38_spill]] %s2733_s3 }
   0x5   :  { %2759 = sst [smem:[#allocation39_spill]] %s2734_s4 }
   0x6   :  { %2760 = sst [smem:[#allocation40_spill]] %s2735_s5 }
   0x7   :  { %2761 = sst [smem:[#allocation41_spill]] %s2736_s6 }
   0x8   :  { %28 = vsyncpa [#allocation3], 0 }
   0x9   :  { %29 = vsyncpa [#allocation6], 0 }
   0xa   :  { %30 = vsyncpa [#allocation9], 0 }
   0xb   :  { %31 = vsyncpa [#allocation12], 0 }
   0xc   :  { %32 = vsyncpa [#allocation15], 0 }
   0xd   :  { %33 = vsyncpa [#allocation18], 0 }
   0xe   :  { %34 = vsyncpa [#allocation21], 0 }
   0xf   :  { %35 = vsyncpa [#allocation4], 0  ;;  %s2762_s29 = sld [smem:[#allocation40_spill]] }
  0x15   :  { %s63_s30 = sshll.u32 %s2762_s29, 4  ;;  %s64_s30 = int_to_ptr.hbm [resolvable:$true] %s63_s30 }
  0x16   :  { %36 = vsyncpa [#allocation25], 0  ;;  %s2186_s4 = smov [#allocation5]   ;;  %s88_s5 = sshll.u32 %s2739_s9, 4  ;;  %s89_s5 = int_to_ptr.hbm [resolvable:$true] %s88_s5 }
  0x17   :  { %s65_s0 = sshll.u32 %s2186_s4, 4  ;;  %s2187_s24 = smov [#allocation8]   ;;  %s66_s0 = int_to_ptr.vmem [resolvable:$true] %s65_s0 }
  0x18   :  { %68 = dma.hbm_to_vmem [thread:$0]  %s64_s30, 16, %s66_s0, [#allocation6]  }
  0x19   :  { %s90_s6 = sshll.u32 %s2187_s24, 4  ;;  %s2188_s25 = smov 64   ;;  %s91_s6 = int_to_ptr.vmem [resolvable:$true] %s90_s6 }
  0x1a   :  { %s2189_s26 = smov 4   ;;  %s112_s3 = sshll.u32 %s2741_s11, 4  ;;  %s113_s3 = int_to_ptr.hbm [resolvable:$true] %s112_s3 }
  0x1b   :  { %96 = dma.hbm_to_vmem [thread:$0]  %s89_s5, 256, %s91_s6, [#allocation9], %s2188_s25, %s2188_s25, %s2189_s26  }
  0x1c   :  { %s2190_s28 = smov [#allocation11]   ;;  %s138_s4 = sshll.u32 %s2743_s13, 4  ;;  %s139_s4 = int_to_ptr.hbm [resolvable:$true] %s138_s4 }
  0x1d   :  { %s114_s29 = sshll.u32 %s2190_s28, 4  ;;  %s2191_s0 = smov [#allocation14]   ;;  %s115_s29 = int_to_ptr.vmem [resolvable:$true] %s114_s29 }
  0x1e   :  { %120 = dma.hbm_to_vmem [thread:$0]  %s113_s3, 256, %s115_s29, [#allocation12], %s2188_s25, %s2188_s25, %s2189_s26  }
  0x1f   :  { %s140_s23 = sshll.u32 %s2191_s0, 4  ;;  %s163_s24 = sshll.u32 %s2745_s15, 4  ;;  %s141_s23 = int_to_ptr.vmem [resolvable:$true] %s140_s23  ;;  %s164_s24 = int_to_ptr.hbm [resolvable:$true] %s163_s24 }
  0x20   :  { %146 = dma.hbm_to_vmem [thread:$0]  %s139_s4, 256, %s141_s23, [#allocation15], %s2188_s25, %s2188_s25, %s2189_s26  }
  0x21   :  { %s184_s13 = sshll.u32 %s2747_s17, 4  ;;  %s2192_s2 = smov [#allocation17]   ;;  %s185_s13 = int_to_ptr.hbm [resolvable:$true] %s184_s13 }
  0x22   :  { %s165_s27 = sshll.u32 %s2192_s2, 4  ;;  %s2193_s3 = smov [#allocation20]   ;;  %s166_s27 = int_to_ptr.vmem [resolvable:$true] %s165_s27 }
  0x23   :  { %168 = dma.hbm_to_vmem [thread:$0]  %s164_s24, 16, %s166_s27, [#allocation18]  }
  0x24   :  { %s186_s28 = sshll.u32 %s2193_s3, 4  ;;  %s2763_s15 = sld [smem:[#allocation37_spill]]  ;;  %s187_s28 = int_to_ptr.vmem [resolvable:$true] %s186_s28 }
  0x25   :  { %192 = dma.hbm_to_vmem [thread:$0]  %s185_s13, 256, %s187_s28, [#allocation21], %s2188_s25, %s2188_s25, %s2189_s26  }
  0x26   :  { %s2194_s4 = smov [#allocation2]   ;;  %s2764_s1 = sld [smem:[#allocation41_spill]] }
  0x27   :  { %s47_s0 = sshll.u32 %s2194_s4, 4  ;;  %s2195_s24 = smov 16   ;;  %s48_s0 = int_to_ptr.vmem [resolvable:$true] %s47_s0 }
  0x28   :  { %s2196_s11 = smov 1   ;;  %s2197_s6 = smov [#allocation7]  }
  0x29   :  { %s76_s2 = sshll.u32 %s2197_s6, 4  ;;  %s102_s29 = sshll.u32 %s2740_s10, 4  ;;  %s77_s2 = int_to_ptr.vmem [resolvable:$true] %s76_s2  ;;  %s103_s29 = int_to_ptr.hbm [resolvable:$true] %s102_s29 }
  0x2a   :  { %s45_s30 = sshll.u32 %s2763_s15, 4  ;;  %s125_s9 = sshll.u32 %s2742_s12, 4  ;;  %s46_s30 = int_to_ptr.hbm [resolvable:$true] %s45_s30  ;;  %s126_s9 = int_to_ptr.hbm [resolvable:$true] %s125_s9 }
  0x2b   :  { %53 = dma.hbm_to_vmem [thread:$0]  %s46_s30, 32, %s48_s0, [#allocation3], %s2195_s24, %s2195_s24, %s2196_s11  }
  0x2c   :  { %s74_s5 = sshll.u32 %s2764_s1, 4  ;;  %s2198_s15 = smov [#allocation10]   ;;  %s75_s5 = int_to_ptr.hbm [resolvable:$true] %s74_s5 }
  0x2d   :  { %79 = dma.hbm_to_vmem [thread:$0]  %s75_s5, 16, %s77_s2, [#allocation6]  }
  0x2e   :  { %s104_s4 = sshll.u32 %s2198_s15, 4  ;;  %s2199_s30 = smov [#allocation13]   ;;  %s105_s4 = int_to_ptr.vmem [resolvable:$true] %s104_s4 }
  0x2f   :  { %107 = dma.hbm_to_vmem [thread:$0]  %s103_s29, 16, %s105_s4, [#allocation9]  }
  0x30   :  { %s127_s0 = sshll.u32 %s2199_s30, 4  ;;  %s152_s1 = sshll.u32 %s2744_s14, 4  ;;  %s128_s0 = int_to_ptr.vmem [resolvable:$true] %s127_s0  ;;  %s153_s1 = int_to_ptr.hbm [resolvable:$true] %s152_s1 }
  0x31   :  { %133 = dma.hbm_to_vmem [thread:$0]  %s126_s9, 256, %s128_s0, [#allocation12], %s2188_s25, %s2188_s25, %s2189_s26  }
  0x32   :  { %s174_s12 = sshll.u32 %s2746_s16, 4  ;;  %s2200_s11 = smov [#allocation16]   ;;  %s175_s12 = int_to_ptr.hbm [resolvable:$true] %s174_s12 }
  0x33   :  { %s154_s6 = sshll.u32 %s2200_s11, 4  ;;  %s2201_s2 = smov [#allocation19]   ;;  %s155_s6 = int_to_ptr.vmem [resolvable:$true] %s154_s6 }
  0x34   :  { %157 = dma.hbm_to_vmem [thread:$0]  %s153_s1, 16, %s155_s6, [#allocation15]  }
  0x35   :  { %s176_s27 = sshll.u32 %s2201_s2, 4  ;;  %s198_s14 = sshll.u32 %s2748_s18, 4  ;;  %s177_s27 = int_to_ptr.vmem [resolvable:$true] %s176_s27  ;;  %s199_s14 = int_to_ptr.hbm [resolvable:$true] %s198_s14 }
  0x36   :  { %179 = dma.hbm_to_vmem [thread:$0]  %s175_s12, 16, %s177_s27, [#allocation18]  }
  0x37   :  { %s2202_s13 = smov [#allocation22]  }
  0x38   :  { %s200_s25 = sshll.u32 %s2202_s13, 4  ;;  %s201_s25 = int_to_ptr.vmem [resolvable:$true] %s200_s25 }
  0x39   :  { %203 = dma.hbm_to_vmem [thread:$0]  %s199_s14, 16, %s201_s25, [#allocation21]  }
  0x3a   :  { %2168 = dma.done.wait [#allocation3], 32  }
  0x3b   :  { %2169 = vsyncadd [#allocation3], 4294967264 }
  0x3c   :  { %2170 = dma.done.wait [#allocation6], 32  }
  0x3d   :  { %2171 = vsyncadd [#allocation6], 4294967264 }
  0x3e   :  { %2172 = dma.done.wait [#allocation9], 272  }
  0x3f   :  { %2173 = vsyncadd [#allocation9], 4294967024 }
  0x40   :  { %2174 = dma.done.wait [#allocation12], 512  }
  0x41   :  { %2175 = vsyncadd [#allocation12], 4294966784 }
  0x42   :  { %2176 = dma.done.wait [#allocation15], 272  }
  0x43   :  { %2177 = vsyncadd [#allocation15], 4294967024 }
  0x44   :  { %2178 = dma.done.wait [#allocation18], 32  }
  0x45   :  { %2179 = vsyncadd [#allocation18], 4294967264 }
  0x46   :  { %2180 = dma.done.wait [#allocation21], 272  }
  0x47   :  { %2181 = vsyncadd [#allocation21], 4294967024  ;;  %vm271_vm0 = vcmask 261120   ;;  %s2765_s26 = sld [smem:[#allocation36_spill]]  ;;  %v2203_v8 = vmov 32.0   ;;  %v1656_v35 = vld [vmem:[%s2737_s7 + $0x8] sm:$0xff] }
  0x48   :  { %s2766_s15 = sld [smem:[#allocation35_spill]]  ;;  %1728 = vrcp.f32 %v2203_v8  ;;  %463 = vmatpush.bf16.msra.mxu1 %v1656_v35  ;;  %v1655_v39 = vld [vmem:[%s2737_s7] sm:$0xff]  ;;  %v1658_v43 = vld [vmem:[%s2738_s8 + $0x8] sm:$0xff]  ;;  %vm517_vm14 = vcmask 130048   ;;  %s2204_s16 = smov 96  }
  0x49   :  { %v1657_v48 = vld [vmem:[%s2738_s8] sm:$0xff]  ;;  %s2767_s27 = sld [smem:[#allocation38_spill]]  ;;  %s2206_s28 = smov 112  }
  0x4a   :  { %s2768_s14 = sld [smem:[#allocation39_spill]]  ;;  %s2207_s9 = smov 80  }
  0x4b   :  { %s1516_s18 = sshll.u32 %s2752_s22, 4  ;;  %s1503_s0 = sshll.u32 %s2751_s21, 4  ;;  %s1517_s18 = int_to_ptr.hbm [resolvable:$true] %s1516_s18  ;;  %s1504_s0 = int_to_ptr.hbm [resolvable:$true] %s1503_s0 }
  0x4c   :  { %464 = vmatpush.bf16.msra.mxu1 %v1655_v39 }
  0x4d   :  { %v2386_v0 = vld [vmem:[%s2765_s26] sm:$0xff]  ;;  %v2397_v4 = vld [vmem:[%s2765_s26 + $0x8] sm:$0xff]  ;;  %s2209_s26 = smov 128  }
  0x4e   :  { %v261_v1 = vld [vmem:[%s2766_s15] sm:$0xff]  ;;  %v383_v2 = vsel %vm271_vm0, %v2386_v0, 0.0  ;;  %v262_v5 = vld [vmem:[%s2766_s15 + $0x8] sm:$0xff]  ;;  %v386_v6 = vsel %vm271_vm0, %v2397_v4, 0.0  ;;  %v1729_v9 = vpop.eup %1728 }
  0x4f   :  { %v272_v3 = vsel %vm271_vm0, %v261_v1, 0.0  ;;  %384 = vadd.xlane.f32.xlu0 %v383_v2  ;;  %v275_v7 = vsel %vm271_vm0, %v262_v5, 0.0  ;;  %v285_v10 = vmul.f32 32.0, %v1729_v9  ;;  %vm289_vm1 = vweird.f32 %v1729_v9 }
  0x50   :  { %273 = vadd.xlane.f32.xlu1 %v272_v3  ;;  %501 = vmatpush.bf16.msrb.mxu1 %v1658_v43 }
  0x51   :  { %v286_v11 = vsub.f32 1.0, %v285_v10 }
  0x53   :  { %v287_v12 = vmul.f32 %v1729_v9, %v286_v11 }
  0x54   :  { %502 = vmatpush.bf16.msrb.mxu1 %v1657_v48 }
  0x55   :  { %v288_v13 = vadd.f32 %v1729_v9, %v287_v12 }
  0x57   :  { %387 = vadd.xlane.f32.xlu0 %v386_v6  ;;  %v2405_v14 = vsel %vm289_vm1, %v1729_v9, %v288_v13  ;;  %v1718_v9 = vld [vmem:[#allocation5] ss:$0 sm:$0xff] }
  0x58   :  { %276 = vadd.xlane.f32.xlu1 %v275_v7 }
  0xc2   :  { %v385_v15 = vpop.xlane.xlu0 %384 }
  0xc3   :  { %v274_v16 = vpop.xlane.xlu1 %273  ;;  %v389_v17 = vmul.f32 %v385_v15, %v2405_v14 }
  0xc4   :  { %v291_v18 = vmul.f32 %v2405_v14, %v274_v16 }
  0xc5   :  { %v2410_v19 = vsub.f32 %v2386_v0, %v389_v17  ;;  %v1719_v17 = vld [vmem:[#allocation7] ss:$0 sm:$0xff] }
  0xc6   :  { %v2412_v20 = vsub.f32 %v261_v1, %v291_v18 }
  0xc7   :  { %v393_v21 = vmul.f32 %v2410_v19, %v2410_v19 }
  0xc8   :  { %v299_v22 = vmul.f32 %v2412_v20, %v2412_v20 }
  0xc9   :  { %v395_v23 = vsel %vm271_vm0, %v393_v21, 0.0 }
  0xca   :  { %v303_v24 = vsel %vm271_vm0, %v299_v22, 0.0  ;;  %396 = vadd.xlane.f32.xlu2 %v395_v23  ;;  %v388_v25 = vpop.xlane.xlu0 %387 }
  0xcb   :  { %304 = vadd.xlane.f32.xlu0 %v303_v24  ;;  %v277_v26 = vpop.xlane.xlu1 %276  ;;  %v390_v27 = vmul.f32 %v388_v25, %v2405_v14 }
  0xcc   :  { %v292_v28 = vmul.f32 %v2405_v14, %v277_v26 }
  0xcd   :  { %v2423_v29 = vsub.f32 %v2397_v4, %v390_v27 }
  0xce   :  { %v2425_v30 = vsub.f32 %v262_v5, %v292_v28 }
  0xcf   :  { %v394_v31 = vmul.f32 %v2423_v29, %v2423_v29 }
  0xd0   :  { %v300_v32 = vmul.f32 %v2425_v30, %v2425_v30 }
  0xd1   :  { %v398_v33 = vsel %vm271_vm0, %v394_v31, 0.0  ;;  %v2457_v31 = vld [vmem:[%s2767_s27] ss:$0 sm:$0xff] }
  0xd2   :  { %v306_v34 = vsel %vm271_vm0, %v300_v32, 0.0  ;;  %399 = vadd.xlane.f32.xlu2 %v398_v33 }
  0xd3   :  { %307 = vadd.xlane.f32.xlu1 %v306_v34  ;;  %v2464_v34 = vld [vmem:[%s2768_s14] ss:$0 sm:$0xff] }
 0x13d   :  { %v397_v36 = vpop.xlane.xlu2 %396 }
 0x13e   :  { %v305_v37 = vpop.xlane.xlu0 %304  ;;  %v401_v38 = vmul.f32 %v397_v36, %v2405_v14 }
 0x13f   :  { %v315_v41 = vmul.f32 %v305_v37, %v2405_v14  ;;  %v2475_v37 = vld [vmem:[%s2766_s15 + $0x18] sm:$0xff] }
 0x140   :  { %v403_v40 = vadd.f32 1e-05, %v401_v38  ;;  %v281_v38 = vsel %vm271_vm0, %v2475_v37, 0.0 }
 0x141   :  { %v319_v42 = vadd.f32 1e-05, %v315_v41  ;;  %282 = vadd.xlane.f32.xlu0 %v281_v38 }
 0x142   :  { %1730 = vrsqrt.f32 %v403_v40  ;;  %vm411_vm3 = vweird.f32 %v403_v40 }
 0x143   :  { %1732 = vrsqrt.f32 %v319_v42  ;;  %vm329_vm10 = vweird.f32 %v319_v42 }
 0x145   :  { %v400_v44 = vpop.xlane.xlu2 %399 }
 0x146   :  { %v308_v45 = vpop.xlane.xlu1 %307  ;;  %v402_v46 = vmul.f32 %v400_v44, %v2405_v14 }
 0x147   :  { %v316_v47 = vmul.f32 %v308_v45, %v2405_v14 }
 0x148   :  { %v1731_v49 = vpop.eup %1730  ;;  %v404_v50 = vadd.f32 1e-05, %v402_v46  ;;  %v267_v46 = vld [vmem:[#allocation2] sm:$0x1] }
 0x149   :  { %v320_v51 = vadd.f32 1e-05, %v316_v47  ;;  %v406_v52 = vmul.f32 %v1731_v49, %v403_v40  ;;  %v1733_v55 = vpop.eup %1732  ;;  %vm412_vm2 = vweird.f32 %v1731_v49  ;;  %vm514_vm15 = vcmp.gt.s32.totalorder %v267_v46, 0 }
 0x14a   :  { %1734 = vrsqrt.f32 %v404_v50  ;;  %v324_v60 = vmul.f32 %v1733_v55, %v319_v42  ;;  %vm413_vm4 = vmor %vm411_vm3, %vm412_vm2  ;;  %vm421_vm6 = vweird.f32 %v404_v50  ;;  %vm330_vm11 = vweird.f32 %v1733_v55 }
 0x14b   :  { %v407_v53 = vmul.f32 %v1731_v49, %v406_v52  ;;  %1736 = vrsqrt.f32 %v320_v51  ;;  %vm339_vm8 = vweird.f32 %v320_v51  ;;  %vm331_vm13 = vmor %vm329_vm10, %vm330_vm11  ;;  %v2205_v47 = vmov 0  }
 0x14c   :  { %v325_v3 = vmul.f32 %v1733_v55, %v324_v60  ;;  %v537_v48 = vsel %vm514_vm15, 1, %v2205_v47  ;;  %vm882_vm10 = vcmask 64512   ;;  %vm912_vm11 = vcmask 1043456  }
 0x14d   :  { %v408_v54 = vmul.f32 0.5, %v407_v53 }
 0x14e   :  { %v326_v10 = vmul.f32 0.5, %v325_v3 }
 0x14f   :  { %v409_v56 = vsub.f32 1.5, %v408_v54  ;;  %v2495_v54 = vld [vmem:[%s2766_s15 + $0x10] sm:$0xff] }
 0x150   :  { %v1735_v57 = vpop.eup %1734  ;;  %v327_v18 = vsub.f32 1.5, %v326_v10 }
 0x151   :  { %v1737_v58 = vpop.eup %1736  ;;  %v410_v59 = vmul.f32 %v1731_v49, %v409_v56  ;;  %v416_v61 = vmul.f32 %v1735_v57, %v404_v50  ;;  %vm422_vm5 = vweird.f32 %v1735_v57  ;;  %v278_v56 = vsel %vm271_vm0, %v2495_v54, 0.0 }
 0x152   :  { %v334_v62 = vmul.f32 %v1737_v58, %v320_v51  ;;  %vm423_vm7 = vmor %vm421_vm6, %vm422_vm5  ;;  %vm340_vm9 = vweird.f32 %v1737_v58  ;;  %v328_v24 = vmul.f32 %v1733_v55, %v327_v18 }
 0x153   :  { %v417_v63 = vmul.f32 %v1735_v57, %v416_v61  ;;  %v414_v2 = vsel %vm413_vm4, %v1731_v49, %v410_v59  ;;  %vm341_vm12 = vmor %vm339_vm8, %vm340_vm9  ;;  %v538_v49 = vperm.slane %v537_v48, 0 }
 0x154   :  { %v335_v1 = vmul.f32 %v1737_v58, %v334_v62  ;;  %v425_v8 = vmul.f32 %v414_v2, %v2410_v19  ;;  %v332_v27 = vsel %vm331_vm13, %v1733_v55, %v328_v24 }
 0x155   :  { %v418_v5 = vmul.f32 0.5, %v417_v63  ;;  %vm2485_vm1 = vcmp.eq.s32.totalorder %v538_v49, 1 }
 0x156   :  { %v336_v7 = vmul.f32 0.5, %v335_v1  ;;  %v430_v16 = vmul.f32 %v1718_v9, %v425_v8 }
 0x157   :  { %v419_v6 = vsub.f32 1.5, %v418_v5 }
 0x158   :  { %v337_v13 = vsub.f32 1.5, %v336_v7  ;;  %v435_v19 = vadd.f32 %v1719_v17, %v430_v16 }
 0x159   :  { %v420_v11 = vmul.f32 %v1735_v57, %v419_v6 }
 0x15a   :  { %v338_v22 = vmul.f32 %v1737_v58, %v337_v13 }
 0x15b   :  { %v424_v12 = vsel %vm423_vm7, %v1735_v57, %v420_v11 }
 0x15c   :  { %v426_v15 = vmul.f32 %v424_v12, %v2423_v29  ;;  %v342_v26 = vsel %vm341_vm12, %v1737_v58, %v338_v22  ;;  %v363_v29 = vmul.f32 %v332_v27, %v2412_v20 }
 0x15d   :  { %v364_v28 = vmul.f32 %v342_v26, %v2425_v30 }
 0x15e   :  { %v431_v21 = vmul.f32 %v1718_v9, %v426_v15  ;;  %v370_v33 = vmul.f32 %v2457_v31, %v363_v29 }
 0x15f   :  { %v371_v32 = vmul.f32 %v2457_v31, %v364_v28 }
 0x160   :  { %v436_v23 = vadd.f32 %v1719_v17, %v431_v21  ;;  %v377_v30 = vadd.f32 %v2464_v34, %v370_v33 }
 0x161   :  { %v378_v35 = vadd.f32 %v2464_v34, %v371_v32 }
 0x162   :  { %v437_v25 = vpack.c.bf16 %v436_v23, %v435_v19 }
 0x163   :  { %v2468_v36 = vpack.c.bf16 %v378_v35, %v377_v30 }
 0x164   :  { %1548 = vmatmul.msk.bf16.vlgmr.msra.gmra.mxu1 %vm271_vm0, %v437_v25 }
 0x174   :  { %1557 = vmatmul.msk.bf16.vlgmr.msrb.gmra.mxu1 %vm271_vm0, %v2468_v36 }
 0x1b4   :  { %v283_v57 = vpop.xlane.xlu0 %282 }
 0x1b5   :  { %v294_v58 = vmul.f32 %v2405_v14, %v283_v57 }
 0x1b7   :  { %v298_v59 = vsub.f32 %v2475_v37, %v294_v58 }
 0x1b9   :  { %v302_v60 = vmul.f32 %v298_v59, %v298_v59 }
 0x1bb   :  { %v312_v61 = vsel %vm271_vm0, %v302_v60, 0.0 }
 0x1e1   :  { %v466_v20 = vpop.f32.mrf.mxu1 }
 0x1e2   :  { %v515_v44 = vpack.c.bf16 %v466_v20, %v466_v20 }
 0x1e9   :  { %v2479_v39 = vpop.f32.mrf.mxu1 }
 0x1f1   :  { %v504_v40 = vpop.f32.mrf.mxu1 }
 0x1f9   :  { %v506_v41 = vpop.f32.mrf.mxu1 }
 0x1fa   :  { %v516_v42 = vpack.c.bf16 %v506_v41, %v504_v40 }
 0x1fc   :  { %554 = vrot.lane.b32.xlu1 %v516_v42, %s2204_s16  ;;  %v522_v43 = vsel %vm517_vm14, %v516_v42, 0 }
 0x1fd   :  { %531 = vmatpush.bf16.xpose.msra.mxu2 %v522_v43 }
 0x204   :  { %1559 = vmatmul.msk.bf16.vlgmr.msra.gmra.mxu2 %vm517_vm14, %v515_v44 }
 0x26e   :  { %v555_v45 = vpop.permute.xlu1 %554 }
 0x26f   :  { %567 = vmatpush.bf16.msra.mxu3 %v555_v45 }
 0x287   :  { %v533_v51 = vpop.f32.mrf.mxu2 }
 0x288   :  { %v540_v52 = vsel %vm2485_vm1, %v533_v51, -3.4028235e+38 }
 0x289   :  { %v541_v53 = vsel %vm517_vm14, %v540_v52, -inf }
 0x28a   :  { %542 = vmax.xlane.f32.xlu2 %v541_v53 }
 0x28f   :  { %v535_v55 = vpop.f32.mrf.mxu2 }
 0x292   :  { %279 = vadd.xlane.f32.xlu2 %v278_v56 }
 0x2aa   :  { %576 = vrot.lane.b32.xlu2 %v516_v42, %s2206_s28 }
 0x2d3   :  { %313 = vadd.xlane.f32.xlu2 %v312_v61 }
 0x2eb   :  { %610 = vrot.lane.b32.xlu2 %v516_v42, %s2207_s9 }
 0x2fd   :  { %v543_v62 = vpop.xlane.xlu2 %542 }
 0x2fe   :  { %v544_v63 = vsub.f32 %v540_v52, %v543_v62  ;;  %v635_v62 = vpack.c.bf16 %v2479_v39, %v2479_v39 }
 0x300   :  { %v545_v1 = vmul.f32 1.442695, %v544_v63 }
 0x302   :  { %1738 = vpow2.f32 %v545_v1 }
 0x305   :  { %v280_v2 = vpop.xlane.xlu2 %279 }
 0x306   :  { %v293_v3 = vmul.f32 %v2405_v14, %v280_v2 }
 0x308   :  { %v1739_v5 = vpop.eup %1738  ;;  %v297_v6 = vsub.f32 %v2495_v54, %v293_v3 }
 0x309   :  { %v547_v7 = vsel %vm517_vm14, %v1739_v5, 0.0 }
 0x30a   :  { %548 = vadd.xlane.f32.xlu0 %v547_v7  ;;  %v301_v8 = vmul.f32 %v297_v6, %v297_v6 }
 0x30c   :  { %v309_v9 = vsel %vm271_vm0, %v301_v8, 0.0 }
 0x30d   :  { %310 = vadd.xlane.f32.xlu1 %v309_v9  ;;  %v577_v10 = vpop.permute.xlu2 %576 }
 0x30e   :  { %v582_v11 = vsel %vm517_vm14, %v577_v10, 0 }
 0x30f   :  { %591 = vmatpush.bf16.xpose.msrb.mxu3 %v582_v11 }
 0x31e   :  { %574 = vrot.lane.b32.xlu0 %v515_v44, %s2206_s28 }
 0x346   :  { %v314_v12 = vpop.xlane.xlu2 %313 }
 0x347   :  { %v318_v15 = vmul.f32 %v314_v12, %v2405_v14 }
 0x349   :  { %v322_v16 = vadd.f32 1e-05, %v318_v15 }
 0x34b   :  { %1740 = vrsqrt.f32 %v322_v16  ;;  %vm359_vm2 = vweird.f32 %v322_v16 }
 0x34e   :  { %v611_v13 = vpop.permute.xlu2 %610 }
 0x34f   :  { %623 = vmatpush.bf16.msra.mxu0 %v611_v13 }
 0x351   :  { %v1741_v17 = vpop.eup %1740 }
 0x352   :  { %v354_v18 = vmul.f32 %v1741_v17, %v322_v16  ;;  %vm360_vm3 = vweird.f32 %v1741_v17 }
 0x353   :  { %vm361_vm4 = vmor %vm359_vm2, %vm360_vm3 }
 0x354   :  { %v355_v22 = vmul.f32 %v1741_v17, %v354_v18 }
 0x356   :  { %v356_v26 = vmul.f32 0.5, %v355_v22 }
 0x358   :  { %v357_v29 = vsub.f32 1.5, %v356_v26 }
 0x35a   :  { %v358_v33 = vmul.f32 %v1741_v17, %v357_v29 }
 0x35c   :  { %v362_v20 = vsel %vm361_vm4, %v1741_v17, %v358_v33 }
 0x35d   :  { %v366_v41 = vmul.f32 %v362_v20, %v298_v59 }
 0x35f   :  { %v373_v45 = vmul.f32 %v2457_v31, %v366_v41 }
 0x361   :  { %v380_v51 = vadd.f32 %v2464_v34, %v373_v45 }
 0x37d   :  { %v549_v21 = vpop.xlane.xlu0 %548 }
 0x37e   :  { %1742 = vrcp.f32 %v549_v21 }
 0x380   :  { %v311_v19 = vpop.xlane.xlu1 %310 }
 0x381   :  { %v317_v23 = vmul.f32 %v311_v19, %v2405_v14 }
 0x383   :  { %v321_v24 = vadd.f32 1e-05, %v317_v23 }
 0x384   :  { %v1743_v25 = vpop.eup %1742 }
 0x385   :  { %1744 = vrsqrt.f32 %v321_v24  ;;  %v551_v27 = vmul.f32 %v1743_v25, %v1739_v5  ;;  %vm349_vm5 = vweird.f32 %v321_v24  ;;  %v268_v5 = vld [vmem:[#allocation2 + $0x1] sm:$0x1] }
 0x386   :  { %vm634_vm8 = vcmp.gt.s32.totalorder %v268_v5, 0  ;;  %v1722_v5 = vld [vmem:[#allocation10] ss:$0 sm:$0xff] }
 0x387   :  { %v552_v28 = vpack.c.bf16 %v551_v27, %v551_v27 }
 0x389   :  { %1560 = vmatmul.msk.bf16.vlgmr.msra.gmra.mxu3 %vm517_vm14, %v552_v28 }
 0x38b   :  { %v1745_v32 = vpop.eup %1744 }
 0x38c   :  { %v344_v35 = vmul.f32 %v1745_v32, %v321_v24  ;;  %vm350_vm6 = vweird.f32 %v1745_v32 }
 0x38d   :  { %vm351_vm7 = vmor %vm349_vm5, %vm350_vm6 }
 0x38e   :  { %v345_v30 = vmul.f32 %v1745_v32, %v344_v35 }
 0x390   :  { %v346_v38 = vmul.f32 0.5, %v345_v30  ;;  %v575_v46 = vpop.permute.xlu0 %574 }
 0x392   :  { %v347_v40 = vsub.f32 1.5, %v346_v38 }
 0x394   :  { %v348_v42 = vmul.f32 %v1745_v32, %v347_v40 }
 0x396   :  { %v352_v43 = vsel %vm351_vm7, %v1745_v32, %v348_v42 }
 0x397   :  { %v365_v44 = vmul.f32 %v352_v43, %v297_v6  ;;  %v656_v6 = vsel %vm634_vm8, 1, %v2205_v47 }
 0x398   :  { %v657_v7 = vperm.slane %v656_v6, 0 }
 0x399   :  { %1561 = vmatmul.msk.bf16.vlgmr.msrb.gmra.mxu3 %vm517_vm14, %v575_v46  ;;  %v372_v48 = vmul.f32 %v2457_v31, %v365_v44 }
 0x39a   :  { %vm2534_vm9 = vcmp.eq.s32.totalorder %v657_v7, 1 }
 0x39b   :  { %v379_v49 = vadd.f32 %v2464_v34, %v372_v48 }
 0x39d   :  { %v2518_v52 = vpack.c.bf16 %v380_v51, %v379_v49  ;;  %v1662_v49 = vld [vmem:[#allocation11 + $0x8] sm:$0xff] }
 0x39f   :  { %1558 = vmatmul.msk.bf16.gmra.mxu1 %vm271_vm0, %v2518_v52 }
 0x40c   :  { %v2522_v53 = vpop.f32.mrf.mxu3 }
 0x414   :  { %v571_v55 = vpop.f32.mrf.mxu3 }
 0x41c   :  { %v509_v56 = vpop.f32.mrf.mxu1  ;;  %v593_v57 = vpop.f32.mrf.mxu3 }
 0x41d   :  { %v597_v58 = vsel %vm2485_vm1, %v593_v57, -3.4028235e+38 }
 0x41e   :  { %v598_v59 = vsel %vm517_vm14, %v597_v58, -inf }
 0x41f   :  { %599 = vmax.xlane.f32.xlu0 %v598_v59 }
 0x424   :  { %v511_v31 = vpop.f32.mrf.mxu1  ;;  %v595_v60 = vpop.f32.mrf.mxu3 }
 0x425   :  { %v636_v61 = vpack.c.bf16 %v511_v31, %v509_v56  ;;  %v1661_v56 = vld [vmem:[#allocation11] sm:$0xff] }
 0x427   :  { %v641_v34 = vsel %vm517_vm14, %v636_v61, 0 }
 0x428   :  { %650 = vmatpush.bf16.xpose.msrb.mxu2 %v641_v34  ;;  %v1659_v34 = vld [vmem:[#allocation8] sm:$0xff] }
 0x42f   :  { %1563 = vmatmul.msk.bf16.vlgmr.msrb.gmra.mxu2 %vm517_vm14, %v635_v62 }
 0x433   :  { %693 = vrot.lane.b32.xlu0 %v635_v62, %s2206_s28 }
 0x492   :  { %v600_v63 = vpop.xlane.xlu0 %599 }
 0x493   :  { %v601_v1 = vsub.f32 %v597_v58, %v600_v63 }
 0x495   :  { %v602_v50 = vmul.f32 1.442695, %v601_v1 }
 0x497   :  { %1746 = vpow2.f32 %v602_v50 }
 0x49d   :  { %v1747_v2 = vpop.eup %1746 }
 0x49e   :  { %v604_v3 = vsel %vm517_vm14, %v1747_v2, 0.0 }
 0x49f   :  { %605 = vadd.xlane.f32.xlu1 %v604_v3  ;;  %v1663_v3 = vld [vmem:[#allocation13] sm:$0xff] }
 0x4a5   :  { %v694_v16 = vpop.permute.xlu0 %693 }
 0x4b2   :  { %v652_v39 = vpop.f32.mrf.mxu2 }
 0x4b3   :  { %v659_v9 = vsel %vm2534_vm9, %v652_v39, -3.4028235e+38 }
 0x4b4   :  { %v660_v10 = vsel %vm517_vm14, %v659_v9, -inf }
 0x4b5   :  { %661 = vmax.xlane.f32.xlu0 %v660_v10 }
 0x4b8   :  { %695 = vrot.lane.b32.xlu1 %v636_v61, %s2206_s28 }
 0x4ba   :  { %v654_v11 = vpop.f32.mrf.mxu2 }
 0x512   :  { %v606_v12 = vpop.xlane.xlu1 %605 }
 0x513   :  { %1748 = vrcp.f32 %v606_v12 }
 0x519   :  { %v1749_v13 = vpop.eup %1748 }
 0x51a   :  { %v608_v15 = vmul.f32 %v1749_v13, %v1747_v2  ;;  %v1664_v2 = vld [vmem:[#allocation13 + $0x8] sm:$0xff] }
 0x51c   :  { %v609_v47 = vpack.c.bf16 %v608_v15, %v608_v15 }
 0x51e   :  { %1562 = vmatmul.msk.bf16.vlgmr.msra.gmra.mxu0 %vm517_vm14, %v609_v47 }
 0x528   :  { %v662_v17 = vpop.xlane.xlu0 %661 }
 0x529   :  { %v663_v18 = vsub.f32 %v659_v9, %v662_v17 }
 0x52a   :  { %v696_v21 = vpop.permute.xlu1 %695 }
 0x52b   :  { %v664_v22 = vmul.f32 1.442695, %v663_v18  ;;  %v701_v19 = vsel %vm517_vm14, %v696_v21, 0 }
 0x52c   :  { %710 = vmatpush.bf16.xpose.msrb.mxu0 %v701_v19 }
 0x52d   :  { %1750 = vpow2.f32 %v664_v22 }
 0x533   :  { %v1751_v23 = vpop.eup %1750  ;;  %1565 = vmatmul.msk.bf16.vlgmr.msrb.gmra.mxu0 %vm517_vm14, %v694_v16 }
 0x534   :  { %v666_v24 = vsel %vm517_vm14, %v1751_v23, 0.0  ;;  %852 = vmatpush.bf16.msra.mxu0 %v1664_v2 }
 0x535   :  { %667 = vadd.xlane.f32.xlu0 %v666_v24 }
 0x538   :  { %853 = vmatpush.bf16.msra.mxu0 %v1663_v3 }
 0x59b   :  { %v625_v25 = vpop.f32.mrf.mxu0 }
 0x5a3   :  { %v627_v26 = vpop.f32.mrf.mxu0 }
 0x5a8   :  { %v668_v44 = vpop.xlane.xlu0 %667 }
 0x5b0   :  { %v712_v27 = vpop.f32.mrf.mxu0 }
 0x5b1   :  { %v716_v28 = vsel %vm2534_vm9, %v712_v27, -3.4028235e+38 }
 0x5b2   :  { %v717_v29 = vsel %vm517_vm14, %v716_v28, -inf }
 0x5b3   :  { %718 = vmax.xlane.f32.xlu2 %v717_v29 }
 0x5b8   :  { %v714_v32 = vpop.f32.mrf.mxu0 }
 0x5cb   :  { %729 = vrot.lane.b32.xlu2 %v636_v61, %s2207_s9 }
 0x626   :  { %v719_v33 = vpop.xlane.xlu2 %718 }
 0x627   :  { %v720_v35 = vsub.f32 %v716_v28, %v719_v33 }
 0x629   :  { %v721_v30 = vmul.f32 1.442695, %v720_v35 }
 0x62b   :  { %1752 = vpow2.f32 %v721_v30 }
 0x62e   :  { %v730_v20 = vpop.permute.xlu2 %729 }
 0x62f   :  { %742 = vmatpush.bf16.msra.mxu1 %v730_v20 }
 0x631   :  { %v1753_v38 = vpop.eup %1752 }
 0x632   :  { %v723_v40 = vsel %vm517_vm14, %v1753_v38, 0.0 }
 0x633   :  { %724 = vadd.xlane.f32.xlu1 %v723_v40 }
 0x64c   :  { %673 = vrot.lane.b32.xlu1 %v636_v61, %s2204_s16  ;;  %v1660_v61 = vld [vmem:[#allocation8 + $0x8] sm:$0xff] }
 0x64d   :  { %783 = vmatpush.bf16.msra.mxu2 %v1660_v61 }
 0x651   :  { %784 = vmatpush.bf16.msra.mxu2 %v1659_v34 }
 0x6a6   :  { %v725_v41 = vpop.xlane.xlu1 %724 }
 0x6a7   :  { %1754 = vrcp.f32 %v725_v41 }
 0x6a8   :  { %1756 = vrcp.f32 %v668_v44 }
 0x6ad   :  { %v1755_v42 = vpop.eup %1754 }
 0x6ae   :  { %v727_v43 = vmul.f32 %v1755_v42, %v1753_v38  ;;  %v1757_v46 = vpop.eup %1756 }
 0x6af   :  { %v670_v48 = vmul.f32 %v1757_v46, %v1751_v23 }
 0x6b0   :  { %v728_v45 = vpack.c.bf16 %v727_v43, %v727_v43 }
 0x6b1   :  { %v671_v55 = vpack.c.bf16 %v670_v48, %v670_v48 }
 0x6b2   :  { %1566 = vmatmul.msk.bf16.vlgmr.msra.gmra.mxu1 %vm517_vm14, %v728_v45 }
 0x6be   :  { %v674_v51 = vpop.permute.xlu1 %673 }
 0x6bf   :  { %686 = vmatpush.bf16.msra.mxu3 %v674_v51 }
 0x6c2   :  { %1564 = vmatmul.msk.bf16.vlgmr.msra.gmra.mxu3 %vm517_vm14, %v671_v55 }
 0x6c3   :  { %813 = vmatpush.bf16.msrb.mxu3 %v1662_v49 }
 0x6c7   :  { %814 = vmatpush.bf16.msrb.mxu3 %v1661_v56 }
 0x6d2   :  { %1584 = vmatmul.msk.bf16.vlgmr.msrb.gmra.mxu3 %vm271_vm0, %v2468_v36 }
 0x6e2   :  { %1585 = vmatmul.msk.bf16.gmra.mxu3 %vm271_vm0, %v2518_v52 }
 0x72f   :  { %v744_v57 = vpop.f32.mrf.mxu1 }
 0x730   :  { %v1703_v58 = vpack.i.bf16 %v744_v57, %v625_v25 }
 0x732   :  { %1704 = vrot.lane.b32.xlu0 %v1703_v58, %s2195_s24 }
 0x737   :  { %v746_v59 = vpop.f32.mrf.mxu1 }
 0x745   :  { %v688_v31 = vpop.f32.mrf.mxu3 }
 0x74d   :  { %v690_v60 = vpop.f32.mrf.mxu3 }
 0x7a4   :  { %v1705_v62 = vpop.permute.xlu0 %1704 }
 0x7a5   :  { %v1707_v63 = vunpack.i.h.bf16 %v1705_v62  ;;  %v1706_v1 = vunpack.i.l.bf16 %v1705_v62 }
 0x7a7   :  { %v752_v50 = vsel %vm517_vm14, %v688_v31, %v1707_v63  ;;  %v633_v36 = vsel %vm517_vm14, %v2522_v53, %v1706_v1  ;;  %v816_v53 = vpop.f32.mrf.mxu3 }
 0x7a8   :  { %v753_v52 = vpack.c.bf16 %v752_v50, %v633_v36 }
 0x7aa   :  { %1575 = vmatmul.msk.bf16.vlgmr.msra.gmra.mxu2 %vm271_vm0, %v753_v52 }
 0x82d   :  { %v786_v6 = vpop.f32.mrf.mxu2 }
 0x82e   :  { %v787_v7 = vadd.f32 %v1722_v5, %v786_v6 }
 0x830   :  { %v1209_v8 = vadd.f32 %v787_v7, %v2386_v0  ;;  %v818_v0 = vpop.f32.mrf.mxu3 }
 0x831   :  { %v860_v47 = vpack.c.bf16 %v818_v0, %v816_v53 }
 0x832   :  { %1211 = vst.msk [vmem:[#allocation24] sm:$0xff] %vm271_vm0, %v1209_v8 }
 0x835   :  { %v788_v39 = vpop.f32.mrf.mxu2 }
 0x836   :  { %v789_v9 = vadd.f32 %v1722_v5, %v788_v39 }
 0x838   :  { %v826_v10 = vpack.c.bf16 %v789_v9, %v787_v7  ;;  %v1210_v11 = vadd.f32 %v789_v9, %v2397_v4  ;;  %v821_v27 = vpop.f32.mrf.mxu3 }
 0x83a   :  { %1212 = vst.msk [vmem:[#allocation24 + $0x8] sm:$0xff] %vm271_vm0, %v1210_v11  ;;  %1594 = vmatmul.msk.bf16.vlgmr.msra.gmra.mxu0 %vm271_vm0, %v826_v10 }
 0x840   :  { %v823_v28 = vpop.f32.mrf.mxu3 }
 0x841   :  { %v1010_v29 = vpack.c.bf16 %v823_v28, %v821_v27 }
 0x8b7   :  { %v855_v12 = vpop.f32.mrf.mxu0 }
 0x8b8   :  { %v861_v13 = vpack.c.bf16 %v855_v12, %v855_v12 }
 0x8ba   :  { %933 = vrot.lane.b32.xlu0 %v861_v13, %s2206_s28  ;;  %v866_v15 = vsel %vm517_vm14, %v861_v13, 0 }
 0x8bb   :  { %875 = vmatpush.bf16.xpose.msrb.mxu1 %v866_v15 }
 0x8bf   :  { %v857_v16 = vpop.f32.mrf.mxu0 }
 0x8c0   :  { %v2572_v4 = vpack.c.bf16 %v857_v16, %v857_v16 }
 0x8c2   :  { %931 = vrot.lane.b32.xlu0 %v860_v47, %s2206_s28  ;;  %1595 = vmatmul.msk.bf16.vlgmr.msrb.gmra.mxu1 %vm517_vm14, %v860_v47  ;;  %v1016_v62 = vsel %vm517_vm14, %v2572_v4, 0 }
 0x8ca   :  { %1081 = vrot.lane.b32.xlu0 %v2572_v4, %s2206_s28 }
 0x92c   :  { %v934_v17 = vpop.permute.xlu0 %933 }
 0x92d   :  { %v939_v18 = vsel %vm517_vm14, %v934_v17, 0 }
 0x92e   :  { %948 = vmatpush.bf16.xpose.msrb.mxu0 %v939_v18 }
 0x934   :  { %v932_v21 = vpop.permute.xlu0 %931 }
 0x935   :  { %1597 = vmatmul.msk.bf16.vlgmr.msrb.gmra.mxu0 %vm517_vm14, %v932_v21 }
 0x93c   :  { %v1082_v22 = vpop.permute.xlu0 %1081 }
 0x93d   :  { %v1087_v19 = vsel %vm517_vm14, %v1082_v22, 0 }
 0x93e   :  { %1096 = vmatpush.bf16.xpose.msra.mxu0 %v1087_v19 }
 0x93f   :  { %v877_v23 = vpop.f32.mrf.mxu1 }
 0x940   :  { %v883_v24 = vsel %vm882_vm10, %v877_v23, -inf }
 0x941   :  { %884 = vmax.xlane.f32.xlu2 %v883_v24 }
 0x947   :  { %v879_v25 = vpop.f32.mrf.mxu1 }
 0x948   :  { %v886_v26 = vsel %vm882_vm10, %v879_v25, -inf }
 0x949   :  { %887 = vmax.xlane.f32.xlu1 %v886_v26 }
 0x962   :  { %1079 = vrot.lane.b32.xlu1 %v1010_v29, %s2206_s28  ;;  %s2210_s28 = smov 8  }
 0x9b2   :  { %v950_v32 = vpop.f32.mrf.mxu0 }
 0x9b3   :  { %v955_v48 = vsel %vm882_vm10, %v950_v32, -inf }
 0x9b4   :  { %v885_v33 = vpop.xlane.xlu2 %884 }
 0x9b5   :  { %v889_v35 = vsub.f32 %v877_v23, %v885_v33 }
 0x9b7   :  { %v891_v30 = vmul.f32 1.442695, %v889_v35 }
 0x9b9   :  { %1758 = vpow2.f32 %v891_v30 }
 0x9ba   :  { %v2582_v20 = vpop.f32.mrf.mxu0 }
 0x9bb   :  { %v958_v38 = vsel %vm882_vm10, %v2582_v20, -inf }
 0x9bc   :  { %v888_v40 = vpop.xlane.xlu1 %887  ;;  %959 = vmax.xlane.f32.xlu1 %v958_v38 }
 0x9bd   :  { %v890_v41 = vsub.f32 %v879_v25, %v888_v40 }
 0x9bf   :  { %v1759_v42 = vpop.eup %1758  ;;  %v893_v43 = vmul.f32 1.442695, %v890_v41 }
 0x9c0   :  { %v895_v44 = vsel %vm882_vm10, %v1759_v42, 0.0 }
 0x9c1   :  { %1760 = vpow2.f32 %v893_v43  ;;  %896 = vadd.xlane.f32.xlu0 %v895_v44 }
 0x9c7   :  { %v1761_v45 = vpop.eup %1760 }
 0x9c8   :  { %v898_v46 = vsel %vm882_vm10, %v1761_v45, 0.0 }
 0x9c9   :  { %899 = vadd.xlane.f32.xlu2 %v898_v46  ;;  %956 = vmax.xlane.f32.xlu0 %v955_v48 }
 0x9d4   :  { %v1080_v49 = vpop.permute.xlu1 %1079 }
 0x9d5   :  { %1601 = vmatmul.msk.bf16.vlgmr.msra.gmra.mxu0 %vm517_vm14, %v1080_v49  ;;  %978 = vrot.lane.b32.xlu1 %v861_v13, %s2207_s9 }
 0x9dd   :  { %1056 = vrot.lane.b32.xlu1 %v2572_v4, %s2204_s16 }
 0x9e1   :  { %907 = vrot.lane.b32.xlu2 %v861_v13, %s2204_s16 }
 0xa2f   :  { %v960_v56 = vpop.xlane.xlu1 %959 }
 0xa30   :  { %v962_v47 = vsub.f32 %v2582_v20, %v960_v56 }
 0xa32   :  { %v965_v18 = vmul.f32 1.442695, %v962_v47 }
 0xa34   :  { %v897_v51 = vpop.xlane.xlu0 %896 }
 0xa35   :  { %1762 = vrcp.f32 %v897_v51 }
 0xa3b   :  { %v1763_v57 = vpop.eup %1762 }
 0xa3c   :  { %v900_v55 = vpop.xlane.xlu2 %899  ;;  %v903_v59 = vmul.f32 %v1763_v57, %v1759_v42  ;;  %v957_v50 = vpop.xlane.xlu0 %956 }
 0xa3d   :  { %1764 = vrcp.f32 %v900_v55  ;;  %v961_v2 = vsub.f32 %v950_v32, %v957_v50 }
 0xa3f   :  { %v963_v6 = vmul.f32 1.442695, %v961_v2 }
 0xa41   :  { %1766 = vpow2.f32 %v963_v6 }
 0xa43   :  { %v1765_v58 = vpop.eup %1764 }
 0xa44   :  { %v904_v31 = vmul.f32 %v1765_v58, %v1761_v45  ;;  %v908_v60 = vpop.permute.xlu2 %907 }
 0xa45   :  { %v914_v61 = vsel %vm912_vm11, %v908_v60, 0 }
 0xa46   :  { %v905_v34 = vpack.c.bf16 %v904_v31, %v903_v59  ;;  %923 = vmatpush.bf16.msrb.mxu2 %v914_v61 }
 0xa47   :  { %v979_v63 = vpop.permute.xlu1 %978  ;;  %v1767_v39 = vpop.eup %1766 }
 0xa48   :  { %v984_v1 = vsel %vm912_vm11, %v979_v63, 0  ;;  %v967_v9 = vsel %vm882_vm10, %v1767_v39, 0.0 }
 0xa49   :  { %1596 = vmatmul.msk.bf16.vlgmr.msrb.gmra.mxu2 %vm882_vm10, %v905_v34  ;;  %993 = vmatpush.bf16.msra.mxu1 %v984_v1 }
 0xa4a   :  { %1025 = vmatpush.bf16.xpose.msra.mxu2 %v1016_v62 }
 0xa4f   :  { %v1057_v36 = vpop.permute.xlu1 %1056 }
 0xa50   :  { %v1062_v52 = vsel %vm912_vm11, %v1057_v36, 0 }
 0xa51   :  { %1071 = vmatpush.bf16.msra.mxu3 %v1062_v52 }
 0xa52   :  { %v1098_v3 = vpop.f32.mrf.mxu0 }
 0xa53   :  { %v1103_v5 = vsel %vm882_vm10, %v1098_v3, -inf }
 0xa54   :  { %1104 = vmax.xlane.f32.xlu2 %v1103_v5 }
 0xa59   :  { %1599 = vmatmul.msk.bf16.vlgmr.msra.gmra.mxu2 %vm517_vm14, %v1010_v29 }
 0xa5a   :  { %v1100_v7 = vpop.f32.mrf.mxu0 }
 0xa5b   :  { %v1106_v8 = vsel %vm882_vm10, %v1100_v7, -inf }
 0xa5c   :  { %1107 = vmax.xlane.f32.xlu0 %v1106_v8 }
 0xa64   :  { %968 = vadd.xlane.f32.xlu0 %v967_v9  ;;  %v1665_v9 = vld [vmem:[#allocation14] sm:$0xff] }
 0xac7   :  { %v1105_v10 = vpop.xlane.xlu2 %1104 }
 0xac8   :  { %v1109_v11 = vsub.f32 %v1098_v3, %v1105_v10 }
 0xaca   :  { %v1111_v53 = vmul.f32 1.442695, %v1109_v11 }
 0xacc   :  { %1768 = vpow2.f32 %v1111_v53  ;;  %v2604_v12 = vpop.f32.mrf.mxu2 }
 0xacd   :  { %1770 = vpow2.f32 %v965_v18 }
 0xacf   :  { %v1108_v21 = vpop.xlane.xlu0 %1107 }
 0xad0   :  { %v1110_v22 = vsub.f32 %v1100_v7, %v1108_v21 }
 0xad2   :  { %v1769_v13 = vpop.eup %1768  ;;  %v1113_v24 = vmul.f32 1.442695, %v1110_v22 }
 0xad3   :  { %v1115_v15 = vsel %vm882_vm10, %v1769_v13, 0.0  ;;  %v1771_v25 = vpop.eup %1770 }
 0xad4   :  { %v2607_v0 = vpop.f32.mrf.mxu2  ;;  %1116 = vadd.xlane.f32.xlu2 %v1115_v15  ;;  %1772 = vpow2.f32 %v1113_v24  ;;  %v970_v26 = vsel %vm882_vm10, %v1771_v25, 0.0 }
 0xad7   :  { %v969_v32 = vpop.xlane.xlu0 %968 }
 0xada   :  { %v1773_v27 = vpop.eup %1772 }
 0xadb   :  { %v1118_v28 = vsel %vm882_vm10, %v1773_v27, 0.0 }
 0xadc   :  { %v1027_v16 = vpop.f32.mrf.mxu2 }
 0xadd   :  { %v1032_v17 = vsel %vm882_vm10, %v1027_v16, -inf }
 0xade   :  { %1033 = vmax.xlane.f32.xlu0 %v1032_v17 }
 0xae4   :  { %v1029_v19 = vpop.f32.mrf.mxu2 }
 0xae5   :  { %v1035_v23 = vsel %vm882_vm10, %v1029_v19, -inf }
 0xae6   :  { %1036 = vmax.xlane.f32.xlu0 %v1035_v23 }
 0xaec   :  { %1126 = vrot.lane.b32.xlu2 %v2572_v4, %s2207_s9 }
 0xaee   :  { %971 = vadd.xlane.f32.xlu0 %v970_v26 }
 0xaf6   :  { %1119 = vadd.xlane.f32.xlu0 %v1118_v28 }
 0xb47   :  { %v1117_v29 = vpop.xlane.xlu2 %1116 }
 0xb4f   :  { %v1127_v33 = vpop.permute.xlu2 %1126 }
 0xb50   :  { %v1132_v35 = vsel %vm912_vm11, %v1127_v33, 0  ;;  %v1807_v33 = vld [vmem:[%s2766_s15 + $0x8] sm:$0xff] }
 0xb51   :  { %v1034_v30 = vpop.xlane.xlu0 %1033  ;;  %1141 = vmatpush.bf16.msrb.mxu1 %v1132_v35 }
 0xb52   :  { %v1038_v20 = vsub.f32 %v1027_v16, %v1034_v30 }
 0xb54   :  { %v1040_v38 = vmul.f32 1.442695, %v1038_v20 }
 0xb56   :  { %1774 = vpow2.f32 %v1040_v38 }
 0xb59   :  { %v1037_v40 = vpop.xlane.xlu0 %1036 }
 0xb5a   :  { %v1039_v41 = vsub.f32 %v1029_v19, %v1037_v40 }
 0xb5c   :  { %v1775_v4 = vpop.eup %1774  ;;  %v1042_v42 = vmul.f32 1.442695, %v1039_v41 }
 0xb5d   :  { %v1044_v43 = vsel %vm882_vm10, %v1775_v4, 0.0 }
 0xb5e   :  { %1776 = vpow2.f32 %v1042_v42  ;;  %1045 = vadd.xlane.f32.xlu0 %v1044_v43 }
 0xb5f   :  { %1778 = vrcp.f32 %v969_v32 }
 0xb61   :  { %v972_v44 = vpop.xlane.xlu0 %971 }
 0xb62   :  { %1780 = vrcp.f32 %v972_v44 }
 0xb64   :  { %v1777_v45 = vpop.eup %1776 }
 0xb65   :  { %v1047_v46 = vsel %vm882_vm10, %v1777_v45, 0.0  ;;  %v1779_v48 = vpop.eup %1778 }
 0xb66   :  { %1048 = vadd.xlane.f32.xlu0 %v1047_v46  ;;  %v975_v51 = vmul.f32 %v1779_v48, %v1767_v39  ;;  %v1666_v39 = vld [vmem:[#allocation14 + $0x8] sm:$0xff] }
 0xb67   :  { %1192 = vmatpush.bf16.msrb.mxu2 %v1666_v39 }
 0xb68   :  { %v1781_v49 = vpop.eup %1780 }
 0xb69   :  { %v976_v55 = vmul.f32 %v1781_v49, %v1771_v25  ;;  %v1120_v57 = vpop.xlane.xlu0 %1119  ;;  %v1723_v25 = vld [vmem:[#allocation16] ss:$0 sm:$0xff] }
 0xb6a   :  { %1782 = vrcp.f32 %v1120_v57 }
 0xb6b   :  { %v977_v56 = vpack.c.bf16 %v976_v55, %v975_v51  ;;  %1784 = vrcp.f32 %v1117_v29  ;;  %1193 = vmatpush.bf16.msrb.mxu2 %v1665_v9 }
 0xb6d   :  { %1598 = vmatmul.msk.bf16.vlgmr.msra.gmra.mxu1 %vm882_vm10, %v977_v56 }
 0xb70   :  { %v1783_v58 = vpop.eup %1782 }
 0xb71   :  { %v1785_v59 = vpop.eup %1784  ;;  %v1124_v31 = vmul.f32 %v1783_v58, %v1773_v27 }
 0xb72   :  { %v1123_v60 = vmul.f32 %v1785_v59, %v1769_v13 }
 0xb74   :  { %v1125_v61 = vpack.c.bf16 %v1124_v31, %v1123_v60 }
 0xb7d   :  { %1602 = vmatmul.msk.bf16.vlgmr.msrb.gmra.mxu1 %vm882_vm10, %v1125_v61 }
 0xbd1   :  { %v1046_v34 = vpop.xlane.xlu0 %1045 }
 0xbd2   :  { %1786 = vrcp.f32 %v1046_v34 }
 0xbd8   :  { %v1787_v63 = vpop.eup %1786 }
 0xbd9   :  { %v1049_v62 = vpop.xlane.xlu0 %1048  ;;  %v1052_v50 = vmul.f32 %v1787_v63, %v1775_v4 }
 0xbda   :  { %1788 = vrcp.f32 %v1049_v62 }
 0xbe0   :  { %v1789_v1 = vpop.eup %1788 }
 0xbe1   :  { %v1053_v36 = vmul.f32 %v1789_v1, %v1777_v45 }
 0xbe3   :  { %v1054_v52 = vpack.c.bf16 %v1053_v36, %v1052_v50  ;;  %v1668_v36 = vld [vmem:[#allocation20 + $0x8] sm:$0xff] }
 0xbe4   :  { %1351 = vmatpush.bf16.msrb.mxu3 %v1668_v36  ;;  %v1676_v36 = vld [vmem:[%s2749_s19 + $0x38] sm:$0xff] }
 0xbe5   :  { %1600 = vmatmul.msk.bf16.vlgmr.msra.gmra.mxu3 %vm882_vm10, %v1054_v52  ;;  %1470 = vmatpush.bf16.msrb.mxu0 %v1676_v36 }
 0xbea   :  { %v995_v2 = vpop.f32.mrf.mxu1 }
 0xbf2   :  { %v997_v3 = vpop.f32.mrf.mxu1 }
 0xbf3   :  { %v1708_v5 = vpack.i.bf16 %v997_v3, %v995_v2 }
 0xbf5   :  { %1709 = vrot.lane.b32.xlu0 %v1708_v5, %s2195_s24  ;;  %v1667_v5 = vld [vmem:[#allocation20] sm:$0xff] }
 0xbf6   :  { %1352 = vmatpush.bf16.msrb.mxu3 %v1667_v5  ;;  %v1670_v5 = vld [vmem:[%s2749_s19 + $0x8] sm:$0xff] }
 0xbfa   :  { %v1143_v6 = vpop.f32.mrf.mxu1 }
 0xc02   :  { %v1145_v7 = vpop.f32.mrf.mxu1 }
 0xc03   :  { %v1713_v8 = vpack.i.bf16 %v1145_v7, %v1143_v6 }
 0xc05   :  { %1714 = vrot.lane.b32.xlu2 %v1713_v8, %s2195_s24 }
 0xc5f   :  { %v1715_v17 = vpop.permute.xlu2 %1714 }
 0xc60   :  { %v1717_v21 = vunpack.i.h.bf16 %v1715_v17  ;;  %v1716_v22 = vunpack.i.l.bf16 %v1715_v17 }
 0xc67   :  { %v1710_v10 = vpop.permute.xlu0 %1709 }
 0xc68   :  { %v1712_v11 = vunpack.i.h.bf16 %v1710_v10  ;;  %v1711_v53 = vunpack.i.l.bf16 %v1710_v10  ;;  %v1073_v16 = vpop.f32.mrf.mxu3 }
 0xc69   :  { %v1156_v23 = vsel %vm517_vm14, %v1073_v16, %v1716_v22 }
 0xc6a   :  { %v1009_v13 = vsel %vm517_vm14, %v2607_v0, %v1712_v11  ;;  %v1008_v15 = vsel %vm517_vm14, %v2604_v12, %v1711_v53  ;;  %v1806_v12 = vld [vmem:[%s2766_s15] sm:$0xff] }
 0xc6b   :  { %v1158_v47 = vpack.c.bf16 %v1009_v13, %v1008_v15 }
 0xc6d   :  { %1611 = vmatmul.msk.bf16.vlgmr.msrb.gmra.mxu2 %vm271_vm0, %v1158_v47 }
 0xc70   :  { %v1075_v18 = vpop.f32.mrf.mxu3 }
 0xc71   :  { %v1157_v19 = vsel %vm517_vm14, %v1075_v18, %v1717_v21 }
 0xc72   :  { %v1159_v24 = vpack.c.bf16 %v1157_v19, %v1156_v23 }
 0xc7d   :  { %1612 = vmatmul.msk.bf16.gmra.mxu2 %vm271_vm0, %v1159_v24 }
 0xcf0   :  { %v1195_v0 = vpop.f32.mrf.mxu2 }
 0xcf1   :  { %v1196_v26 = vadd.f32 %v1723_v25, %v1195_v0 }
 0xcf3   :  { %v2635_v27 = vadd.f32 %v1806_v12, %v1196_v26  ;;  %v1724_v26 = vld [vmem:[#allocation17] ss:$0 sm:$0xff] }
 0xcf5   :  { %v1215_v28 = vsel %vm271_vm0, %v2635_v27, 0.0 }
 0xcf6   :  { %1216 = vadd.xlane.f32.xlu1 %v1215_v28 }
 0xcf8   :  { %v1197_v29 = vpop.f32.mrf.mxu2 }
 0xcf9   :  { %v1198_v32 = vadd.f32 %v1723_v25, %v1197_v29 }
 0xcfb   :  { %v2642_v35 = vadd.f32 %v1807_v33, %v1198_v32 }
 0xcfd   :  { %v1218_v30 = vsel %vm271_vm0, %v2642_v35, 0.0 }
 0xcfe   :  { %1219 = vadd.xlane.f32.xlu2 %v1218_v30 }
 0xd00   :  { %v1200_v20 = vpop.f32.mrf.mxu2 }
 0xd01   :  { %v1201_v38 = vadd.f32 %v1723_v25, %v1200_v20  ;;  %v1725_v20 = vld [vmem:[#allocation19] ss:$0 sm:$0xff] }
 0xd03   :  { %v2647_v40 = vadd.f32 %v1201_v38, %v2495_v54 }
 0xd05   :  { %v1221_v41 = vsel %vm271_vm0, %v2647_v40, 0.0 }
 0xd06   :  { %1222 = vadd.xlane.f32.xlu0 %v1221_v41 }
 0xd08   :  { %v1202_v4 = vpop.f32.mrf.mxu2 }
 0xd09   :  { %v1203_v42 = vadd.f32 %v1723_v25, %v1202_v4 }
 0xd0b   :  { %v2652_v43 = vadd.f32 %v1203_v42, %v2475_v37 }
 0xd0d   :  { %v1224_v44 = vsel %vm271_vm0, %v2652_v43, 0.0 }
 0xd0e   :  { %1225 = vadd.xlane.f32.xlu1 %v1224_v44 }
 0xd69   :  { %v1217_v45 = vpop.xlane.xlu1 %1216 }
 0xd6a   :  { %v1227_v46 = vmul.f32 %v1217_v45, %v2405_v14 }
 0xd6c   :  { %v1231_v48 = vsub.f32 %v2635_v27, %v1227_v46 }
 0xd6e   :  { %v1235_v54 = vmul.f32 %v1231_v48, %v1231_v48 }
 0xd70   :  { %v1239_v49 = vsel %vm271_vm0, %v1235_v54, 0.0 }
 0xd71   :  { %v1220_v51 = vpop.xlane.xlu2 %1219  ;;  %1240 = vadd.xlane.f32.xlu2 %v1239_v49 }
 0xd72   :  { %v1228_v55 = vmul.f32 %v1220_v51, %v2405_v14 }
 0xd74   :  { %v2661_v56 = vsub.f32 %v2642_v35, %v1228_v55 }
 0xd76   :  { %v1236_v37 = vmul.f32 %v2661_v56, %v2661_v56 }
 0xd78   :  { %v1242_v57 = vsel %vm271_vm0, %v1236_v37, 0.0 }
 0xd79   :  { %1243 = vadd.xlane.f32.xlu1 %v1242_v57  ;;  %v1223_v58 = vpop.xlane.xlu0 %1222 }
 0xd7a   :  { %v1229_v59 = vmul.f32 %v1223_v58, %v2405_v14 }
 0xd7c   :  { %v2668_v31 = vsub.f32 %v2647_v40, %v1229_v59 }
 0xd7e   :  { %v1237_v60 = vmul.f32 %v2668_v31, %v2668_v31 }
 0xd80   :  { %v1245_v61 = vsel %vm271_vm0, %v1237_v60, 0.0 }
 0xd81   :  { %1246 = vadd.xlane.f32.xlu2 %v1245_v61  ;;  %v1226_v34 = vpop.xlane.xlu1 %1225 }
 0xd82   :  { %v1230_v62 = vmul.f32 %v1226_v34, %v2405_v14 }
 0xd84   :  { %v2675_v63 = vsub.f32 %v2652_v43, %v1230_v62 }
 0xd86   :  { %v1238_v1 = vmul.f32 %v2675_v63, %v2675_v63 }
 0xd88   :  { %v1248_v50 = vsel %vm271_vm0, %v1238_v1, 0.0 }
 0xd89   :  { %1249 = vadd.xlane.f32.xlu1 %v1248_v50 }
 0xde4   :  { %v1241_v52 = vpop.xlane.xlu2 %1240 }
 0xde5   :  { %v1251_v2 = vmul.f32 %v1241_v52, %v2405_v14  ;;  %v1673_v52 = vld [vmem:[%s2749_s19 + $0x20] sm:$0xff] }
 0xde7   :  { %v1255_v3 = vadd.f32 1e-05, %v1251_v2  ;;  %v1672_v2 = vld [vmem:[%s2749_s19 + $0x18] sm:$0xff] }
 0xde9   :  { %1790 = vrsqrt.f32 %v1255_v3  ;;  %vm1265_vm13 = vweird.f32 %v1255_v3 }
 0xdec   :  { %v1244_v6 = vpop.xlane.xlu1 %1243 }
 0xded   :  { %v1252_v7 = vmul.f32 %v1244_v6, %v2405_v14  ;;  %v1726_v6 = vld [vmem:[#allocation22] ss:$0 sm:$0xff] }
 0xdef   :  { %v1791_v8 = vpop.eup %1790  ;;  %v1256_v39 = vadd.f32 1e-05, %v1252_v7 }
 0xdf0   :  { %v1260_v9 = vmul.f32 %v1791_v8, %v1255_v3  ;;  %vm1266_vm12 = vweird.f32 %v1791_v8  ;;  %v1671_v3 = vld [vmem:[%s2749_s19 + $0x10] sm:$0xff] }
 0xdf1   :  { %1792 = vrsqrt.f32 %v1256_v39  ;;  %vm1267_vm14 = vmor %vm1265_vm13, %vm1266_vm12  ;;  %vm1275_vm1 = vweird.f32 %v1256_v39 }
 0xdf2   :  { %v1261_v10 = vmul.f32 %v1791_v8, %v1260_v9 }
 0xdf4   :  { %v1262_v11 = vmul.f32 0.5, %v1261_v10  ;;  %v1247_v53 = vpop.xlane.xlu2 %1246 }
 0xdf5   :  { %v1253_v13 = vmul.f32 %v1247_v53, %v2405_v14 }
 0xdf6   :  { %v1263_v15 = vsub.f32 1.5, %v1262_v11 }
 0xdf7   :  { %v1793_v47 = vpop.eup %1792  ;;  %v1257_v16 = vadd.f32 1e-05, %v1253_v13 }
 0xdf8   :  { %v1264_v17 = vmul.f32 %v1791_v8, %v1263_v15  ;;  %v1270_v18 = vmul.f32 %v1793_v47, %v1256_v39  ;;  %vm1276_vm15 = vweird.f32 %v1793_v47 }
 0xdf9   :  { %1794 = vrsqrt.f32 %v1257_v16  ;;  %vm1277_vm2 = vmor %vm1275_vm1, %vm1276_vm15  ;;  %vm1285_vm4 = vweird.f32 %v1257_v16 }
 0xdfa   :  { %v1271_v21 = vmul.f32 %v1793_v47, %v1270_v18  ;;  %v1268_v22 = vsel %vm1267_vm14, %v1791_v8, %v1264_v17  ;;  %v1669_v8 = vld [vmem:[%s2749_s19] sm:$0xff] }
 0xdfb   :  { %v1299_v12 = vmul.f32 %v1268_v22, %v1231_v48 }
 0xdfc   :  { %v1272_v19 = vmul.f32 0.5, %v1271_v21  ;;  %v1250_v23 = vpop.xlane.xlu1 %1249 }
 0xdfd   :  { %v1254_v24 = vmul.f32 %v1250_v23, %v2405_v14  ;;  %v1306_v38 = vmul.f32 %v1724_v26, %v1299_v12 }
 0xdfe   :  { %v1273_v25 = vsub.f32 1.5, %v1272_v19 }
 0xdff   :  { %v1795_v0 = vpop.eup %1794  ;;  %v1258_v28 = vadd.f32 1e-05, %v1254_v24  ;;  %v1313_v45 = vadd.f32 %v1725_v20, %v1306_v38 }
 0xe00   :  { %v1274_v29 = vmul.f32 %v1793_v47, %v1273_v25  ;;  %v1280_v32 = vmul.f32 %v1795_v0, %v1257_v16  ;;  %vm1286_vm3 = vweird.f32 %v1795_v0 }
 0xe01   :  { %1796 = vrsqrt.f32 %v1258_v28  ;;  %vm1287_vm5 = vmor %vm1285_vm4, %vm1286_vm3  ;;  %vm1295_vm7 = vweird.f32 %v1258_v28 }
 0xe02   :  { %v1278_v33 = vsel %vm1277_vm2, %v1793_v47, %v1274_v29  ;;  %v1281_v30 = vmul.f32 %v1795_v0, %v1280_v32 }
 0xe03   :  { %v1300_v41 = vmul.f32 %v1278_v33, %v2661_v56 }
 0xe04   :  { %v1282_v4 = vmul.f32 0.5, %v1281_v30 }
 0xe05   :  { %v1307_v42 = vmul.f32 %v1724_v26, %v1300_v41 }
 0xe06   :  { %v1283_v14 = vsub.f32 1.5, %v1282_v4 }
 0xe07   :  { %v1797_v44 = vpop.eup %1796  ;;  %v1314_v46 = vadd.f32 %v1725_v20, %v1307_v42 }
 0xe08   :  { %v1284_v54 = vmul.f32 %v1795_v0, %v1283_v14  ;;  %v1290_v48 = vmul.f32 %v1797_v44, %v1258_v28  ;;  %vm1296_vm6 = vweird.f32 %v1797_v44 }
 0xe09   :  { %v1317_v49 = vpack.c.bf16 %v1314_v46, %v1313_v45  ;;  %vm1297_vm8 = vmor %vm1295_vm7, %vm1296_vm6 }
 0xe0a   :  { %v1291_v51 = vmul.f32 %v1797_v44, %v1290_v48  ;;  %v1288_v55 = vsel %vm1287_vm5, %v1795_v0, %v1284_v54 }
 0xe0b   :  { %1621 = vmatmul.msk.bf16.vlgmr.msrb.gmra.mxu3 %vm271_vm0, %v1317_v49  ;;  %v1301_v56 = vmul.f32 %v1288_v55, %v2668_v31  ;;  %v1675_v31 = vld [vmem:[%s2749_s19 + $0x30] sm:$0xff] }
 0xe0c   :  { %v1292_v37 = vmul.f32 0.5, %v1291_v51  ;;  %1471 = vmatpush.bf16.msrb.mxu0 %v1675_v31 }
 0xe0d   :  { %v1308_v61 = vmul.f32 %v1724_v26, %v1301_v56 }
 0xe0e   :  { %v1293_v57 = vsub.f32 1.5, %v1292_v37 }
 0xe0f   :  { %v1315_v62 = vadd.f32 %v1725_v20, %v1308_v61  ;;  %v1727_v61 = vld [vmem:[%s2750_s20] ss:$0 sm:$0xff]  ;;  %s2211_s20 = smov [#allocation23]  }
 0xe10   :  { %v1294_v58 = vmul.f32 %v1797_v44, %v1293_v57  ;;  %s1501_s22 = sshll.u32 %s2211_s20, 4  ;;  %s1502_s22 = int_to_ptr.vmem [resolvable:$true] %s1501_s22 }
 0xe12   :  { %v1298_v59 = vsel %vm1297_vm8, %v1797_v44, %v1294_v58 }
 0xe13   :  { %v1302_v60 = vmul.f32 %v1298_v59, %v2675_v63  ;;  %v1674_v63 = vld [vmem:[%s2749_s19 + $0x28] sm:$0xff]  ;;  %s2208_s19 = smov [#allocation24]  }
 0xe14   :  { %1472 = vmatpush.bf16.msrb.mxu0 %v1674_v63  ;;  %s1514_s13 = sshll.u32 %s2208_s19, 4  ;;  %s1515_s13 = int_to_ptr.vmem [resolvable:$true] %s1514_s13 }
 0xe15   :  { %v1309_v34 = vmul.f32 %v1724_v26, %v1302_v60  ;;  %1522 = dma.vmem_to_hbm [thread:$0]  %s1515_s13, 256, %s1517_s18, [#allocation25], %s2209_s26, %s2209_s26, %s2210_s28  }
 0xe17   :  { %v1316_v1 = vadd.f32 %v1725_v20, %v1309_v34 }
 0xe18   :  { %1473 = vmatpush.bf16.msrb.mxu0 %v1673_v52 }
 0xe19   :  { %v1318_v50 = vpack.c.bf16 %v1316_v1, %v1315_v62 }
 0xe1b   :  { %1622 = vmatmul.msk.bf16.gmra.mxu3 %vm271_vm0, %v1318_v50 }
 0xe1c   :  { %1474 = vmatpush.bf16.msrb.mxu0 %v1672_v2 }
 0xe20   :  { %1475 = vmatpush.bf16.msrb.mxu0 %v1671_v3 }
 0xe24   :  { %1476 = vmatpush.bf16.msrb.mxu0 %v1670_v5 }
 0xe28   :  { %1477 = vmatpush.bf16.msrb.mxu0 %v1669_v8 }
 0xe8e   :  { %v1354_v7 = vpop.f32.mrf.mxu3 }
 0xe8f   :  { %v1355_v39 = vadd.f32 %v1726_v6, %v1354_v7 }
 0xe91   :  { %v1364_v9 = vmul.f32 %v1355_v39, %v1355_v39 }
 0xe93   :  { %v1368_v10 = vmul.f32 %v1364_v9, %v1355_v39 }
 0xe95   :  { %v1372_v11 = vmul.f32 0.044715, %v1368_v10 }
 0xe96   :  { %v1356_v53 = vpop.f32.mrf.mxu3 }
 0xe97   :  { %v1376_v13 = vadd.f32 %v1372_v11, %v1355_v39  ;;  %v1357_v15 = vadd.f32 %v1726_v6, %v1356_v53 }
 0xe99   :  { %v1380_v47 = vmul.f32 0.7978846, %v1376_v13  ;;  %v1365_v16 = vmul.f32 %v1357_v15, %v1357_v15 }
 0xe9b   :  { %v1369_v17 = vmul.f32 %v1365_v16, %v1357_v15  ;;  %1798 = vtanh.f32 %v1380_v47 }
 0xe9d   :  { %v1373_v18 = vmul.f32 0.044715, %v1369_v17 }
 0xe9e   :  { %v1359_v21 = vpop.f32.mrf.mxu3 }
 0xe9f   :  { %v1377_v22 = vadd.f32 %v1373_v18, %v1357_v15  ;;  %v1360_v19 = vadd.f32 %v1726_v6, %v1359_v21 }
 0xea1   :  { %v1381_v23 = vmul.f32 0.7978846, %v1377_v22  ;;  %v1366_v24 = vmul.f32 %v1360_v19, %v1360_v19  ;;  %v1799_v25 = vpop.eup %1798 }
 0xea2   :  { %v1388_v12 = vadd.f32 1.0, %v1799_v25 }
 0xea3   :  { %1800 = vtanh.f32 %v1381_v23  ;;  %v1370_v0 = vmul.f32 %v1366_v24, %v1360_v19 }
 0xea4   :  { %v1392_v38 = vmul.f32 0.5, %v1388_v12 }
 0xea5   :  { %v1374_v26 = vmul.f32 0.044715, %v1370_v0 }
 0xea6   :  { %v1361_v28 = vpop.f32.mrf.mxu3  ;;  %v1396_v44 = vmul.f32 %v1392_v38, %v1355_v39 }
 0xea7   :  { %v1378_v29 = vadd.f32 %v1374_v26, %v1360_v19  ;;  %v1362_v32 = vadd.f32 %v1726_v6, %v1361_v28 }
 0xea9   :  { %v1801_v33 = vpop.eup %1800  ;;  %v1367_v30 = vmul.f32 %v1362_v32, %v1362_v32  ;;  %v1382_v20 = vmul.f32 0.7978846, %v1378_v29 }
 0xeaa   :  { %v1389_v41 = vadd.f32 1.0, %v1801_v33 }
 0xeab   :  { %v1371_v4 = vmul.f32 %v1367_v30, %v1362_v32  ;;  %1802 = vtanh.f32 %v1382_v20 }
 0xeac   :  { %v1393_v42 = vmul.f32 0.5, %v1389_v41 }
 0xead   :  { %v1375_v14 = vmul.f32 0.044715, %v1371_v4 }
 0xeae   :  { %v1397_v45 = vmul.f32 %v1393_v42, %v1357_v15 }
 0xeaf   :  { %v1379_v46 = vadd.f32 %v1375_v14, %v1362_v32 }
 0xeb0   :  { %v1400_v54 = vpack.c.bf16 %v1397_v45, %v1396_v44 }
 0xeb1   :  { %v1383_v48 = vmul.f32 0.7978846, %v1379_v46  ;;  %v1803_v49 = vpop.eup %1802 }
 0xeb2   :  { %1478 = vmatmul.bf16.vlgmr.msrb.gmra.mxu0 %v1400_v54  ;;  %v1390_v51 = vadd.f32 1.0, %v1803_v49 }
 0xeb3   :  { %1804 = vtanh.f32 %v1383_v48 }
 0xeb4   :  { %v1394_v57 = vmul.f32 0.5, %v1390_v51 }
 0xeb6   :  { %v1398_v58 = vmul.f32 %v1394_v57, %v1360_v19 }
 0xeb9   :  { %v1805_v55 = vpop.eup %1804 }
 0xeba   :  { %v1391_v37 = vadd.f32 1.0, %v1805_v55 }
 0xebc   :  { %v1395_v56 = vmul.f32 0.5, %v1391_v37 }
 0xebe   :  { %v1399_v59 = vmul.f32 %v1395_v56, %v1362_v32 }
 0xec0   :  { %v1401_v60 = vpack.c.bf16 %v1399_v59, %v1398_v58 }
 0xec2   :  { %1483 = vmatmul.bf16.gmra.mxu0 %v1401_v60 }
 0xf2f   :  { %v1479_v34 = vpop.f32.mrf.mxu0 }
 0xf30   :  { %v1480_v62 = vadd.f32 %v1727_v61, %v1479_v34 }
 0xf32   :  { %v1489_v1 = vadd.f32 %v1480_v62, %v2635_v27 }
 0xf34   :  { %1493 = vst.msk [vmem:[#allocation23] sm:$0xff] %vm271_vm0, %v1489_v1 }
 0xf37   :  { %v1481_v50 = vpop.f32.mrf.mxu0 }
 0xf38   :  { %v1482_v36 = vadd.f32 %v1727_v61, %v1481_v50 }
 0xf3a   :  { %v1490_v31 = vadd.f32 %v1482_v36, %v2642_v35 }
 0xf3c   :  { %1494 = vst.msk [vmem:[#allocation23 + $0x8] sm:$0xff] %vm271_vm0, %v1490_v31 }
 0xf3f   :  { %v1484_v63 = vpop.f32.mrf.mxu0 }
 0xf40   :  { %v1485_v52 = vadd.f32 %v1727_v61, %v1484_v63 }
 0xf42   :  { %v1491_v2 = vadd.f32 %v1485_v52, %v2647_v40 }
 0xf44   :  { %1495 = vst.msk [vmem:[#allocation23 + $0x10] sm:$0xff] %vm271_vm0, %v1491_v2 }
 0xf47   :  { %v1486_v3 = vpop.f32.mrf.mxu0 }
 0xf48   :  { %v1487_v27 = vadd.f32 %v1727_v61, %v1486_v3 }
 0xf4a   :  { %v1492_v5 = vadd.f32 %v1487_v27, %v2652_v43 }
 0xf4c   :  { %1496 = vst.msk [vmem:[#allocation23 + $0x18] sm:$0xff] %vm271_vm0, %v1492_v5 }
 0xf4d   :  { %1509 = dma.vmem_to_hbm [thread:$0]  %s1502_s22, 512, %s1504_s0, [#allocation4], %s2209_s26, %s2209_s26, %s2210_s28  }
 0xf4e   :  { %2182 = dma.done.wait [#allocation4], 512  }
 0xf4f   :  { %2183 = vsyncadd [#allocation4], 4294966784 }
 0xf50   :  { %2184 = dma.done.wait [#allocation25], 256  }
 0xf51   :  { %2185 = vsyncadd [#allocation25], 4294967040 }
 0xf52   :  { %1531 = vsyncpa [#allocation3], 1 }
 0xf53   :  { %1532 = vsyncpa [#allocation6], 1 }
 0xf54   :  { %1533 = vsyncpa [#allocation9], 1 }
 0xf55   :  { %1534 = vsyncpa [#allocation12], 1 }
 0xf56   :  { %1535 = vsyncpa [#allocation15], 1 }
 0xf57   :  { %1536 = vsyncpa [#allocation18], 1 }
 0xf58   :  { %1537 = vsyncpa [#allocation21], 1 }
 0xf59   :  { %1538 = vsyncpa [#allocation4], 1 }
 0xf5a   :  { %1539 = vsyncpa [#allocation25], 1 }

</bundles_post_ra>
